<compile_context>
chip_gen: v7x
topology: tpu7x:2x2x1
jax: 0.10.0
libtpu: 0.0.40
codegen_flags: <defaults>
</compile_context>

<pallas_src>
import math

import numpy as np

import jax
import jax.numpy as jnp
from jax import lax
from jax.experimental import pallas as pl
from jax.experimental.pallas import tpu as pltpu


def _make_kernel(B, P, T, I, H, NH, BPP):
    """Build the fused kernel for a static shape config."""
    DH = H // NH
    scale = 1.0 / math.sqrt(DH)
    f32 = jnp.float32

    def kernel(x_ref,
               wi0_ref, wh0_ref, b0_ref,
               wi1_ref, wh1_ref, b1_ref,
               wi2_ref, wh2_ref, b2_ref,
               ln_g_ref, ln_b_ref,
               qw_ref, qb_ref, kw_ref, kb_ref, vw_ref, vb_ref,
               ow_ref, ob_ref,
               fcw_ref, fcb_ref,
               pw_ref,
               mask_ref, tile_ref, sel_ref,
               out_ref):
        # ---- Layer-0 input projection hoisted out of the serial loop -------
        # (T*BPP, I) @ (I, 4H) + bias, done once; per-step slabs are then
        # static, sublane-aligned row slices of this value.
        gates0_all = (jnp.dot(x_ref[...], wi0_ref[...],
                              preferred_element_type=f32) + b0_ref[...])

        wh0 = wh0_ref[...]
        wh1 = wh1_ref[...]
        wh2 = wh2_ref[...]
        wi1 = wi1_ref[...]
        wi2 = wi2_ref[...]
        # Bias broadcasts hoisted once (JAX does not CSE broadcast_in_dim).
        b1f = jnp.broadcast_to(b1_ref[...], (BPP, 4 * H))
        b2f = jnp.broadcast_to(b2_ref[...], (BPP, 4 * H))

        def activate(gates, c_prev):
            # One full-vreg sigmoid covers the i/f/o gates (PyTorch order
            # i, f, g, o); tanh only for the g block and for c_new.
            sig = jax.nn.sigmoid(gates)
            i_g = sig[:, 0:H]
            f_g = sig[:, H:2 * H]
            o_g = sig[:, 3 * H:4 * H]
            g_g = jnp.tanh(gates[:, 2 * H:3 * H])
            c_new = f_g * c_prev + i_g * g_g
            h_new = o_g * jnp.tanh(c_new)
            return h_new, c_new

        zeros = jnp.zeros((BPP, H), f32)
        h0 = c0 = h1 = c1 = h2 = c2 = zeros

        # Static unroll over T: full cross-iteration visibility for the
        # scheduler; the carry is only a handful of vregs so live ranges stay
        # trivially bounded.
        for t in range(T):
            # Recurrent matmuls of all three layers only depend on t-1 state:
            # issue them together so they pipeline on the MXU and overlap the
            # lower layers' EUP work.
            r0 = jnp.dot(h0, wh0, preferred_element_type=f32)
            r1 = jnp.dot(h1, wh1, preferred_element_type=f32)
            r2 = jnp.dot(h2, wh2, preferred_element_type=f32)
            h0, c0 = activate(gates0_all[t * BPP:(t + 1) * BPP, :] + r0, c0)
            h1, c1 = activate(
                jnp.dot(h0, wi1, preferred_element_type=f32) + r1 + b1f, c1)
            h2, c2 = activate(
                jnp.dot(h1, wi2, preferred_element_type=f32) + r2 + b2f, c2)

        # ---- LayerNorm (eps=1e-5, biased variance) over hidden dim ---------
        mean = jnp.mean(h2, axis=-1, keepdims=True)
        var = jnp.mean(jnp.square(h2 - mean), axis=-1, keepdims=True)
        normed = (h2 - mean) * lax.rsqrt(var + 1e-5)
        normed = normed * ln_g_ref[...] + ln_b_ref[...]                 # (BPP, H)

        # ---- Multi-head self-attention over the P pattern tokens -----------
        # Full-slab q/k/v projections: one matmul each for all batches.
        q = jnp.dot(normed, qw_ref[...], preferred_element_type=f32) + qb_ref[...]
        k = jnp.dot(normed, kw_ref[...], preferred_element_type=f32) + kb_ref[...]
        v = jnp.dot(normed, vw_ref[...], preferred_element_type=f32) + vb_ref[...]

        # Per-head scores over the whole BPP row slab; the additive mask kills
        # cross-batch and padding entries, replacing B per-batch matmuls with
        # one per head.
        scores = []
        for hh in range(NH):
            lo = hh * DH
            scores.append(lax.dot_general(
                q[:, lo:lo + DH], k[:, lo:lo + DH],
                (((1,), (1,)), ((), ())),
                preferred_element_type=f32))                            # (BPP, BPP)
        scores_all = jnp.concatenate(scores, axis=0) * scale + mask_ref[...]

        # Single batched softmax across all heads / batches / padding rows.
        m = jnp.max(scores_all, axis=-1, keepdims=True)
        e = jnp.exp(scores_all - m)
        attnw = e / jnp.sum(e, axis=-1, keepdims=True)                  # (NH*BPP, BPP)

        # Context + output projection, accumulated per head (avoids a lane
        # concatenation; ow row blocks are sublane-aligned).
        ow = ow_ref[...]
        attn_out = jnp.broadcast_to(ob_ref[...], (BPP, H))
        for hh in range(NH):
            lo = hh * DH
            ctx_h = jnp.dot(attnw[hh * BPP:(hh + 1) * BPP, :],
                            v[:, lo:lo + DH],
                            preferred_element_type=f32)                 # (BPP, DH)
            attn_out = attn_out + jnp.dot(ctx_h, ow[lo:lo + DH, :],
                                          preferred_element_type=f32)   # (BPP, H)

        # ---- Pattern-mix softmax, aggregation and shared fc (all batches) --
        pwv = pw_ref[...]                                               # (1, P)
        pwv = jnp.exp(pwv - jnp.max(pwv, axis=-1, keepdims=True))
        pwv = pwv / jnp.sum(pwv, axis=-1, keepdims=True)
        w_tiled = jnp.dot(pwv, tile_ref[...], preferred_element_type=f32)  # (1, BPP)
        mix = sel_ref[...] * w_tiled                                    # (B, BPP)
        aggregated = jnp.dot(mix, attn_out, preferred_element_type=f32)  # (B, H)
        out_ref[...] = (jnp.dot(aggregated, fcw_ref[...],
                                preferred_element_type=f32) + fcb_ref[...])  # (B, 1)

    return kernel


def init_params(key, input_size, hidden_size, num_patterns, num_heads):
    """Deterministic synthetic parameters with PyTorch-like shapes, pre-transposed."""
    H, I, P = hidden_size, input_size, num_patterns
    k = 1.0 / math.sqrt(H)
    keys = iter(jax.random.split(key, 32))

    def u(shape):
        return jax.random.uniform(next(keys), shape, jnp.float32, -k, k)

    params = {"num_heads": num_heads}
    in_dims = [I, H, H]
    for l in range(3):
        w_ih = u((4 * H, in_dims[l]))                 # torch: weight_ih_l{l}
        w_hh = u((4 * H, H))                          # torch: weight_hh_l{l}
        b_ih = u((4 * H,))
        b_hh = u((4 * H,))
        params[f"wi{l}"] = w_ih.T                     # (in, 4H)
        params[f"wh{l}"] = w_hh.T                     # (H, 4H)
        params[f"b{l}"] = (b_ih + b_hh).reshape(1, 4 * H)
    params["ln_g"] = jnp.ones((1, H), jnp.float32)    # LayerNorm default init
    params["ln_b"] = jnp.zeros((1, H), jnp.float32)
    in_proj_w = u((3 * H, H))                         # MHA in_proj_weight
    in_proj_b = u((3 * H,))
    params["qw"] = in_proj_w[:H].T
    params["kw"] = in_proj_w[H:2 * H].T
    params["vw"] = in_proj_w[2 * H:].T
    params["qb"] = in_proj_b[:H].reshape(1, H)
    params["kb"] = in_proj_b[H:2 * H].reshape(1, H)
    params["vb"] = in_proj_b[2 * H:].reshape(1, H)
    params["ow"] = u((H, H)).T                        # out_proj.weight^T
    params["ob"] = u((H,)).reshape(1, H)
    params["fcw"] = u((1, H)).T                       # shared_fc.weight^T -> (H, 1)
    params["fcb"] = u((1,)).reshape(1, 1)
    params["pw"] = jnp.ones((1, P), jnp.float32)      # attention_weights = ones(P)
    return params


def siamese_forward(params, inputs):
    """inputs: list of P arrays, each (B, T, I)  ->  combined_pred (B, 1)."""
    P = len(inputs)
    B, T, I = inputs[0].shape
    H = params["ln_g"].shape[-1]
    NH = params["num_heads"]
    BP = B * P
    BPP = ((BP + 7) // 8) * 8          # pad row count to a full sublane tile

    # (B, P, T, I) -> time-major (T, BP, I) with row = b*P + p, padded rows,
    # then flattened so the layer-0 projection is a single matmul and per-step
    # slabs are vreg-aligned static row slices.
    x = jnp.stack([a.astype(jnp.float32) for a in inputs], axis=1)
    x = jnp.transpose(x, (2, 0, 1, 3)).reshape(T, BP, I)
    if BPP != BP:
        x = jnp.pad(x, ((0, 0), (0, BPP - BP), (0, 0)))
    x_flat = x.reshape(T * BPP, I)

    # Static structure constants: batch-block attention mask (tiled over
    # heads), pattern-weight lane-tiling matrix and per-batch row-selection
    # matrix for the aggregation matmul.
    mask = np.full((BPP, BPP), -1e30, dtype=np.float32)
    tile_mat = np.zeros((P, BPP), dtype=np.float32)
    sel_mat = np.zeros((B, BPP), dtype=np.float32)
    for b in range(B):
        mask[b * P:(b + 1) * P, b * P:(b + 1) * P] = 0.0
        sel_mat[b, b * P:(b + 1) * P] = 1.0
        for p in range(P):
            tile_mat[p, b * P + p] = 1.0
    mask_tiled = jnp.asarray(np.tile(mask, (NH, 1)))
    tile_mat = jnp.asarray(tile_mat)
    sel_mat = jnp.asarray(sel_mat)

    args = (
        x_flat,
        params["wi0"], params["wh0"], params["b0"],
        params["wi1"], params["wh1"], params["b1"],
        params["wi2"], params["wh2"], params["b2"],
        params["ln_g"], params["ln_b"],
        params["qw"], params["qb"], params["kw"], params["kb"],
        params["vw"], params["vb"],
        params["ow"], params["ob"],
        params["fcw"], params["fcb"],
        params["pw"],
        mask_tiled, tile_mat, sel_mat,
    )
    kernel = _make_kernel(B, P, T, I, H, NH, BPP)

    DH = H // NH
    flops = int(2 * T * BPP * I * 4 * H            # hoisted layer-0 input projection
                + 2 * T * 5 * BPP * H * 4 * H      # recurrent + inter-layer matmuls
                + 2 * 3 * BPP * H * H              # q/k/v projections
                + 2 * NH * (2 * BPP * BPP * DH + BPP * DH * H)
                + 2 * B * BPP * H + 2 * B * H)
    trans = int(T * 3 * BPP * 6 * H + NH * BPP * BPP + P)
    nbytes = int(sum(int(np.prod(a.shape)) * 4 for a in args) + B * 4)

    return pl.pallas_call(
        kernel,
        out_shape=jax.ShapeDtypeStruct((B, 1), jnp.float32),
        in_specs=[pl.BlockSpec(memory_space=pltpu.MemorySpace.VMEM) for _ in args],
        out_specs=pl.BlockSpec(memory_space=pltpu.MemorySpace.VMEM),
        cost_estimate=pl.CostEstimate(flops=flops, transcendentals=trans,
                                      bytes_accessed=nbytes),
    )(*args)


def reference_forward(params, inputs):
    """Pure-JAX reference mirroring the PyTorch forward (eval mode)."""
    P = len(inputs)
    B, T, I = inputs[0].shape
    H = params["ln_g"].shape[-1]
    NH = params["num_heads"]
    DH = H // NH

    layers = [(params["wi0"], params["wh0"], params["b0"]),
              (params["wi1"], params["wh1"], params["b1"]),
              (params["wi2"], params["wh2"], params["b2"])]

    def run_lstm(x):                                   # x: (B, T, in)
        seq = x
        for (wi, whh, b) in layers:
            def step(carry, x_t):
                h, c = carry
                g = x_t @ wi + h @ whh + b
                i = jax.nn.sigmoid(g[:, :H])
                f = jax.nn.sigmoid(g[:, H:2 * H])
                gg = jnp.tanh(g[:, 2 * H:3 * H])
                o = jax.nn.sigmoid(g[:, 3 * H:])
                c = f * c + i * gg
                h = o * jnp.tanh(c)
                return (h, c), h
            init = (jnp.zeros((B, H)), jnp.zeros((B, H)))
            _, hs = lax.scan(step, init, jnp.swapaxes(seq, 0, 1))
            seq = jnp.swapaxes(hs, 0, 1)               # (B, T, H)
        return seq[:, -1, :]

    branch = []
    for p in range(P):
        last = run_lstm(inputs[p].astype(jnp.float32))
        mean = last.mean(-1, keepdims=True)
        var = ((last - mean) ** 2).mean(-1, keepdims=True)
        n = (last - mean) / jnp.sqrt(var + 1e-5) * params["ln_g"] + params["ln_b"]
        branch.append(n)
    stacked = jnp.stack(branch, axis=1)                # (B, P, H)

    q = stacked @ params["qw"] + params["qb"]
    k = stacked @ params["kw"] + params["kb"]
    v = stacked @ params["vw"] + params["vb"]

    def split_heads(t):
        return t.reshape(B, P, NH, DH).transpose(0, 2, 1, 3)

    qh, kh, vh = split_heads(q), split_heads(k), split_heads(v)
    scores = jnp.einsum("bnpd,bnqd->bnpq", qh, kh) / math.sqrt(DH)
    attnw = jax.nn.softmax(scores, axis=-1)
    ctx = jnp.einsum("bnpq,bnqd->bnpd", attnw, vh)
    ctx = ctx.transpose(0, 2, 1, 3).reshape(B, P, H)
    attn_out = ctx @ params["ow"] + params["ob"]       # (B, P, H)

    w = jax.nn.softmax(params["pw"], axis=-1)[0]       # (P,)
    aggregated = jnp.sum(attn_out * w[None, :, None], axis=1)   # (B, H)
    return aggregated @ params["fcw"] + params["fcb"]  # (B, 1)


if __name__ == "__main__":
    INPUT_SIZE, HIDDEN, NUM_PATTERNS, NUM_HEADS = 8, 32, 3, 4
    BATCH, SEQ = 2, 8

    key = jax.random.PRNGKey(0)
    pkey, xkey = jax.random.split(key)
    params = init_params(pkey, INPUT_SIZE, HIDDEN, NUM_PATTERNS, NUM_HEADS)

    xkeys = jax.random.split(xkey, NUM_PATTERNS)
    inputs = [jax.random.normal(xkeys[p], (BATCH, SEQ, INPUT_SIZE), jnp.float32)
              for p in range(NUM_PATTERNS)]

    out = siamese_forward(params, inputs)
    out = jax.block_until_ready(out)

    ref = reference_forward(params, inputs)
    assert out.shape == (BATCH, 1), out.shape
    assert bool(jnp.all(jnp.isfinite(out)))
    assert bool(jnp.allclose(out, ref, rtol=1e-2, atol=1e-2)), (out, ref)
    print("KERNEL_OK")
</pallas_src>

<mosaic_0001>
module attributes {stable_mosaic.version = 11 : i64} {
  func.func @kernel(%arg0: memref<64x8xf32, #tpu.memory_space<vmem>>, %arg1: memref<8x128xf32, #tpu.memory_space<vmem>>, %arg2: memref<32x128xf32, #tpu.memory_space<vmem>>, %arg3: memref<1x128xf32, #tpu.memory_space<vmem>>, %arg4: memref<32x128xf32, #tpu.memory_space<vmem>>, %arg5: memref<32x128xf32, #tpu.memory_space<vmem>>, %arg6: memref<1x128xf32, #tpu.memory_space<vmem>>, %arg7: memref<32x128xf32, #tpu.memory_space<vmem>>, %arg8: memref<32x128xf32, #tpu.memory_space<vmem>>, %arg9: memref<1x128xf32, #tpu.memory_space<vmem>>, %arg10: memref<1x32xf32, #tpu.memory_space<vmem>>, %arg11: memref<1x32xf32, #tpu.memory_space<vmem>>, %arg12: memref<32x32xf32, #tpu.memory_space<vmem>>, %arg13: memref<1x32xf32, #tpu.memory_space<vmem>>, %arg14: memref<32x32xf32, #tpu.memory_space<vmem>>, %arg15: memref<1x32xf32, #tpu.memory_space<vmem>>, %arg16: memref<32x32xf32, #tpu.memory_space<vmem>>, %arg17: memref<1x32xf32, #tpu.memory_space<vmem>>, %arg18: memref<32x32xf32, #tpu.memory_space<vmem>>, %arg19: memref<1x32xf32, #tpu.memory_space<vmem>>, %arg20: memref<32x1xf32, #tpu.memory_space<vmem>>, %arg21: memref<1x1xf32, #tpu.memory_space<vmem>>, %arg22: memref<1x3xf32, #tpu.memory_space<vmem>>, %arg23: memref<32x8xf32, #tpu.memory_space<vmem>>, %arg24: memref<3x8xf32, #tpu.memory_space<vmem>>, %arg25: memref<2x8xf32, #tpu.memory_space<vmem>>, %arg26: memref<2x1xf32, #tpu.memory_space<vmem>>) attributes {dimension_semantics = [], scalar_prefetch = 0 : i64, scratch_operands = 0 : i64, tpu.core_type = #tpu.core_type<tc>} {
    %c0 = arith.constant 0 : index
    %c0_0 = arith.constant 0 : index
    %0 = vector.load %arg0[%c0, %c0_0] : memref<64x8xf32, #tpu.memory_space<vmem>>, vector<64x8xf32>
    %c0_1 = arith.constant 0 : index
    %c0_2 = arith.constant 0 : index
    %1 = vector.load %arg1[%c0_1, %c0_2] : memref<8x128xf32, #tpu.memory_space<vmem>>, vector<8x128xf32>
    %cst = arith.constant dense<0.000000e+00> : vector<64x128xf32>
    %2 = tpu.matmul %0, %1, %cst {dimension_numbers = #tpu.dot_dimension_numbers<[1], [0], [0], [1], [0, 0, 1, 1], [], []>} : vector<64x8xf32>, vector<8x128xf32>, vector<64x128xf32> -> vector<64x128xf32>
    %c0_3 = arith.constant 0 : index
    %c0_4 = arith.constant 0 : index
    %3 = vector.load %arg3[%c0_3, %c0_4] : memref<1x128xf32, #tpu.memory_space<vmem>>, vector<1x128xf32>
    %4 = vector.broadcast %3 : vector<1x128xf32> to vector<64x128xf32>
    %5 = arith.addf %2, %4 : vector<64x128xf32>
    %c0_5 = arith.constant 0 : index
    %c0_6 = arith.constant 0 : index
    %6 = vector.load %arg2[%c0_5, %c0_6] : memref<32x128xf32, #tpu.memory_space<vmem>>, vector<32x128xf32>
    %c0_7 = arith.constant 0 : index
    %c0_8 = arith.constant 0 : index
    %7 = vector.load %arg5[%c0_7, %c0_8] : memref<32x128xf32, #tpu.memory_space<vmem>>, vector<32x128xf32>
    %c0_9 = arith.constant 0 : index
    %c0_10 = arith.constant 0 : index
    %8 = vector.load %arg8[%c0_9, %c0_10] : memref<32x128xf32, #tpu.memory_space<vmem>>, vector<32x128xf32>
    %c0_11 = arith.constant 0 : index
    %c0_12 = arith.constant 0 : index
    %9 = vector.load %arg4[%c0_11, %c0_12] : memref<32x128xf32, #tpu.memory_space<vmem>>, vector<32x128xf32>
    %c0_13 = arith.constant 0 : index
    %c0_14 = arith.constant 0 : index
    %10 = vector.load %arg7[%c0_13, %c0_14] : memref<32x128xf32, #tpu.memory_space<vmem>>, vector<32x128xf32>
    %c0_15 = arith.constant 0 : index
    %c0_16 = arith.constant 0 : index
    %11 = vector.load %arg6[%c0_15, %c0_16] : memref<1x128xf32, #tpu.memory_space<vmem>>, vector<1x128xf32>
    %12 = vector.shape_cast %11 : vector<1x128xf32> to vector<1x128xf32>
    %13 = vector.broadcast %12 : vector<1x128xf32> to vector<8x128xf32>
    %c0_17 = arith.constant 0 : index
    %c0_18 = arith.constant 0 : index
    %14 = vector.load %arg9[%c0_17, %c0_18] : memref<1x128xf32, #tpu.memory_space<vmem>>, vector<1x128xf32>
    %15 = vector.shape_cast %14 : vector<1x128xf32> to vector<1x128xf32>
    %16 = vector.broadcast %15 : vector<1x128xf32> to vector<8x128xf32>
    %cst_19 = arith.constant 0.000000e+00 : f32
    %17 = vector.broadcast %cst_19 : f32 to vector<8x32xf32>
    %cst_20 = arith.constant dense<0.000000e+00> : vector<8x128xf32>
    %18 = tpu.matmul %17, %6, %cst_20 {dimension_numbers = #tpu.dot_dimension_numbers<[1], [0], [0], [1], [0, 0, 1, 1], [], []>} : vector<8x32xf32>, vector<32x128xf32>, vector<8x128xf32> -> vector<8x128xf32>
    %cst_21 = arith.constant dense<0.000000e+00> : vector<8x128xf32>
    %19 = tpu.matmul %17, %7, %cst_21 {dimension_numbers = #tpu.dot_dimension_numbers<[1], [0], [0], [1], [0, 0, 1, 1], [], []>} : vector<8x32xf32>, vector<32x128xf32>, vector<8x128xf32> -> vector<8x128xf32>
    %cst_22 = arith.constant dense<0.000000e+00> : vector<8x128xf32>
    %20 = tpu.matmul %17, %8, %cst_22 {dimension_numbers = #tpu.dot_dimension_numbers<[1], [0], [0], [1], [0, 0, 1, 1], [], []>} : vector<8x32xf32>, vector<32x128xf32>, vector<8x128xf32> -> vector<8x128xf32>
    %21 = vector.extract_strided_slice %5 {offsets = [0, 0], sizes = [8, 128], strides = [1, 1]} : vector<64x128xf32> to vector<8x128xf32>
    %22 = arith.addf %21, %18 : vector<8x128xf32>
    %23 = arith.negf %22 : vector<8x128xf32>
    %24 = math.exp %23 : vector<8x128xf32>
    %cst_23 = arith.constant 1.000000e+00 : f32
    %25 = vector.broadcast %cst_23 : f32 to vector<8x128xf32>
    %26 = arith.addf %25, %24 : vector<8x128xf32>
    %27 = arith.divf %25, %26 : vector<8x128xf32>
    %28 = vector.extract_strided_slice %27 {offsets = [0, 0], sizes = [8, 32], strides = [1, 1]} : vector<8x128xf32> to vector<8x32xf32>
    %29 = vector.extract_strided_slice %27 {offsets = [0, 32], sizes = [8, 32], strides = [1, 1]} : vector<8x128xf32> to vector<8x32xf32>
    %30 = vector.extract_strided_slice %27 {offsets = [0, 96], sizes = [8, 32], strides = [1, 1]} : vector<8x128xf32> to vector<8x32xf32>
    %31 = vector.extract_strided_slice %22 {offsets = [0, 64], sizes = [8, 32], strides = [1, 1]} : vector<8x128xf32> to vector<8x32xf32>
    %32 = math.tanh %31 : vector<8x32xf32>
    %33 = arith.mulf %29, %17 : vector<8x32xf32>
    %34 = arith.mulf %28, %32 : vector<8x32xf32>
    %35 = arith.addf %33, %34 : vector<8x32xf32>
    %36 = math.tanh %35 : vector<8x32xf32>
    %37 = arith.mulf %30, %36 : vector<8x32xf32>
    %cst_24 = arith.constant dense<0.000000e+00> : vector<8x128xf32>
    %38 = tpu.matmul %37, %9, %cst_24 {dimension_numbers = #tpu.dot_dimension_numbers<[1], [0], [0], [1], [0, 0, 1, 1], [], []>} : vector<8x32xf32>, vector<32x128xf32>, vector<8x128xf32> -> vector<8x128xf32>
    %39 = arith.addf %38, %19 : vector<8x128xf32>
    %40 = arith.addf %39, %13 : vector<8x128xf32>
    %41 = arith.negf %40 : vector<8x128xf32>
    %42 = math.exp %41 : vector<8x128xf32>
    %cst_25 = arith.constant 1.000000e+00 : f32
    %43 = vector.broadcast %cst_25 : f32 to vector<8x128xf32>
    %44 = arith.addf %43, %42 : vector<8x128xf32>
    %45 = arith.divf %43, %44 : vector<8x128xf32>
    %46 = vector.extract_strided_slice %45 {offsets = [0, 0], sizes = [8, 32], strides = [1, 1]} : vector<8x128xf32> to vector<8x32xf32>
    %47 = vector.extract_strided_slice %45 {offsets = [0, 32], sizes = [8, 32], strides = [1, 1]} : vector<8x128xf32> to vector<8x32xf32>
    %48 = vector.extract_strided_slice %45 {offsets = [0, 96], sizes = [8, 32], strides = [1, 1]} : vector<8x128xf32> to vector<8x32xf32>
    %49 = vector.extract_strided_slice %40 {offsets = [0, 64], sizes = [8, 32], strides = [1, 1]} : vector<8x128xf32> to vector<8x32xf32>
    %50 = math.tanh %49 : vector<8x32xf32>
    %51 = arith.mulf %47, %17 : vector<8x32xf32>
    %52 = arith.mulf %46, %50 : vector<8x32xf32>
    %53 = arith.addf %51, %52 : vector<8x32xf32>
    %54 = math.tanh %53 : vector<8x32xf32>
    %55 = arith.mulf %48, %54 : vector<8x32xf32>
    %cst_26 = arith.constant dense<0.000000e+00> : vector<8x128xf32>
    %56 = tpu.matmul %55, %10, %cst_26 {dimension_numbers = #tpu.dot_dimension_numbers<[1], [0], [0], [1], [0, 0, 1, 1], [], []>} : vector<8x32xf32>, vector<32x128xf32>, vector<8x128xf32> -> vector<8x128xf32>
    %57 = arith.addf %56, %20 : vector<8x128xf32>
    %58 = arith.addf %57, %16 : vector<8x128xf32>
    %59 = arith.negf %58 : vector<8x128xf32>
    %60 = math.exp %59 : vector<8x128xf32>
    %cst_27 = arith.constant 1.000000e+00 : f32
    %61 = vector.broadcast %cst_27 : f32 to vector<8x128xf32>
    %62 = arith.addf %61, %60 : vector<8x128xf32>
    %63 = arith.divf %61, %62 : vector<8x128xf32>
    %64 = vector.extract_strided_slice %63 {offsets = [0, 0], sizes = [8, 32], strides = [1, 1]} : vector<8x128xf32> to vector<8x32xf32>
    %65 = vector.extract_strided_slice %63 {offsets = [0, 32], sizes = [8, 32], strides = [1, 1]} : vector<8x128xf32> to vector<8x32xf32>
    %66 = vector.extract_strided_slice %63 {offsets = [0, 96], sizes = [8, 32], strides = [1, 1]} : vector<8x128xf32> to vector<8x32xf32>
    %67 = vector.extract_strided_slice %58 {offsets = [0, 64], sizes = [8, 32], strides = [1, 1]} : vector<8x128xf32> to vector<8x32xf32>
    %68 = math.tanh %67 : vector<8x32xf32>
    %69 = arith.mulf %65, %17 : vector<8x32xf32>
    %70 = arith.mulf %64, %68 : vector<8x32xf32>
    %71 = arith.addf %69, %70 : vector<8x32xf32>
    %72 = math.tanh %71 : vector<8x32xf32>
    %73 = arith.mulf %66, %72 : vector<8x32xf32>
    %cst_28 = arith.constant dense<0.000000e+00> : vector<8x128xf32>
    %74 = tpu.matmul %37, %6, %cst_28 {dimension_numbers = #tpu.dot_dimension_numbers<[1], [0], [0], [1], [0, 0, 1, 1], [], []>} : vector<8x32xf32>, vector<32x128xf32>, vector<8x128xf32> -> vector<8x128xf32>
    %cst_29 = arith.constant dense<0.000000e+00> : vector<8x128xf32>
    %75 = tpu.matmul %55, %7, %cst_29 {dimension_numbers = #tpu.dot_dimension_numbers<[1], [0], [0], [1], [0, 0, 1, 1], [], []>} : vector<8x32xf32>, vector<32x128xf32>, vector<8x128xf32> -> vector<8x128xf32>
    %cst_30 = arith.constant dense<0.000000e+00> : vector<8x128xf32>
    %76 = tpu.matmul %73, %8, %cst_30 {dimension_numbers = #tpu.dot_dimension_numbers<[1], [0], [0], [1], [0, 0, 1, 1], [], []>} : vector<8x32xf32>, vector<32x128xf32>, vector<8x128xf32> -> vector<8x128xf32>
    %77 = vector.extract_strided_slice %5 {offsets = [8, 0], sizes = [8, 128], strides = [1, 1]} : vector<64x128xf32> to vector<8x128xf32>
    %78 = arith.addf %77, %74 : vector<8x128xf32>
    %79 = arith.negf %78 : vector<8x128xf32>
    %80 = math.exp %79 : vector<8x128xf32>
    %cst_31 = arith.constant 1.000000e+00 : f32
    %81 = vector.broadcast %cst_31 : f32 to vector<8x128xf32>
    %82 = arith.addf %81, %80 : vector<8x128xf32>
    %83 = arith.divf %81, %82 : vector<8x128xf32>
    %84 = vector.extract_strided_slice %83 {offsets = [0, 0], sizes = [8, 32], strides = [1, 1]} : vector<8x128xf32> to vector<8x32xf32>
    %85 = vector.extract_strided_slice %83 {offsets = [0, 32], sizes = [8, 32], strides = [1, 1]} : vector<8x128xf32> to vector<8x32xf32>
    %86 = vector.extract_strided_slice %83 {offsets = [0, 96], sizes = [8, 32], strides = [1, 1]} : vector<8x128xf32> to vector<8x32xf32>
    %87 = vector.extract_strided_slice %78 {offsets = [0, 64], sizes = [8, 32], strides = [1, 1]} : vector<8x128xf32> to vector<8x32xf32>
    %88 = math.tanh %87 : vector<8x32xf32>
    %89 = arith.mulf %85, %35 : vector<8x32xf32>
    %90 = arith.mulf %84, %88 : vector<8x32xf32>
    %91 = arith.addf %89, %90 : vector<8x32xf32>
    %92 = math.tanh %91 : vector<8x32xf32>
    %93 = arith.mulf %86, %92 : vector<8x32xf32>
    %cst_32 = arith.constant dense<0.000000e+00> : vector<8x128xf32>
    %94 = tpu.matmul %93, %9, %cst_32 {dimension_numbers = #tpu.dot_dimension_numbers<[1], [0], [0], [1], [0, 0, 1, 1], [], []>} : vector<8x32xf32>, vector<32x128xf32>, vector<8x128xf32> -> vector<8x128xf32>
    %95 = arith.addf %94, %75 : vector<8x128xf32>
    %96 = arith.addf %95, %13 : vector<8x128xf32>
    %97 = arith.negf %96 : vector<8x128xf32>
    %98 = math.exp %97 : vector<8x128xf32>
    %cst_33 = arith.constant 1.000000e+00 : f32
    %99 = vector.broadcast %cst_33 : f32 to vector<8x128xf32>
    %100 = arith.addf %99, %98 : vector<8x128xf32>
    %101 = arith.divf %99, %100 : vector<8x128xf32>
    %102 = vector.extract_strided_slice %101 {offsets = [0, 0], sizes = [8, 32], strides = [1, 1]} : vector<8x128xf32> to vector<8x32xf32>
    %103 = vector.extract_strided_slice %101 {offsets = [0, 32], sizes = [8, 32], strides = [1, 1]} : vector<8x128xf32> to vector<8x32xf32>
    %104 = vector.extract_strided_slice %101 {offsets = [0, 96], sizes = [8, 32], strides = [1, 1]} : vector<8x128xf32> to vector<8x32xf32>
    %105 = vector.extract_strided_slice %96 {offsets = [0, 64], sizes = [8, 32], strides = [1, 1]} : vector<8x128xf32> to vector<8x32xf32>
    %106 = math.tanh %105 : vector<8x32xf32>
    %107 = arith.mulf %103, %53 : vector<8x32xf32>
    %108 = arith.mulf %102, %106 : vector<8x32xf32>
    %109 = arith.addf %107, %108 : vector<8x32xf32>
    %110 = math.tanh %109 : vector<8x32xf32>
    %111 = arith.mulf %104, %110 : vector<8x32xf32>
    %cst_34 = arith.constant dense<0.000000e+00> : vector<8x128xf32>
    %112 = tpu.matmul %111, %10, %cst_34 {dimension_numbers = #tpu.dot_dimension_numbers<[1], [0], [0], [1], [0, 0, 1, 1], [], []>} : vector<8x32xf32>, vector<32x128xf32>, vector<8x128xf32> -> vector<8x128xf32>
    %113 = arith.addf %112, %76 : vector<8x128xf32>
    %114 = arith.addf %113, %16 : vector<8x128xf32>
    %115 = arith.negf %114 : vector<8x128xf32>
    %116 = math.exp %115 : vector<8x128xf32>
    %cst_35 = arith.constant 1.000000e+00 : f32
    %117 = vector.broadcast %cst_35 : f32 to vector<8x128xf32>
    %118 = arith.addf %117, %116 : vector<8x128xf32>
    %119 = arith.divf %117, %118 : vector<8x128xf32>
    %120 = vector.extract_strided_slice %119 {offsets = [0, 0], sizes = [8, 32], strides = [1, 1]} : vector<8x128xf32> to vector<8x32xf32>
    %121 = vector.extract_strided_slice %119 {offsets = [0, 32], sizes = [8, 32], strides = [1, 1]} : vector<8x128xf32> to vector<8x32xf32>
    %122 = vector.extract_strided_slice %119 {offsets = [0, 96], sizes = [8, 32], strides = [1, 1]} : vector<8x128xf32> to vector<8x32xf32>
    %123 = vector.extract_strided_slice %114 {offsets = [0, 64], sizes = [8, 32], strides = [1, 1]} : vector<8x128xf32> to vector<8x32xf32>
    %124 = math.tanh %123 : vector<8x32xf32>
    %125 = arith.mulf %121, %71 : vector<8x32xf32>
    %126 = arith.mulf %120, %124 : vector<8x32xf32>
    %127 = arith.addf %125, %126 : vector<8x32xf32>
    %128 = math.tanh %127 : vector<8x32xf32>
    %129 = arith.mulf %122, %128 : vector<8x32xf32>
    %cst_36 = arith.constant dense<0.000000e+00> : vector<8x128xf32>
    %130 = tpu.matmul %93, %6, %cst_36 {dimension_numbers = #tpu.dot_dimension_numbers<[1], [0], [0], [1], [0, 0, 1, 1], [], []>} : vector<8x32xf32>, vector<32x128xf32>, vector<8x128xf32> -> vector<8x128xf32>
    %cst_37 = arith.constant dense<0.000000e+00> : vector<8x128xf32>
    %131 = tpu.matmul %111, %7, %cst_37 {dimension_numbers = #tpu.dot_dimension_numbers<[1], [0], [0], [1], [0, 0, 1, 1], [], []>} : vector<8x32xf32>, vector<32x128xf32>, vector<8x128xf32> -> vector<8x128xf32>
    %cst_38 = arith.constant dense<0.000000e+00> : vector<8x128xf32>
    %132 = tpu.matmul %129, %8, %cst_38 {dimension_numbers = #tpu.dot_dimension_numbers<[1], [0], [0], [1], [0, 0, 1, 1], [], []>} : vector<8x32xf32>, vector<32x128xf32>, vector<8x128xf32> -> vector<8x128xf32>
    %133 = vector.extract_strided_slice %5 {offsets = [16, 0], sizes = [8, 128], strides = [1, 1]} : vector<64x128xf32> to vector<8x128xf32>
    %134 = arith.addf %133, %130 : vector<8x128xf32>
    %135 = arith.negf %134 : vector<8x128xf32>
    %136 = math.exp %135 : vector<8x128xf32>
    %cst_39 = arith.constant 1.000000e+00 : f32
    %137 = vector.broadcast %cst_39 : f32 to vector<8x128xf32>
    %138 = arith.addf %137, %136 : vector<8x128xf32>
    %139 = arith.divf %137, %138 : vector<8x128xf32>
    %140 = vector.extract_strided_slice %139 {offsets = [0, 0], sizes = [8, 32], strides = [1, 1]} : vector<8x128xf32> to vector<8x32xf32>
    %141 = vector.extract_strided_slice %139 {offsets = [0, 32], sizes = [8, 32], strides = [1, 1]} : vector<8x128xf32> to vector<8x32xf32>
    %142 = vector.extract_strided_slice %139 {offsets = [0, 96], sizes = [8, 32], strides = [1, 1]} : vector<8x128xf32> to vector<8x32xf32>
    %143 = vector.extract_strided_slice %134 {offsets = [0, 64], sizes = [8, 32], strides = [1, 1]} : vector<8x128xf32> to vector<8x32xf32>
    %144 = math.tanh %143 : vector<8x32xf32>
    %145 = arith.mulf %141, %91 : vector<8x32xf32>
    %146 = arith.mulf %140, %144 : vector<8x32xf32>
    %147 = arith.addf %145, %146 : vector<8x32xf32>
    %148 = math.tanh %147 : vector<8x32xf32>
    %149 = arith.mulf %142, %148 : vector<8x32xf32>
    %cst_40 = arith.constant dense<0.000000e+00> : vector<8x128xf32>
    %150 = tpu.matmul %149, %9, %cst_40 {dimension_numbers = #tpu.dot_dimension_numbers<[1], [0], [0], [1], [0, 0, 1, 1], [], []>} : vector<8x32xf32>, vector<32x128xf32>, vector<8x128xf32> -> vector<8x128xf32>
    %151 = arith.addf %150, %131 : vector<8x128xf32>
    %152 = arith.addf %151, %13 : vector<8x128xf32>
    %153 = arith.negf %152 : vector<8x128xf32>
    %154 = math.exp %153 : vector<8x128xf32>
    %cst_41 = arith.constant 1.000000e+00 : f32
    %155 = vector.broadcast %cst_41 : f32 to vector<8x128xf32>
    %156 = arith.addf %155, %154 : vector<8x128xf32>
    %157 = arith.divf %155, %156 : vector<8x128xf32>
    %158 = vector.extract_strided_slice %157 {offsets = [0, 0], sizes = [8, 32], strides = [1, 1]} : vector<8x128xf32> to vector<8x32xf32>
    %159 = vector.extract_strided_slice %157 {offsets = [0, 32], sizes = [8, 32], strides = [1, 1]} : vector<8x128xf32> to vector<8x32xf32>
    %160 = vector.extract_strided_slice %157 {offsets = [0, 96], sizes = [8, 32], strides = [1, 1]} : vector<8x128xf32> to vector<8x32xf32>
    %161 = vector.extract_strided_slice %152 {offsets = [0, 64], sizes = [8, 32], strides = [1, 1]} : vector<8x128xf32> to vector<8x32xf32>
    %162 = math.tanh %161 : vector<8x32xf32>
    %163 = arith.mulf %159, %109 : vector<8x32xf32>
    %164 = arith.mulf %158, %162 : vector<8x32xf32>
    %165 = arith.addf %163, %164 : vector<8x32xf32>
    %166 = math.tanh %165 : vector<8x32xf32>
    %167 = arith.mulf %160, %166 : vector<8x32xf32>
    %cst_42 = arith.constant dense<0.000000e+00> : vector<8x128xf32>
    %168 = tpu.matmul %167, %10, %cst_42 {dimension_numbers = #tpu.dot_dimension_numbers<[1], [0], [0], [1], [0, 0, 1, 1], [], []>} : vector<8x32xf32>, vector<32x128xf32>, vector<8x128xf32> -> vector<8x128xf32>
    %169 = arith.addf %168, %132 : vector<8x128xf32>
    %170 = arith.addf %169, %16 : vector<8x128xf32>
    %171 = arith.negf %170 : vector<8x128xf32>
    %172 = math.exp %171 : vector<8x128xf32>
    %cst_43 = arith.constant 1.000000e+00 : f32
    %173 = vector.broadcast %cst_43 : f32 to vector<8x128xf32>
    %174 = arith.addf %173, %172 : vector<8x128xf32>
    %175 = arith.divf %173, %174 : vector<8x128xf32>
    %176 = vector.extract_strided_slice %175 {offsets = [0, 0], sizes = [8, 32], strides = [1, 1]} : vector<8x128xf32> to vector<8x32xf32>
    %177 = vector.extract_strided_slice %175 {offsets = [0, 32], sizes = [8, 32], strides = [1, 1]} : vector<8x128xf32> to vector<8x32xf32>
    %178 = vector.extract_strided_slice %175 {offsets = [0, 96], sizes = [8, 32], strides = [1, 1]} : vector<8x128xf32> to vector<8x32xf32>
    %179 = vector.extract_strided_slice %170 {offsets = [0, 64], sizes = [8, 32], strides = [1, 1]} : vector<8x128xf32> to vector<8x32xf32>
    %180 = math.tanh %179 : vector<8x32xf32>
    %181 = arith.mulf %177, %127 : vector<8x32xf32>
    %182 = arith.mulf %176, %180 : vector<8x32xf32>
    %183 = arith.addf %181, %182 : vector<8x32xf32>
    %184 = math.tanh %183 : vector<8x32xf32>
    %185 = arith.mulf %178, %184 : vector<8x32xf32>
    %cst_44 = arith.constant dense<0.000000e+00> : vector<8x128xf32>
    %186 = tpu.matmul %149, %6, %cst_44 {dimension_numbers = #tpu.dot_dimension_numbers<[1], [0], [0], [1], [0, 0, 1, 1], [], []>} : vector<8x32xf32>, vector<32x128xf32>, vector<8x128xf32> -> vector<8x128xf32>
    %cst_45 = arith.constant dense<0.000000e+00> : vector<8x128xf32>
    %187 = tpu.matmul %167, %7, %cst_45 {dimension_numbers = #tpu.dot_dimension_numbers<[1], [0], [0], [1], [0, 0, 1, 1], [], []>} : vector<8x32xf32>, vector<32x128xf32>, vector<8x128xf32> -> vector<8x128xf32>
    %cst_46 = arith.constant dense<0.000000e+00> : vector<8x128xf32>
    %188 = tpu.matmul %185, %8, %cst_46 {dimension_numbers = #tpu.dot_dimension_numbers<[1], [0], [0], [1], [0, 0, 1, 1], [], []>} : vector<8x32xf32>, vector<32x128xf32>, vector<8x128xf32> -> vector<8x128xf32>
    %189 = vector.extract_strided_slice %5 {offsets = [24, 0], sizes = [8, 128], strides = [1, 1]} : vector<64x128xf32> to vector<8x128xf32>
    %190 = arith.addf %189, %186 : vector<8x128xf32>
    %191 = arith.negf %190 : vector<8x128xf32>
    %192 = math.exp %191 : vector<8x128xf32>
    %cst_47 = arith.constant 1.000000e+00 : f32
    %193 = vector.broadcast %cst_47 : f32 to vector<8x128xf32>
    %194 = arith.addf %193, %192 : vector<8x128xf32>
    %195 = arith.divf %193, %194 : vector<8x128xf32>
    %196 = vector.extract_strided_slice %195 {offsets = [0, 0], sizes = [8, 32], strides = [1, 1]} : vector<8x128xf32> to vector<8x32xf32>
    %197 = vector.extract_strided_slice %195 {offsets = [0, 32], sizes = [8, 32], strides = [1, 1]} : vector<8x128xf32> to vector<8x32xf32>
    %198 = vector.extract_strided_slice %195 {offsets = [0, 96], sizes = [8, 32], strides = [1, 1]} : vector<8x128xf32> to vector<8x32xf32>
    %199 = vector.extract_strided_slice %190 {offsets = [0, 64], sizes = [8, 32], strides = [1, 1]} : vector<8x128xf32> to vector<8x32xf32>
    %200 = math.tanh %199 : vector<8x32xf32>
    %201 = arith.mulf %197, %147 : vector<8x32xf32>
    %202 = arith.mulf %196, %200 : vector<8x32xf32>
    %203 = arith.addf %201, %202 : vector<8x32xf32>
    %204 = math.tanh %203 : vector<8x32xf32>
    %205 = arith.mulf %198, %204 : vector<8x32xf32>
    %cst_48 = arith.constant dense<0.000000e+00> : vector<8x128xf32>
    %206 = tpu.matmul %205, %9, %cst_48 {dimension_numbers = #tpu.dot_dimension_numbers<[1], [0], [0], [1], [0, 0, 1, 1], [], []>} : vector<8x32xf32>, vector<32x128xf32>, vector<8x128xf32> -> vector<8x128xf32>
    %207 = arith.addf %206, %187 : vector<8x128xf32>
    %208 = arith.addf %207, %13 : vector<8x128xf32>
    %209 = arith.negf %208 : vector<8x128xf32>
    %210 = math.exp %209 : vector<8x128xf32>
    %cst_49 = arith.constant 1.000000e+00 : f32
    %211 = vector.broadcast %cst_49 : f32 to vector<8x128xf32>
    %212 = arith.addf %211, %210 : vector<8x128xf32>
    %213 = arith.divf %211, %212 : vector<8x128xf32>
    %214 = vector.extract_strided_slice %213 {offsets = [0, 0], sizes = [8, 32], strides = [1, 1]} : vector<8x128xf32> to vector<8x32xf32>
    %215 = vector.extract_strided_slice %213 {offsets = [0, 32], sizes = [8, 32], strides = [1, 1]} : vector<8x128xf32> to vector<8x32xf32>
    %216 = vector.extract_strided_slice %213 {offsets = [0, 96], sizes = [8, 32], strides = [1, 1]} : vector<8x128xf32> to vector<8x32xf32>
    %217 = vector.extract_strided_slice %208 {offsets = [0, 64], sizes = [8, 32], strides = [1, 1]} : vector<8x128xf32> to vector<8x32xf32>
    %218 = math.tanh %217 : vector<8x32xf32>
    %219 = arith.mulf %215, %165 : vector<8x32xf32>
    %220 = arith.mulf %214, %218 : vector<8x32xf32>
    %221 = arith.addf %219, %220 : vector<8x32xf32>
    %222 = math.tanh %221 : vector<8x32xf32>
    %223 = arith.mulf %216, %222 : vector<8x32xf32>
    %cst_50 = arith.constant dense<0.000000e+00> : vector<8x128xf32>
    %224 = tpu.matmul %223, %10, %cst_50 {dimension_numbers = #tpu.dot_dimension_numbers<[1], [0], [0], [1], [0, 0, 1, 1], [], []>} : vector<8x32xf32>, vector<32x128xf32>, vector<8x128xf32> -> vector<8x128xf32>
    %225 = arith.addf %224, %188 : vector<8x128xf32>
    %226 = arith.addf %225, %16 : vector<8x128xf32>
    %227 = arith.negf %226 : vector<8x128xf32>
    %228 = math.exp %227 : vector<8x128xf32>
    %cst_51 = arith.constant 1.000000e+00 : f32
    %229 = vector.broadcast %cst_51 : f32 to vector<8x128xf32>
    %230 = arith.addf %229, %228 : vector<8x128xf32>
    %231 = arith.divf %229, %230 : vector<8x128xf32>
    %232 = vector.extract_strided_slice %231 {offsets = [0, 0], sizes = [8, 32], strides = [1, 1]} : vector<8x128xf32> to vector<8x32xf32>
    %233 = vector.extract_strided_slice %231 {offsets = [0, 32], sizes = [8, 32], strides = [1, 1]} : vector<8x128xf32> to vector<8x32xf32>
    %234 = vector.extract_strided_slice %231 {offsets = [0, 96], sizes = [8, 32], strides = [1, 1]} : vector<8x128xf32> to vector<8x32xf32>
    %235 = vector.extract_strided_slice %226 {offsets = [0, 64], sizes = [8, 32], strides = [1, 1]} : vector<8x128xf32> to vector<8x32xf32>
    %236 = math.tanh %235 : vector<8x32xf32>
    %237 = arith.mulf %233, %183 : vector<8x32xf32>
    %238 = arith.mulf %232, %236 : vector<8x32xf32>
    %239 = arith.addf %237, %238 : vector<8x32xf32>
    %240 = math.tanh %239 : vector<8x32xf32>
    %241 = arith.mulf %234, %240 : vector<8x32xf32>
    %cst_52 = arith.constant dense<0.000000e+00> : vector<8x128xf32>
    %242 = tpu.matmul %205, %6, %cst_52 {dimension_numbers = #tpu.dot_dimension_numbers<[1], [0], [0], [1], [0, 0, 1, 1], [], []>} : vector<8x32xf32>, vector<32x128xf32>, vector<8x128xf32> -> vector<8x128xf32>
    %cst_53 = arith.constant dense<0.000000e+00> : vector<8x128xf32>
    %243 = tpu.matmul %223, %7, %cst_53 {dimension_numbers = #tpu.dot_dimension_numbers<[1], [0], [0], [1], [0, 0, 1, 1], [], []>} : vector<8x32xf32>, vector<32x128xf32>, vector<8x128xf32> -> vector<8x128xf32>
    %cst_54 = arith.constant dense<0.000000e+00> : vector<8x128xf32>
    %244 = tpu.matmul %241, %8, %cst_54 {dimension_numbers = #tpu.dot_dimension_numbers<[1], [0], [0], [1], [0, 0, 1, 1], [], []>} : vector<8x32xf32>, vector<32x128xf32>, vector<8x128xf32> -> vector<8x128xf32>
    %245 = vector.extract_strided_slice %5 {offsets = [32, 0], sizes = [8, 128], strides = [1, 1]} : vector<64x128xf32> to vector<8x128xf32>
    %246 = arith.addf %245, %242 : vector<8x128xf32>
    %247 = arith.negf %246 : vector<8x128xf32>
    %248 = math.exp %247 : vector<8x128xf32>
    %cst_55 = arith.constant 1.000000e+00 : f32
    %249 = vector.broadcast %cst_55 : f32 to vector<8x128xf32>
    %250 = arith.addf %249, %248 : vector<8x128xf32>
    %251 = arith.divf %249, %250 : vector<8x128xf32>
    %252 = vector.extract_strided_slice %251 {offsets = [0, 0], sizes = [8, 32], strides = [1, 1]} : vector<8x128xf32> to vector<8x32xf32>
    %253 = vector.extract_strided_slice %251 {offsets = [0, 32], sizes = [8, 32], strides = [1, 1]} : vector<8x128xf32> to vector<8x32xf32>
    %254 = vector.extract_strided_slice %251 {offsets = [0, 96], sizes = [8, 32], strides = [1, 1]} : vector<8x128xf32> to vector<8x32xf32>
    %255 = vector.extract_strided_slice %246 {offsets = [0, 64], sizes = [8, 32], strides = [1, 1]} : vector<8x128xf32> to vector<8x32xf32>
    %256 = math.tanh %255 : vector<8x32xf32>
    %257 = arith.mulf %253, %203 : vector<8x32xf32>
    %258 = arith.mulf %252, %256 : vector<8x32xf32>
    %259 = arith.addf %257, %258 : vector<8x32xf32>
    %260 = math.tanh %259 : vector<8x32xf32>
    %261 = arith.mulf %254, %260 : vector<8x32xf32>
    %cst_56 = arith.constant dense<0.000000e+00> : vector<8x128xf32>
    %262 = tpu.matmul %261, %9, %cst_56 {dimension_numbers = #tpu.dot_dimension_numbers<[1], [0], [0], [1], [0, 0, 1, 1], [], []>} : vector<8x32xf32>, vector<32x128xf32>, vector<8x128xf32> -> vector<8x128xf32>
    %263 = arith.addf %262, %243 : vector<8x128xf32>
    %264 = arith.addf %263, %13 : vector<8x128xf32>
    %265 = arith.negf %264 : vector<8x128xf32>
    %266 = math.exp %265 : vector<8x128xf32>
    %cst_57 = arith.constant 1.000000e+00 : f32
    %267 = vector.broadcast %cst_57 : f32 to vector<8x128xf32>
    %268 = arith.addf %267, %266 : vector<8x128xf32>
    %269 = arith.divf %267, %268 : vector<8x128xf32>
    %270 = vector.extract_strided_slice %269 {offsets = [0, 0], sizes = [8, 32], strides = [1, 1]} : vector<8x128xf32> to vector<8x32xf32>
    %271 = vector.extract_strided_slice %269 {offsets = [0, 32], sizes = [8, 32], strides = [1, 1]} : vector<8x128xf32> to vector<8x32xf32>
    %272 = vector.extract_strided_slice %269 {offsets = [0, 96], sizes = [8, 32], strides = [1, 1]} : vector<8x128xf32> to vector<8x32xf32>
    %273 = vector.extract_strided_slice %264 {offsets = [0, 64], sizes = [8, 32], strides = [1, 1]} : vector<8x128xf32> to vector<8x32xf32>
    %274 = math.tanh %273 : vector<8x32xf32>
    %275 = arith.mulf %271, %221 : vector<8x32xf32>
    %276 = arith.mulf %270, %274 : vector<8x32xf32>
    %277 = arith.addf %275, %276 : vector<8x32xf32>
    %278 = math.tanh %277 : vector<8x32xf32>
    %279 = arith.mulf %272, %278 : vector<8x32xf32>
    %cst_58 = arith.constant dense<0.000000e+00> : vector<8x128xf32>
    %280 = tpu.matmul %279, %10, %cst_58 {dimension_numbers = #tpu.dot_dimension_numbers<[1], [0], [0], [1], [0, 0, 1, 1], [], []>} : vector<8x32xf32>, vector<32x128xf32>, vector<8x128xf32> -> vector<8x128xf32>
    %281 = arith.addf %280, %244 : vector<8x128xf32>
    %282 = arith.addf %281, %16 : vector<8x128xf32>
    %283 = arith.negf %282 : vector<8x128xf32>
    %284 = math.exp %283 : vector<8x128xf32>
    %cst_59 = arith.constant 1.000000e+00 : f32
    %285 = vector.broadcast %cst_59 : f32 to vector<8x128xf32>
    %286 = arith.addf %285, %284 : vector<8x128xf32>
    %287 = arith.divf %285, %286 : vector<8x128xf32>
    %288 = vector.extract_strided_slice %287 {offsets = [0, 0], sizes = [8, 32], strides = [1, 1]} : vector<8x128xf32> to vector<8x32xf32>
    %289 = vector.extract_strided_slice %287 {offsets = [0, 32], sizes = [8, 32], strides = [1, 1]} : vector<8x128xf32> to vector<8x32xf32>
    %290 = vector.extract_strided_slice %287 {offsets = [0, 96], sizes = [8, 32], strides = [1, 1]} : vector<8x128xf32> to vector<8x32xf32>
    %291 = vector.extract_strided_slice %282 {offsets = [0, 64], sizes = [8, 32], strides = [1, 1]} : vector<8x128xf32> to vector<8x32xf32>
    %292 = math.tanh %291 : vector<8x32xf32>
    %293 = arith.mulf %289, %239 : vector<8x32xf32>
    %294 = arith.mulf %288, %292 : vector<8x32xf32>
    %295 = arith.addf %293, %294 : vector<8x32xf32>
    %296 = math.tanh %295 : vector<8x32xf32>
    %297 = arith.mulf %290, %296 : vector<8x32xf32>
    %cst_60 = arith.constant dense<0.000000e+00> : vector<8x128xf32>
    %298 = tpu.matmul %261, %6, %cst_60 {dimension_numbers = #tpu.dot_dimension_numbers<[1], [0], [0], [1], [0, 0, 1, 1], [], []>} : vector<8x32xf32>, vector<32x128xf32>, vector<8x128xf32> -> vector<8x128xf32>
    %cst_61 = arith.constant dense<0.000000e+00> : vector<8x128xf32>
    %299 = tpu.matmul %279, %7, %cst_61 {dimension_numbers = #tpu.dot_dimension_numbers<[1], [0], [0], [1], [0, 0, 1, 1], [], []>} : vector<8x32xf32>, vector<32x128xf32>, vector<8x128xf32> -> vector<8x128xf32>
    %cst_62 = arith.constant dense<0.000000e+00> : vector<8x128xf32>
    %300 = tpu.matmul %297, %8, %cst_62 {dimension_numbers = #tpu.dot_dimension_numbers<[1], [0], [0], [1], [0, 0, 1, 1], [], []>} : vector<8x32xf32>, vector<32x128xf32>, vector<8x128xf32> -> vector<8x128xf32>
    %301 = vector.extract_strided_slice %5 {offsets = [40, 0], sizes = [8, 128], strides = [1, 1]} : vector<64x128xf32> to vector<8x128xf32>
    %302 = arith.addf %301, %298 : vector<8x128xf32>
    %303 = arith.negf %302 : vector<8x128xf32>
    %304 = math.exp %303 : vector<8x128xf32>
    %cst_63 = arith.constant 1.000000e+00 : f32
    %305 = vector.broadcast %cst_63 : f32 to vector<8x128xf32>
    %306 = arith.addf %305, %304 : vector<8x128xf32>
    %307 = arith.divf %305, %306 : vector<8x128xf32>
    %308 = vector.extract_strided_slice %307 {offsets = [0, 0], sizes = [8, 32], strides = [1, 1]} : vector<8x128xf32> to vector<8x32xf32>
    %309 = vector.extract_strided_slice %307 {offsets = [0, 32], sizes = [8, 32], strides = [1, 1]} : vector<8x128xf32> to vector<8x32xf32>
    %310 = vector.extract_strided_slice %307 {offsets = [0, 96], sizes = [8, 32], strides = [1, 1]} : vector<8x128xf32> to vector<8x32xf32>
    %311 = vector.extract_strided_slice %302 {offsets = [0, 64], sizes = [8, 32], strides = [1, 1]} : vector<8x128xf32> to vector<8x32xf32>
    %312 = math.tanh %311 : vector<8x32xf32>
    %313 = arith.mulf %309, %259 : vector<8x32xf32>
    %314 = arith.mulf %308, %312 : vector<8x32xf32>
    %315 = arith.addf %313, %314 : vector<8x32xf32>
    %316 = math.tanh %315 : vector<8x32xf32>
    %317 = arith.mulf %310, %316 : vector<8x32xf32>
    %cst_64 = arith.constant dense<0.000000e+00> : vector<8x128xf32>
    %318 = tpu.matmul %317, %9, %cst_64 {dimension_numbers = #tpu.dot_dimension_numbers<[1], [0], [0], [1], [0, 0, 1, 1], [], []>} : vector<8x32xf32>, vector<32x128xf32>, vector<8x128xf32> -> vector<8x128xf32>
    %319 = arith.addf %318, %299 : vector<8x128xf32>
    %320 = arith.addf %319, %13 : vector<8x128xf32>
    %321 = arith.negf %320 : vector<8x128xf32>
    %322 = math.exp %321 : vector<8x128xf32>
    %cst_65 = arith.constant 1.000000e+00 : f32
    %323 = vector.broadcast %cst_65 : f32 to vector<8x128xf32>
    %324 = arith.addf %323, %322 : vector<8x128xf32>
    %325 = arith.divf %323, %324 : vector<8x128xf32>
    %326 = vector.extract_strided_slice %325 {offsets = [0, 0], sizes = [8, 32], strides = [1, 1]} : vector<8x128xf32> to vector<8x32xf32>
    %327 = vector.extract_strided_slice %325 {offsets = [0, 32], sizes = [8, 32], strides = [1, 1]} : vector<8x128xf32> to vector<8x32xf32>
    %328 = vector.extract_strided_slice %325 {offsets = [0, 96], sizes = [8, 32], strides = [1, 1]} : vector<8x128xf32> to vector<8x32xf32>
    %329 = vector.extract_strided_slice %320 {offsets = [0, 64], sizes = [8, 32], strides = [1, 1]} : vector<8x128xf32> to vector<8x32xf32>
    %330 = math.tanh %329 : vector<8x32xf32>
    %331 = arith.mulf %327, %277 : vector<8x32xf32>
    %332 = arith.mulf %326, %330 : vector<8x32xf32>
    %333 = arith.addf %331, %332 : vector<8x32xf32>
    %334 = math.tanh %333 : vector<8x32xf32>
    %335 = arith.mulf %328, %334 : vector<8x32xf32>
    %cst_66 = arith.constant dense<0.000000e+00> : vector<8x128xf32>
    %336 = tpu.matmul %335, %10, %cst_66 {dimension_numbers = #tpu.dot_dimension_numbers<[1], [0], [0], [1], [0, 0, 1, 1], [], []>} : vector<8x32xf32>, vector<32x128xf32>, vector<8x128xf32> -> vector<8x128xf32>
    %337 = arith.addf %336, %300 : vector<8x128xf32>
    %338 = arith.addf %337, %16 : vector<8x128xf32>
    %339 = arith.negf %338 : vector<8x128xf32>
    %340 = math.exp %339 : vector<8x128xf32>
    %cst_67 = arith.constant 1.000000e+00 : f32
    %341 = vector.broadcast %cst_67 : f32 to vector<8x128xf32>
    %342 = arith.addf %341, %340 : vector<8x128xf32>
    %343 = arith.divf %341, %342 : vector<8x128xf32>
    %344 = vector.extract_strided_slice %343 {offsets = [0, 0], sizes = [8, 32], strides = [1, 1]} : vector<8x128xf32> to vector<8x32xf32>
    %345 = vector.extract_strided_slice %343 {offsets = [0, 32], sizes = [8, 32], strides = [1, 1]} : vector<8x128xf32> to vector<8x32xf32>
    %346 = vector.extract_strided_slice %343 {offsets = [0, 96], sizes = [8, 32], strides = [1, 1]} : vector<8x128xf32> to vector<8x32xf32>
    %347 = vector.extract_strided_slice %338 {offsets = [0, 64], sizes = [8, 32], strides = [1, 1]} : vector<8x128xf32> to vector<8x32xf32>
    %348 = math.tanh %347 : vector<8x32xf32>
    %349 = arith.mulf %345, %295 : vector<8x32xf32>
    %350 = arith.mulf %344, %348 : vector<8x32xf32>
    %351 = arith.addf %349, %350 : vector<8x32xf32>
    %352 = math.tanh %351 : vector<8x32xf32>
    %353 = arith.mulf %346, %352 : vector<8x32xf32>
    %cst_68 = arith.constant dense<0.000000e+00> : vector<8x128xf32>
    %354 = tpu.matmul %317, %6, %cst_68 {dimension_numbers = #tpu.dot_dimension_numbers<[1], [0], [0], [1], [0, 0, 1, 1], [], []>} : vector<8x32xf32>, vector<32x128xf32>, vector<8x128xf32> -> vector<8x128xf32>
    %cst_69 = arith.constant dense<0.000000e+00> : vector<8x128xf32>
    %355 = tpu.matmul %335, %7, %cst_69 {dimension_numbers = #tpu.dot_dimension_numbers<[1], [0], [0], [1], [0, 0, 1, 1], [], []>} : vector<8x32xf32>, vector<32x128xf32>, vector<8x128xf32> -> vector<8x128xf32>
    %cst_70 = arith.constant dense<0.000000e+00> : vector<8x128xf32>
    %356 = tpu.matmul %353, %8, %cst_70 {dimension_numbers = #tpu.dot_dimension_numbers<[1], [0], [0], [1], [0, 0, 1, 1], [], []>} : vector<8x32xf32>, vector<32x128xf32>, vector<8x128xf32> -> vector<8x128xf32>
    %357 = vector.extract_strided_slice %5 {offsets = [48, 0], sizes = [8, 128], strides = [1, 1]} : vector<64x128xf32> to vector<8x128xf32>
    %358 = arith.addf %357, %354 : vector<8x128xf32>
    %359 = arith.negf %358 : vector<8x128xf32>
    %360 = math.exp %359 : vector<8x128xf32>
    %cst_71 = arith.constant 1.000000e+00 : f32
    %361 = vector.broadcast %cst_71 : f32 to vector<8x128xf32>
    %362 = arith.addf %361, %360 : vector<8x128xf32>
    %363 = arith.divf %361, %362 : vector<8x128xf32>
    %364 = vector.extract_strided_slice %363 {offsets = [0, 0], sizes = [8, 32], strides = [1, 1]} : vector<8x128xf32> to vector<8x32xf32>
    %365 = vector.extract_strided_slice %363 {offsets = [0, 32], sizes = [8, 32], strides = [1, 1]} : vector<8x128xf32> to vector<8x32xf32>
    %366 = vector.extract_strided_slice %363 {offsets = [0, 96], sizes = [8, 32], strides = [1, 1]} : vector<8x128xf32> to vector<8x32xf32>
    %367 = vector.extract_strided_slice %358 {offsets = [0, 64], sizes = [8, 32], strides = [1, 1]} : vector<8x128xf32> to vector<8x32xf32>
    %368 = math.tanh %367 : vector<8x32xf32>
    %369 = arith.mulf %365, %315 : vector<8x32xf32>
    %370 = arith.mulf %364, %368 : vector<8x32xf32>
    %371 = arith.addf %369, %370 : vector<8x32xf32>
    %372 = math.tanh %371 : vector<8x32xf32>
    %373 = arith.mulf %366, %372 : vector<8x32xf32>
    %cst_72 = arith.constant dense<0.000000e+00> : vector<8x128xf32>
    %374 = tpu.matmul %373, %9, %cst_72 {dimension_numbers = #tpu.dot_dimension_numbers<[1], [0], [0], [1], [0, 0, 1, 1], [], []>} : vector<8x32xf32>, vector<32x128xf32>, vector<8x128xf32> -> vector<8x128xf32>
    %375 = arith.addf %374, %355 : vector<8x128xf32>
    %376 = arith.addf %375, %13 : vector<8x128xf32>
    %377 = arith.negf %376 : vector<8x128xf32>
    %378 = math.exp %377 : vector<8x128xf32>
    %cst_73 = arith.constant 1.000000e+00 : f32
    %379 = vector.broadcast %cst_73 : f32 to vector<8x128xf32>
    %380 = arith.addf %379, %378 : vector<8x128xf32>
    %381 = arith.divf %379, %380 : vector<8x128xf32>
    %382 = vector.extract_strided_slice %381 {offsets = [0, 0], sizes = [8, 32], strides = [1, 1]} : vector<8x128xf32> to vector<8x32xf32>
    %383 = vector.extract_strided_slice %381 {offsets = [0, 32], sizes = [8, 32], strides = [1, 1]} : vector<8x128xf32> to vector<8x32xf32>
    %384 = vector.extract_strided_slice %381 {offsets = [0, 96], sizes = [8, 32], strides = [1, 1]} : vector<8x128xf32> to vector<8x32xf32>
    %385 = vector.extract_strided_slice %376 {offsets = [0, 64], sizes = [8, 32], strides = [1, 1]} : vector<8x128xf32> to vector<8x32xf32>
    %386 = math.tanh %385 : vector<8x32xf32>
    %387 = arith.mulf %383, %333 : vector<8x32xf32>
    %388 = arith.mulf %382, %386 : vector<8x32xf32>
    %389 = arith.addf %387, %388 : vector<8x32xf32>
    %390 = math.tanh %389 : vector<8x32xf32>
    %391 = arith.mulf %384, %390 : vector<8x32xf32>
    %cst_74 = arith.constant dense<0.000000e+00> : vector<8x128xf32>
    %392 = tpu.matmul %391, %10, %cst_74 {dimension_numbers = #tpu.dot_dimension_numbers<[1], [0], [0], [1], [0, 0, 1, 1], [], []>} : vector<8x32xf32>, vector<32x128xf32>, vector<8x128xf32> -> vector<8x128xf32>
    %393 = arith.addf %392, %356 : vector<8x128xf32>
    %394 = arith.addf %393, %16 : vector<8x128xf32>
    %395 = arith.negf %394 : vector<8x128xf32>
    %396 = math.exp %395 : vector<8x128xf32>
    %cst_75 = arith.constant 1.000000e+00 : f32
    %397 = vector.broadcast %cst_75 : f32 to vector<8x128xf32>
    %398 = arith.addf %397, %396 : vector<8x128xf32>
    %399 = arith.divf %397, %398 : vector<8x128xf32>
    %400 = vector.extract_strided_slice %399 {offsets = [0, 0], sizes = [8, 32], strides = [1, 1]} : vector<8x128xf32> to vector<8x32xf32>
    %401 = vector.extract_strided_slice %399 {offsets = [0, 32], sizes = [8, 32], strides = [1, 1]} : vector<8x128xf32> to vector<8x32xf32>
    %402 = vector.extract_strided_slice %399 {offsets = [0, 96], sizes = [8, 32], strides = [1, 1]} : vector<8x128xf32> to vector<8x32xf32>
    %403 = vector.extract_strided_slice %394 {offsets = [0, 64], sizes = [8, 32], strides = [1, 1]} : vector<8x128xf32> to vector<8x32xf32>
    %404 = math.tanh %403 : vector<8x32xf32>
    %405 = arith.mulf %401, %351 : vector<8x32xf32>
    %406 = arith.mulf %400, %404 : vector<8x32xf32>
    %407 = arith.addf %405, %406 : vector<8x32xf32>
    %408 = math.tanh %407 : vector<8x32xf32>
    %409 = arith.mulf %402, %408 : vector<8x32xf32>
    %cst_76 = arith.constant dense<0.000000e+00> : vector<8x128xf32>
    %410 = tpu.matmul %373, %6, %cst_76 {dimension_numbers = #tpu.dot_dimension_numbers<[1], [0], [0], [1], [0, 0, 1, 1], [], []>} : vector<8x32xf32>, vector<32x128xf32>, vector<8x128xf32> -> vector<8x128xf32>
    %cst_77 = arith.constant dense<0.000000e+00> : vector<8x128xf32>
    %411 = tpu.matmul %391, %7, %cst_77 {dimension_numbers = #tpu.dot_dimension_numbers<[1], [0], [0], [1], [0, 0, 1, 1], [], []>} : vector<8x32xf32>, vector<32x128xf32>, vector<8x128xf32> -> vector<8x128xf32>
    %cst_78 = arith.constant dense<0.000000e+00> : vector<8x128xf32>
    %412 = tpu.matmul %409, %8, %cst_78 {dimension_numbers = #tpu.dot_dimension_numbers<[1], [0], [0], [1], [0, 0, 1, 1], [], []>} : vector<8x32xf32>, vector<32x128xf32>, vector<8x128xf32> -> vector<8x128xf32>
    %413 = vector.extract_strided_slice %5 {offsets = [56, 0], sizes = [8, 128], strides = [1, 1]} : vector<64x128xf32> to vector<8x128xf32>
    %414 = arith.addf %413, %410 : vector<8x128xf32>
    %415 = arith.negf %414 : vector<8x128xf32>
    %416 = math.exp %415 : vector<8x128xf32>
    %cst_79 = arith.constant 1.000000e+00 : f32
    %417 = vector.broadcast %cst_79 : f32 to vector<8x128xf32>
    %418 = arith.addf %417, %416 : vector<8x128xf32>
    %419 = arith.divf %417, %418 : vector<8x128xf32>
    %420 = vector.extract_strided_slice %419 {offsets = [0, 0], sizes = [8, 32], strides = [1, 1]} : vector<8x128xf32> to vector<8x32xf32>
    %421 = vector.extract_strided_slice %419 {offsets = [0, 32], sizes = [8, 32], strides = [1, 1]} : vector<8x128xf32> to vector<8x32xf32>
    %422 = vector.extract_strided_slice %419 {offsets = [0, 96], sizes = [8, 32], strides = [1, 1]} : vector<8x128xf32> to vector<8x32xf32>
    %423 = vector.extract_strided_slice %414 {offsets = [0, 64], sizes = [8, 32], strides = [1, 1]} : vector<8x128xf32> to vector<8x32xf32>
    %424 = math.tanh %423 : vector<8x32xf32>
    %425 = arith.mulf %421, %371 : vector<8x32xf32>
    %426 = arith.mulf %420, %424 : vector<8x32xf32>
    %427 = arith.addf %425, %426 : vector<8x32xf32>
    %428 = math.tanh %427 : vector<8x32xf32>
    %429 = arith.mulf %422, %428 : vector<8x32xf32>
    %cst_80 = arith.constant dense<0.000000e+00> : vector<8x128xf32>
    %430 = tpu.matmul %429, %9, %cst_80 {dimension_numbers = #tpu.dot_dimension_numbers<[1], [0], [0], [1], [0, 0, 1, 1], [], []>} : vector<8x32xf32>, vector<32x128xf32>, vector<8x128xf32> -> vector<8x128xf32>
    %431 = arith.addf %430, %411 : vector<8x128xf32>
    %432 = arith.addf %431, %13 : vector<8x128xf32>
    %433 = arith.negf %432 : vector<8x128xf32>
    %434 = math.exp %433 : vector<8x128xf32>
    %cst_81 = arith.constant 1.000000e+00 : f32
    %435 = vector.broadcast %cst_81 : f32 to vector<8x128xf32>
    %436 = arith.addf %435, %434 : vector<8x128xf32>
    %437 = arith.divf %435, %436 : vector<8x128xf32>
    %438 = vector.extract_strided_slice %437 {offsets = [0, 0], sizes = [8, 32], strides = [1, 1]} : vector<8x128xf32> to vector<8x32xf32>
    %439 = vector.extract_strided_slice %437 {offsets = [0, 32], sizes = [8, 32], strides = [1, 1]} : vector<8x128xf32> to vector<8x32xf32>
    %440 = vector.extract_strided_slice %437 {offsets = [0, 96], sizes = [8, 32], strides = [1, 1]} : vector<8x128xf32> to vector<8x32xf32>
    %441 = vector.extract_strided_slice %432 {offsets = [0, 64], sizes = [8, 32], strides = [1, 1]} : vector<8x128xf32> to vector<8x32xf32>
    %442 = math.tanh %441 : vector<8x32xf32>
    %443 = arith.mulf %439, %389 : vector<8x32xf32>
    %444 = arith.mulf %438, %442 : vector<8x32xf32>
    %445 = arith.addf %443, %444 : vector<8x32xf32>
    %446 = math.tanh %445 : vector<8x32xf32>
    %447 = arith.mulf %440, %446 : vector<8x32xf32>
    %cst_82 = arith.constant dense<0.000000e+00> : vector<8x128xf32>
    %448 = tpu.matmul %447, %10, %cst_82 {dimension_numbers = #tpu.dot_dimension_numbers<[1], [0], [0], [1], [0, 0, 1, 1], [], []>} : vector<8x32xf32>, vector<32x128xf32>, vector<8x128xf32> -> vector<8x128xf32>
    %449 = arith.addf %448, %412 : vector<8x128xf32>
    %450 = arith.addf %449, %16 : vector<8x128xf32>
    %451 = arith.negf %450 : vector<8x128xf32>
    %452 = math.exp %451 : vector<8x128xf32>
    %cst_83 = arith.constant 1.000000e+00 : f32
    %453 = vector.broadcast %cst_83 : f32 to vector<8x128xf32>
    %454 = arith.addf %453, %452 : vector<8x128xf32>
    %455 = arith.divf %453, %454 : vector<8x128xf32>
    %456 = vector.extract_strided_slice %455 {offsets = [0, 0], sizes = [8, 32], strides = [1, 1]} : vector<8x128xf32> to vector<8x32xf32>
    %457 = vector.extract_strided_slice %455 {offsets = [0, 32], sizes = [8, 32], strides = [1, 1]} : vector<8x128xf32> to vector<8x32xf32>
    %458 = vector.extract_strided_slice %455 {offsets = [0, 96], sizes = [8, 32], strides = [1, 1]} : vector<8x128xf32> to vector<8x32xf32>
    %459 = vector.extract_strided_slice %450 {offsets = [0, 64], sizes = [8, 32], strides = [1, 1]} : vector<8x128xf32> to vector<8x32xf32>
    %460 = math.tanh %459 : vector<8x32xf32>
    %461 = arith.mulf %457, %407 : vector<8x32xf32>
    %462 = arith.mulf %456, %460 : vector<8x32xf32>
    %463 = arith.addf %461, %462 : vector<8x32xf32>
    %464 = math.tanh %463 : vector<8x32xf32>
    %465 = arith.mulf %458, %464 : vector<8x32xf32>
    %cst_84 = arith.constant dense<0.000000e+00> : vector<8xf32>
    %466 = vector.multi_reduction <add>, %465, %cst_84 [1] : vector<8x32xf32> to vector<8xf32>
    %467 = vector.shape_cast %466 : vector<8xf32> to vector<8x1xf32>
    %cst_85 = arith.constant 3.200000e+01 : f32
    %468 = vector.broadcast %cst_85 : f32 to vector<8x1xf32>
    %469 = arith.divf %467, %468 : vector<8x1xf32>
    %470 = vector.broadcast %469 : vector<8x1xf32> to vector<8x32xf32>
    %471 = arith.subf %465, %470 : vector<8x32xf32>
    %472 = arith.mulf %471, %471 : vector<8x32xf32>
    %cst_86 = arith.constant dense<0.000000e+00> : vector<8xf32>
    %473 = vector.multi_reduction <add>, %472, %cst_86 [1] : vector<8x32xf32> to vector<8xf32>
    %474 = vector.shape_cast %473 : vector<8xf32> to vector<8x1xf32>
    %cst_87 = arith.constant 3.200000e+01 : f32
    %475 = vector.broadcast %cst_87 : f32 to vector<8x1xf32>
    %476 = arith.divf %474, %475 : vector<8x1xf32>
    %477 = vector.broadcast %469 : vector<8x1xf32> to vector<8x32xf32>
    %478 = arith.subf %465, %477 : vector<8x32xf32>
    %cst_88 = arith.constant 9.99999974E-6 : f32
    %479 = vector.broadcast %cst_88 : f32 to vector<8x1xf32>
    %480 = arith.addf %476, %479 : vector<8x1xf32>
    %481 = math.rsqrt %480 : vector<8x1xf32>
    %482 = vector.broadcast %481 : vector<8x1xf32> to vector<8x32xf32>
    %483 = arith.mulf %478, %482 : vector<8x32xf32>
    %c0_89 = arith.constant 0 : index
    %c0_90 = arith.constant 0 : index
    %484 = vector.load %arg10[%c0_89, %c0_90] : memref<1x32xf32, #tpu.memory_space<vmem>>, vector<1x32xf32>
    %485 = vector.broadcast %484 : vector<1x32xf32> to vector<8x32xf32>
    %486 = arith.mulf %483, %485 : vector<8x32xf32>
    %c0_91 = arith.constant 0 : index
    %c0_92 = arith.constant 0 : index
    %487 = vector.load %arg11[%c0_91, %c0_92] : memref<1x32xf32, #tpu.memory_space<vmem>>, vector<1x32xf32>
    %488 = vector.broadcast %487 : vector<1x32xf32> to vector<8x32xf32>
    %489 = arith.addf %486, %488 : vector<8x32xf32>
    %c0_93 = arith.constant 0 : index
    %c0_94 = arith.constant 0 : index
    %490 = vector.load %arg12[%c0_93, %c0_94] : memref<32x32xf32, #tpu.memory_space<vmem>>, vector<32x32xf32>
    %cst_95 = arith.constant dense<0.000000e+00> : vector<8x32xf32>
    %491 = tpu.matmul %489, %490, %cst_95 {dimension_numbers = #tpu.dot_dimension_numbers<[1], [0], [0], [1], [0, 0, 1, 1], [], []>} : vector<8x32xf32>, vector<32x32xf32>, vector<8x32xf32> -> vector<8x32xf32>
    %c0_96 = arith.constant 0 : index
    %c0_97 = arith.constant 0 : index
    %492 = vector.load %arg13[%c0_96, %c0_97] : memref<1x32xf32, #tpu.memory_space<vmem>>, vector<1x32xf32>
    %493 = vector.broadcast %492 : vector<1x32xf32> to vector<8x32xf32>
    %494 = arith.addf %491, %493 : vector<8x32xf32>
    %c0_98 = arith.constant 0 : index
    %c0_99 = arith.constant 0 : index
    %495 = vector.load %arg14[%c0_98, %c0_99] : memref<32x32xf32, #tpu.memory_space<vmem>>, vector<32x32xf32>
    %cst_100 = arith.constant dense<0.000000e+00> : vector<8x32xf32>
    %496 = tpu.matmul %489, %495, %cst_100 {dimension_numbers = #tpu.dot_dimension_numbers<[1], [0], [0], [1], [0, 0, 1, 1], [], []>} : vector<8x32xf32>, vector<32x32xf32>, vector<8x32xf32> -> vector<8x32xf32>
    %c0_101 = arith.constant 0 : index
    %c0_102 = arith.constant 0 : index
    %497 = vector.load %arg15[%c0_101, %c0_102] : memref<1x32xf32, #tpu.memory_space<vmem>>, vector<1x32xf32>
    %498 = vector.broadcast %497 : vector<1x32xf32> to vector<8x32xf32>
    %499 = arith.addf %496, %498 : vector<8x32xf32>
    %c0_103 = arith.constant 0 : index
    %c0_104 = arith.constant 0 : index
    %500 = vector.load %arg16[%c0_103, %c0_104] : memref<32x32xf32, #tpu.memory_space<vmem>>, vector<32x32xf32>
    %cst_105 = arith.constant dense<0.000000e+00> : vector<8x32xf32>
    %501 = tpu.matmul %489, %500, %cst_105 {dimension_numbers = #tpu.dot_dimension_numbers<[1], [0], [0], [1], [0, 0, 1, 1], [], []>} : vector<8x32xf32>, vector<32x32xf32>, vector<8x32xf32> -> vector<8x32xf32>
    %c0_106 = arith.constant 0 : index
    %c0_107 = arith.constant 0 : index
    %502 = vector.load %arg17[%c0_106, %c0_107] : memref<1x32xf32, #tpu.memory_space<vmem>>, vector<1x32xf32>
    %503 = vector.broadcast %502 : vector<1x32xf32> to vector<8x32xf32>
    %504 = arith.addf %501, %503 : vector<8x32xf32>
    %505 = vector.extract_strided_slice %494 {offsets = [0, 0], sizes = [8, 8], strides = [1, 1]} : vector<8x32xf32> to vector<8x8xf32>
    %506 = vector.extract_strided_slice %499 {offsets = [0, 0], sizes = [8, 8], strides = [1, 1]} : vector<8x32xf32> to vector<8x8xf32>
    %cst_108 = arith.constant dense<0.000000e+00> : vector<8x8xf32>
    %507 = tpu.matmul %505, %506, %cst_108 {dimension_numbers = #tpu.dot_dimension_numbers<[1], [1], [0], [0], [0, 0, 1, 0], [], []>} : vector<8x8xf32>, vector<8x8xf32>, vector<8x8xf32> -> vector<8x8xf32>
    %508 = vector.extract_strided_slice %494 {offsets = [0, 8], sizes = [8, 8], strides = [1, 1]} : vector<8x32xf32> to vector<8x8xf32>
    %509 = vector.extract_strided_slice %499 {offsets = [0, 8], sizes = [8, 8], strides = [1, 1]} : vector<8x32xf32> to vector<8x8xf32>
    %cst_109 = arith.constant dense<0.000000e+00> : vector<8x8xf32>
    %510 = tpu.matmul %508, %509, %cst_109 {dimension_numbers = #tpu.dot_dimension_numbers<[1], [1], [0], [0], [0, 0, 1, 0], [], []>} : vector<8x8xf32>, vector<8x8xf32>, vector<8x8xf32> -> vector<8x8xf32>
    %511 = vector.extract_strided_slice %494 {offsets = [0, 16], sizes = [8, 8], strides = [1, 1]} : vector<8x32xf32> to vector<8x8xf32>
    %512 = vector.extract_strided_slice %499 {offsets = [0, 16], sizes = [8, 8], strides = [1, 1]} : vector<8x32xf32> to vector<8x8xf32>
    %cst_110 = arith.constant dense<0.000000e+00> : vector<8x8xf32>
    %513 = tpu.matmul %511, %512, %cst_110 {dimension_numbers = #tpu.dot_dimension_numbers<[1], [1], [0], [0], [0, 0, 1, 0], [], []>} : vector<8x8xf32>, vector<8x8xf32>, vector<8x8xf32> -> vector<8x8xf32>
    %514 = vector.extract_strided_slice %494 {offsets = [0, 24], sizes = [8, 8], strides = [1, 1]} : vector<8x32xf32> to vector<8x8xf32>
    %515 = vector.extract_strided_slice %499 {offsets = [0, 24], sizes = [8, 8], strides = [1, 1]} : vector<8x32xf32> to vector<8x8xf32>
    %cst_111 = arith.constant dense<0.000000e+00> : vector<8x8xf32>
    %516 = tpu.matmul %514, %515, %cst_111 {dimension_numbers = #tpu.dot_dimension_numbers<[1], [1], [0], [0], [0, 0, 1, 0], [], []>} : vector<8x8xf32>, vector<8x8xf32>, vector<8x8xf32> -> vector<8x8xf32>
    %517 = tpu.concatenate %507, %510, %513, %516 in 0 : vector<8x8xf32>, vector<8x8xf32>, vector<8x8xf32>, vector<8x8xf32> -> vector<32x8xf32>
    %cst_112 = arith.constant 0.353553385 : f32
    %518 = vector.broadcast %cst_112 : f32 to vector<32x8xf32>
    %519 = arith.mulf %517, %518 : vector<32x8xf32>
    %c0_113 = arith.constant 0 : index
    %c0_114 = arith.constant 0 : index
    %520 = vector.load %arg23[%c0_113, %c0_114] : memref<32x8xf32, #tpu.memory_space<vmem>>, vector<32x8xf32>
    %521 = arith.addf %519, %520 : vector<32x8xf32>
    %cst_115 = arith.constant dense<0xFF800000> : vector<32xf32>
    %522 = vector.multi_reduction <maximumf>, %521, %cst_115 [1] : vector<32x8xf32> to vector<32xf32>
    %523 = vector.shape_cast %522 : vector<32xf32> to vector<32x1xf32>
    %524 = vector.broadcast %523 : vector<32x1xf32> to vector<32x8xf32>
    %525 = arith.subf %521, %524 : vector<32x8xf32>
    %526 = math.exp %525 : vector<32x8xf32>
    %cst_116 = arith.constant dense<0.000000e+00> : vector<32xf32>
    %527 = vector.multi_reduction <add>, %526, %cst_116 [1] : vector<32x8xf32> to vector<32xf32>
    %528 = vector.shape_cast %527 : vector<32xf32> to vector<32x1xf32>
    %529 = vector.broadcast %528 : vector<32x1xf32> to vector<32x8xf32>
    %530 = arith.divf %526, %529 : vector<32x8xf32>
    %c0_117 = arith.constant 0 : index
    %c0_118 = arith.constant 0 : index
    %531 = vector.load %arg18[%c0_117, %c0_118] : memref<32x32xf32, #tpu.memory_space<vmem>>, vector<32x32xf32>
    %c0_119 = arith.constant 0 : index
    %c0_120 = arith.constant 0 : index
    %532 = vector.load %arg19[%c0_119, %c0_120] : memref<1x32xf32, #tpu.memory_space<vmem>>, vector<1x32xf32>
    %533 = vector.shape_cast %532 : vector<1x32xf32> to vector<1x32xf32>
    %534 = vector.broadcast %533 : vector<1x32xf32> to vector<8x32xf32>
    %535 = vector.extract_strided_slice %530 {offsets = [0, 0], sizes = [8, 8], strides = [1, 1]} : vector<32x8xf32> to vector<8x8xf32>
    %536 = vector.extract_strided_slice %504 {offsets = [0, 0], sizes = [8, 8], strides = [1, 1]} : vector<8x32xf32> to vector<8x8xf32>
    %cst_121 = arith.constant dense<0.000000e+00> : vector<8x8xf32>
    %537 = tpu.matmul %535, %536, %cst_121 {dimension_numbers = #tpu.dot_dimension_numbers<[1], [0], [0], [1], [0, 0, 1, 1], [], []>} : vector<8x8xf32>, vector<8x8xf32>, vector<8x8xf32> -> vector<8x8xf32>
    %538 = vector.extract_strided_slice %531 {offsets = [0, 0], sizes = [8, 32], strides = [1, 1]} : vector<32x32xf32> to vector<8x32xf32>
    %cst_122 = arith.constant dense<0.000000e+00> : vector<8x32xf32>
    %539 = tpu.matmul %537, %538, %cst_122 {dimension_numbers = #tpu.dot_dimension_numbers<[1], [0], [0], [1], [0, 0, 1, 1], [], []>} : vector<8x8xf32>, vector<8x32xf32>, vector<8x32xf32> -> vector<8x32xf32>
    %540 = arith.addf %534, %539 : vector<8x32xf32>
    %541 = vector.extract_strided_slice %530 {offsets = [8, 0], sizes = [8, 8], strides = [1, 1]} : vector<32x8xf32> to vector<8x8xf32>
    %542 = vector.extract_strided_slice %504 {offsets = [0, 8], sizes = [8, 8], strides = [1, 1]} : vector<8x32xf32> to vector<8x8xf32>
    %cst_123 = arith.constant dense<0.000000e+00> : vector<8x8xf32>
    %543 = tpu.matmul %541, %542, %cst_123 {dimension_numbers = #tpu.dot_dimension_numbers<[1], [0], [0], [1], [0, 0, 1, 1], [], []>} : vector<8x8xf32>, vector<8x8xf32>, vector<8x8xf32> -> vector<8x8xf32>
    %544 = vector.extract_strided_slice %531 {offsets = [8, 0], sizes = [8, 32], strides = [1, 1]} : vector<32x32xf32> to vector<8x32xf32>
    %cst_124 = arith.constant dense<0.000000e+00> : vector<8x32xf32>
    %545 = tpu.matmul %543, %544, %cst_124 {dimension_numbers = #tpu.dot_dimension_numbers<[1], [0], [0], [1], [0, 0, 1, 1], [], []>} : vector<8x8xf32>, vector<8x32xf32>, vector<8x32xf32> -> vector<8x32xf32>
    %546 = arith.addf %540, %545 : vector<8x32xf32>
    %547 = vector.extract_strided_slice %530 {offsets = [16, 0], sizes = [8, 8], strides = [1, 1]} : vector<32x8xf32> to vector<8x8xf32>
    %548 = vector.extract_strided_slice %504 {offsets = [0, 16], sizes = [8, 8], strides = [1, 1]} : vector<8x32xf32> to vector<8x8xf32>
    %cst_125 = arith.constant dense<0.000000e+00> : vector<8x8xf32>
    %549 = tpu.matmul %547, %548, %cst_125 {dimension_numbers = #tpu.dot_dimension_numbers<[1], [0], [0], [1], [0, 0, 1, 1], [], []>} : vector<8x8xf32>, vector<8x8xf32>, vector<8x8xf32> -> vector<8x8xf32>
    %550 = vector.extract_strided_slice %531 {offsets = [16, 0], sizes = [8, 32], strides = [1, 1]} : vector<32x32xf32> to vector<8x32xf32>
    %cst_126 = arith.constant dense<0.000000e+00> : vector<8x32xf32>
    %551 = tpu.matmul %549, %550, %cst_126 {dimension_numbers = #tpu.dot_dimension_numbers<[1], [0], [0], [1], [0, 0, 1, 1], [], []>} : vector<8x8xf32>, vector<8x32xf32>, vector<8x32xf32> -> vector<8x32xf32>
    %552 = arith.addf %546, %551 : vector<8x32xf32>
    %553 = vector.extract_strided_slice %530 {offsets = [24, 0], sizes = [8, 8], strides = [1, 1]} : vector<32x8xf32> to vector<8x8xf32>
    %554 = vector.extract_strided_slice %504 {offsets = [0, 24], sizes = [8, 8], strides = [1, 1]} : vector<8x32xf32> to vector<8x8xf32>
    %cst_127 = arith.constant dense<0.000000e+00> : vector<8x8xf32>
    %555 = tpu.matmul %553, %554, %cst_127 {dimension_numbers = #tpu.dot_dimension_numbers<[1], [0], [0], [1], [0, 0, 1, 1], [], []>} : vector<8x8xf32>, vector<8x8xf32>, vector<8x8xf32> -> vector<8x8xf32>
    %556 = vector.extract_strided_slice %531 {offsets = [24, 0], sizes = [8, 32], strides = [1, 1]} : vector<32x32xf32> to vector<8x32xf32>
    %cst_128 = arith.constant dense<0.000000e+00> : vector<8x32xf32>
    %557 = tpu.matmul %555, %556, %cst_128 {dimension_numbers = #tpu.dot_dimension_numbers<[1], [0], [0], [1], [0, 0, 1, 1], [], []>} : vector<8x8xf32>, vector<8x32xf32>, vector<8x32xf32> -> vector<8x32xf32>
    %558 = arith.addf %552, %557 : vector<8x32xf32>
    %c0_129 = arith.constant 0 : index
    %c0_130 = arith.constant 0 : index
    %559 = vector.load %arg22[%c0_129, %c0_130] : memref<1x3xf32, #tpu.memory_space<vmem>>, vector<1x3xf32>
    %cst_131 = arith.constant dense<0xFF800000> : vector<1xf32>
    %560 = vector.multi_reduction <maximumf>, %559, %cst_131 [1] : vector<1x3xf32> to vector<1xf32>
    %561 = vector.shape_cast %560 : vector<1xf32> to vector<1x1xf32>
    %562 = vector.broadcast %561 : vector<1x1xf32> to vector<1x3xf32>
    %563 = arith.subf %559, %562 : vector<1x3xf32>
    %564 = math.exp %563 : vector<1x3xf32>
    %cst_132 = arith.constant dense<0.000000e+00> : vector<1xf32>
    %565 = vector.multi_reduction <add>, %564, %cst_132 [1] : vector<1x3xf32> to vector<1xf32>
    %566 = vector.shape_cast %565 : vector<1xf32> to vector<1x1xf32>
    %567 = vector.broadcast %566 : vector<1x1xf32> to vector<1x3xf32>
    %568 = arith.divf %564, %567 : vector<1x3xf32>
    %c0_133 = arith.constant 0 : index
    %c0_134 = arith.constant 0 : index
    %569 = vector.load %arg24[%c0_133, %c0_134] : memref<3x8xf32, #tpu.memory_space<vmem>>, vector<3x8xf32>
    %cst_135 = arith.constant dense<0.000000e+00> : vector<1x8xf32>
    %570 = tpu.matmul %568, %569, %cst_135 {dimension_numbers = #tpu.dot_dimension_numbers<[1], [0], [0], [1], [0, 0, 1, 1], [], []>} : vector<1x3xf32>, vector<3x8xf32>, vector<1x8xf32> -> vector<1x8xf32>
    %c0_136 = arith.constant 0 : index
    %c0_137 = arith.constant 0 : index
    %571 = vector.load %arg25[%c0_136, %c0_137] : memref<2x8xf32, #tpu.memory_space<vmem>>, vector<2x8xf32>
    %572 = vector.broadcast %570 : vector<1x8xf32> to vector<2x8xf32>
    %573 = arith.mulf %571, %572 : vector<2x8xf32>
    %cst_138 = arith.constant dense<0.000000e+00> : vector<2x32xf32>
    %574 = tpu.matmul %573, %558, %cst_138 {dimension_numbers = #tpu.dot_dimension_numbers<[1], [0], [0], [1], [0, 0, 1, 1], [], []>} : vector<2x8xf32>, vector<8x32xf32>, vector<2x32xf32> -> vector<2x32xf32>
    %c0_139 = arith.constant 0 : index
    %c0_140 = arith.constant 0 : index
    %575 = vector.load %arg20[%c0_139, %c0_140] : memref<32x1xf32, #tpu.memory_space<vmem>>, vector<32x1xf32>
    %cst_141 = arith.constant dense<0.000000e+00> : vector<2x1xf32>
    %576 = tpu.matmul %574, %575, %cst_141 {dimension_numbers = #tpu.dot_dimension_numbers<[1], [0], [0], [1], [0, 0, 1, 1], [], []>} : vector<2x32xf32>, vector<32x1xf32>, vector<2x1xf32> -> vector<2x1xf32>
    %c0_142 = arith.constant 0 : index
    %c0_143 = arith.constant 0 : index
    %577 = vector.load %arg21[%c0_142, %c0_143] : memref<1x1xf32, #tpu.memory_space<vmem>>, vector<1x1xf32>
    %578 = vector.broadcast %577 : vector<1x1xf32> to vector<2x1xf32>
    %579 = arith.addf %576, %578 : vector<2x1xf32>
    %c0_144 = arith.constant 0 : index
    %c0_145 = arith.constant 0 : index
    %580 = vector.load %arg26[%c0_144, %c0_145] : memref<2x1xf32, #tpu.memory_space<vmem>>, vector<2x1xf32>
    tpu.vector_store %arg26[%c0_144, %c0_145], %579 {strides = array<i32>} : memref<2x1xf32, #tpu.memory_space<vmem>>, vector<2x1xf32>,
    return
  }
}

</mosaic_0001>

<bundles_post_ra>
// kernel: tpu_custom_call.1
= control target key start
LH: loop header
LB: loop body
LE: loop exit
PB: predicated region body
PF: predicated region fallthrough
CT: control target
= control target key end

     0   :  { %s8198_s0 = inlined_call_operand.vmem [shape: f32[64,8], index: 0, kind: input, shape index: {}]   ;;  %s8199_s1 = inlined_call_operand.hbm [shape: f32[8,128], index: 1, kind: input, shape index: {}]   ;;  %s8200_s2 = inlined_call_operand.vmem [shape: f32[32,128], index: 2, kind: input, shape index: {}]   ;;  %s8201_s3 = inlined_call_operand.hbm [shape: f32[1,128], index: 3, kind: input, shape index: {}]   ;;  %s8202_s4 = inlined_call_operand.vmem [shape: f32[32,128], index: 4, kind: input, shape index: {}]   ;;  %s8203_s5 = inlined_call_operand.vmem [shape: f32[32,128], index: 5, kind: input, shape index: {}]   ;;  %s8204_s6 = inlined_call_operand.vmem [shape: f32[1,128], index: 6, kind: input, shape index: {}]   ;;  %s8205_s7 = inlined_call_operand.vmem [shape: f32[32,128], index: 7, kind: input, shape index: {}]   ;;  %s8206_s8 = inlined_call_operand.vmem [shape: f32[32,128], index: 8, kind: input, shape index: {}]   ;;  %s8207_s9 = inlined_call_operand.hbm [shape: f32[1,128], index: 9, kind: input, shape index: {}]   ;;  %s8208_s10 = inlined_call_operand.hbm [shape: f32[1,32], index: 10, kind: input, shape index: {}]   ;;  %s8209_s11 = inlined_call_operand.hbm [shape: f32[1,32], index: 11, kind: input, shape index: {}]   ;;  %s8210_s12 = inlined_call_operand.vmem [shape: f32[32,32], index: 12, kind: input, shape index: {}]   ;;  %s8211_s13 = inlined_call_operand.hbm [shape: f32[1,32], index: 13, kind: input, shape index: {}]   ;;  %s8212_s14 = inlined_call_operand.hbm [shape: f32[32,32], index: 14, kind: input, shape index: {}]   ;;  %s8213_s15 = inlined_call_operand.hbm [shape: f32[1,32], index: 15, kind: input, shape index: {}]   ;;  %s8214_s16 = inlined_call_operand.hbm [shape: f32[32,32], index: 16, kind: input, shape index: {}]   ;;  %s8215_s17 = inlined_call_operand.vmem [shape: f32[1,32], index: 17, kind: input, shape index: {}]   ;;  %s8216_s18 = inlined_call_operand.hbm [shape: f32[32,32], index: 18, kind: input, shape index: {}]   ;;  %s8217_s19 = inlined_call_operand.vmem [shape: f32[1,32], index: 19, kind: input, shape index: {}]   ;;  %s8218_s20 = inlined_call_operand.vmem [shape: f32[32,1], index: 20, kind: input, shape index: {}]   ;;  %s8219_s21 = inlined_call_operand.<no memory space> [shape: f32[1,1], index: 21, kind: input, shape index: {}]   ;;  %s8220_s22 = inlined_call_operand.vmem [shape: f32[1,3], index: 22, kind: input, shape index: {}]   ;;  %s8221_s23 = inlined_call_operand.vmem [shape: f32[32,8], index: 23, kind: input, shape index: {}]   ;;  %s8222_s24 = inlined_call_operand.vmem [shape: f32[3,8], index: 24, kind: input, shape index: {}]   ;;  %s8223_s25 = inlined_call_operand.vmem [shape: f32[2,8], index: 25, kind: input, shape index: {}]   ;;  %s8224_s26 = inlined_call_operand.vmem [shape: f32[2,1], index: 26, kind: output, shape index: {}]  }
   0x1   :  { %8236 = sst [smem:[#allocation25_spill]] %s8198_s0  ;;  %v31_v0 = vstv %s8219_s21 }
   0x2   :  { %8237 = sst [smem:[#allocation26_spill]] %s8199_s1  ;;  %32 = vst [vmem:[#allocation2] sm:$0x1] %v31_v0 }
   0x3   :  { %8238 = sst [smem:[#allocation27_spill]] %s8200_s2 }
   0x4   :  { %8239 = sst [smem:[#allocation28_spill]] %s8201_s3 }
   0x5   :  { %8240 = sst [smem:[#allocation29_spill]] %s8202_s4 }
   0x6   :  { %8241 = sst [smem:[#allocation30_spill]] %s8203_s5 }
   0x7   :  { %8242 = sst [smem:[#allocation31_spill]] %s8204_s6 }
   0x8   :  { %8243 = sst [smem:[#allocation32_spill]] %s8205_s7 }
   0x9   :  { %8244 = sst [smem:[#allocation33_spill]] %s8206_s8 }
   0xa   :  { %8245 = sst [smem:[#allocation34_spill]] %s8207_s9 }
   0xb   :  { %8246 = sst [smem:[#allocation35_spill]] %s8208_s10 }
   0xc   :  { %33 = vsyncpa [#allocation4], 0 }
   0xd   :  { %34 = vsyncpa [#allocation6], 0 }
   0xe   :  { %35 = vsyncpa [#allocation9], 0 }
   0xf   :  { %36 = vsyncpa [#allocation12], 0 }
  0x10   :  { %37 = vsyncpa [#allocation15], 0 }
  0x11   :  { %38 = vsyncpa [#allocation18], 0  ;;  %s7106_s7 = smov [#allocation5]   ;;  %s7107_s8 = smov [#allocation8]  }
  0x12   :  { %s59_s28 = sshll.u32 %s7106_s7, 4  ;;  %s89_s4 = sshll.u32 %s7107_s8, 4  ;;  %s60_s28 = int_to_ptr.vmem [resolvable:$true] %s59_s28  ;;  %s90_s4 = int_to_ptr.vmem [resolvable:$true] %s89_s4 }
  0x13   :  { %s8247_s9 = sld [smem:[#allocation28_spill]] }
  0x19   :  { %s6874_s30 = scalar_lea.hbm %s8247_s9, 16 }
  0x1a   :  { %p6875_p0 = scmp.ne.s32.totalorder %s8247_s9, %s6874_s30  ;;  %p6878_p1 = scmp.lt.u32.totalorder %s6874_s30, %s8247_s9 }
  0x1c   :  { %p6880_p2 = pnand %p6878_p1, %p6875_p0 }
  0x1e   :  { %6883 = shalt.err (!%p6880_p2)
}
  0x1f   :  { %s6884_s6 = scalar_lea.vmem %s60_s28, 16  ;;  %s6888_s1 = scalar_lea.vmem %s60_s28, 32 }
  0x20   :  { %p6885_p3 = scmp.ne.s32.totalorder %s60_s28, %s6884_s6  ;;  %p6889_p4 = scmp.lt.s32.totalorder %s60_s28, %s60_s28 }
  0x21   :  { %p6890_p5 = scmp.lt.s32.totalorder %s6888_s1, %s6884_s6 }
  0x23   :  { %p6891_p6 = por %p6890_p5, %p6889_p4 }
  0x25   :  { %p6892_p7 = pnand %p6891_p6, %p6885_p3 }
  0x27   :  { %6895 = shalt.err (!%p6892_p7)
}
  0x28   :  { %62 = dma.hbm_to_vmem [thread:$0]  %s8247_s9, 16, %s60_s28, [#allocation6]  }
  0x29   :  { %s8248_s29 = sld [smem:[#allocation35_spill]] }
  0x2f   :  { %s6896_s0 = scalar_lea.hbm %s8248_s29, 16 }
  0x30   :  { %p6897_p8 = scmp.ne.s32.totalorder %s8248_s29, %s6896_s0  ;;  %p6900_p9 = scmp.lt.u32.totalorder %s6896_s0, %s8248_s29 }
  0x32   :  { %p6902_p10 = pnand %p6900_p9, %p6897_p8 }
  0x34   :  { %6905 = shalt.err (!%p6902_p10)
}
  0x35   :  { %s6906_s10 = scalar_lea.vmem %s90_s4, 16  ;;  %s6910_s6 = scalar_lea.vmem %s90_s4, 32 }
  0x36   :  { %p6907_p11 = scmp.ne.s32.totalorder %s90_s4, %s6906_s10  ;;  %p6911_p12 = scmp.lt.s32.totalorder %s90_s4, %s90_s4 }
  0x37   :  { %p6912_p13 = scmp.lt.s32.totalorder %s6910_s6, %s6906_s10 }
  0x39   :  { %p6913_p0 = por %p6912_p13, %p6911_p12 }
  0x3b   :  { %p6914_p1 = pnand %p6913_p0, %p6907_p11 }
  0x3d   :  { %6917 = shalt.err (!%p6914_p1)
}
  0x3e   :  { %92 = dma.hbm_to_vmem [thread:$0]  %s8248_s29, 16, %s90_s4, [#allocation9]  }
  0x3f   :  { %s7108_s1 = smov [#allocation11]   ;;  %s7109_s3 = smov [#allocation14]  }
  0x40   :  { %s111_s27 = sshll.u32 %s7108_s1, 4  ;;  %s133_s7 = sshll.u32 %s7109_s3, 4  ;;  %s112_s27 = int_to_ptr.vmem [resolvable:$true] %s111_s27  ;;  %s134_s7 = int_to_ptr.vmem [resolvable:$true] %s133_s7 }
  0x41   :  { %s6918_s2 = scalar_lea.hbm %s8211_s13, 16 }
  0x42   :  { %p6919_p2 = scmp.ne.s32.totalorder %s8211_s13, %s6918_s2  ;;  %p6922_p3 = scmp.lt.u32.totalorder %s6918_s2, %s8211_s13 }
  0x44   :  { %p6924_p4 = pnand %p6922_p3, %p6919_p2 }
  0x46   :  { %6927 = shalt.err (!%p6924_p4)
}
  0x47   :  { %s6928_s4 = scalar_lea.vmem %s112_s27, 16  ;;  %s6932_s29 = scalar_lea.vmem %s112_s27, 32 }
  0x48   :  { %p6929_p5 = scmp.ne.s32.totalorder %s112_s27, %s6928_s4  ;;  %p6933_p6 = scmp.lt.s32.totalorder %s112_s27, %s112_s27 }
  0x49   :  { %p6934_p7 = scmp.lt.s32.totalorder %s6932_s29, %s6928_s4 }
  0x4b   :  { %p6935_p8 = por %p6934_p7, %p6933_p6 }
  0x4d   :  { %p6936_p9 = pnand %p6935_p8, %p6929_p5 }
  0x4f   :  { %6939 = shalt.err (!%p6936_p9)
}
  0x50   :  { %114 = dma.hbm_to_vmem [thread:$0]  %s8211_s13, 16, %s112_s27, [#allocation12]  }
  0x51   :  { %s6940_s3 = scalar_lea.hbm %s8213_s15, 16 }
  0x52   :  { %p6941_p10 = scmp.ne.s32.totalorder %s8213_s15, %s6940_s3  ;;  %p6944_p11 = scmp.lt.u32.totalorder %s6940_s3, %s8213_s15 }
  0x54   :  { %p6946_p12 = pnand %p6944_p11, %p6941_p10 }
  0x56   :  { %6949 = shalt.err (!%p6946_p12)
}
  0x57   :  { %s6950_s5 = scalar_lea.vmem %s134_s7, 16  ;;  %s6954_s21 = scalar_lea.vmem %s134_s7, 32 }
  0x58   :  { %p6951_p13 = scmp.ne.s32.totalorder %s134_s7, %s6950_s5  ;;  %p6955_p0 = scmp.lt.s32.totalorder %s134_s7, %s134_s7 }
  0x59   :  { %p6956_p1 = scmp.lt.s32.totalorder %s6954_s21, %s6950_s5 }
  0x5b   :  { %p6957_p2 = por %p6956_p1, %p6955_p0 }
  0x5d   :  { %p6958_p3 = pnand %p6957_p2, %p6951_p13 }
  0x5f   :  { %6961 = shalt.err (!%p6958_p3)
}
  0x60   :  { %136 = dma.hbm_to_vmem [thread:$0]  %s8213_s15, 16, %s134_s7, [#allocation15]  }
  0x61   :  { %s7110_s10 = smov [#allocation3]   ;;  %s7111_s29 = smov [#allocation7]  }
  0x62   :  { %s47_s4 = sshll.u32 %s7110_s10, 4  ;;  %s79_s6 = sshll.u32 %s7111_s29, 4  ;;  %s48_s4 = int_to_ptr.vmem [resolvable:$true] %s47_s4  ;;  %s80_s6 = int_to_ptr.vmem [resolvable:$true] %s79_s6 }
  0x63   :  { %s8249_s1 = sld [smem:[#allocation26_spill]] }
  0x69   :  { %s6962_s3 = scalar_lea.hbm %s8249_s1, 128 }
  0x6a   :  { %p6963_p4 = scmp.ne.s32.totalorder %s8249_s1, %s6962_s3  ;;  %p6966_p5 = scmp.lt.u32.totalorder %s6962_s3, %s8249_s1 }
  0x6c   :  { %p6968_p6 = pnand %p6966_p5, %p6963_p4 }
  0x6e   :  { %6971 = shalt.err (!%p6968_p6)
}
  0x6f   :  { %s6972_s15 = scalar_lea.vmem %s48_s4, 128  ;;  %p6977_p8 = scmp.lt.s32.totalorder %s48_s4, %s48_s4 }
  0x70   :  { %p6973_p7 = scmp.ne.s32.totalorder %s48_s4, %s6972_s15  ;;  %p6978_p9 = scmp.lt.s32.totalorder %s6972_s15, %s6972_s15 }
  0x72   :  { %p6979_p10 = por %p6978_p9, %p6977_p8 }
  0x74   :  { %p6980_p11 = pnand %p6979_p10, %p6973_p7 }
  0x76   :  { %6983 = shalt.err (!%p6980_p11)
}
  0x77   :  { %50 = dma.hbm_to_vmem [thread:$0]  %s8249_s1, 128, %s48_s4, [#allocation4]  }
  0x78   :  { %s8250_s27 = sld [smem:[#allocation34_spill]] }
  0x7e   :  { %s6984_s10 = scalar_lea.hbm %s8250_s27, 16 }
  0x7f   :  { %p6985_p12 = scmp.ne.s32.totalorder %s8250_s27, %s6984_s10  ;;  %p6988_p13 = scmp.lt.u32.totalorder %s6984_s10, %s8250_s27 }
  0x81   :  { %p6990_p0 = pnand %p6988_p13, %p6985_p12 }
  0x83   :  { %6993 = shalt.err (!%p6990_p0)
}
  0x84   :  { %s6994_s8 = scalar_lea.vmem %s80_s6, 16  ;;  %s6998_s0 = scalar_lea.vmem %s80_s6, 32 }
  0x85   :  { %p6995_p1 = scmp.ne.s32.totalorder %s80_s6, %s6994_s8  ;;  %p6999_p2 = scmp.lt.s32.totalorder %s80_s6, %s80_s6 }
  0x86   :  { %p7000_p3 = scmp.lt.s32.totalorder %s6998_s0, %s6994_s8 }
  0x88   :  { %p7001_p4 = por %p7000_p3, %p6999_p2 }
  0x8a   :  { %p7002_p5 = pnand %p7001_p4, %p6995_p1 }
  0x8c   :  { %7005 = shalt.err (!%p7002_p5)
}
  0x8d   :  { %82 = dma.hbm_to_vmem [thread:$0]  %s8250_s27, 16, %s80_s6, [#allocation6]  }
  0x8e   :  { %s7112_s2 = smov [#allocation10]   ;;  %s7113_s15 = smov [#allocation13]  }
  0x8f   :  { %s99_s30 = sshll.u32 %s7112_s2, 4  ;;  %s120_s7 = sshll.u32 %s7113_s15, 4  ;;  %s100_s30 = int_to_ptr.vmem [resolvable:$true] %s99_s30  ;;  %s7337_s7 = int_to_ptr.vmem [resolvable:$true] %s120_s7 }
  0x90   :  { %s7006_s13 = scalar_lea.hbm %s8209_s11, 16 }
  0x91   :  { %p7007_p6 = scmp.ne.s32.totalorder %s8209_s11, %s7006_s13  ;;  %p7010_p7 = scmp.lt.u32.totalorder %s7006_s13, %s8209_s11 }
  0x93   :  { %p7012_p8 = pnand %p7010_p7, %p7007_p6 }
  0x95   :  { %7015 = shalt.err (!%p7012_p8)
}
  0x96   :  { %s7016_s6 = scalar_lea.vmem %s100_s30, 16  ;;  %s7020_s27 = scalar_lea.vmem %s100_s30, 32 }
  0x97   :  { %p7017_p9 = scmp.ne.s32.totalorder %s100_s30, %s7016_s6  ;;  %p7021_p10 = scmp.lt.s32.totalorder %s100_s30, %s100_s30 }
  0x98   :  { %p7022_p11 = scmp.lt.s32.totalorder %s7020_s27, %s7016_s6 }
  0x9a   :  { %p7023_p12 = por %p7022_p11, %p7021_p10 }
  0x9c   :  { %p7024_p13 = pnand %p7023_p12, %p7017_p9 }
  0x9e   :  { %7027 = shalt.err (!%p7024_p13)
}
  0x9f   :  { %102 = dma.hbm_to_vmem [thread:$0]  %s8209_s11, 16, %s100_s30, [#allocation9]  }
  0xa0   :  { %s7028_s1 = scalar_lea.hbm %s8212_s14, 512 }
  0xa1   :  { %p7029_p0 = scmp.ne.s32.totalorder %s8212_s14, %s7028_s1  ;;  %p7032_p1 = scmp.lt.u32.totalorder %s7028_s1, %s8212_s14 }
  0xa3   :  { %p7034_p2 = pnand %p7032_p1, %p7029_p0 }
  0xa5   :  { %7037 = shalt.err (!%p7034_p2)
}
  0xa6   :  { %s7038_s13 = scalar_lea.vmem %s7337_s7, 512  ;;  %p7043_p4 = scmp.lt.s32.totalorder %s7337_s7, %s7337_s7 }
  0xa7   :  { %p7039_p3 = scmp.ne.s32.totalorder %s7337_s7, %s7038_s13  ;;  %p7044_p5 = scmp.lt.s32.totalorder %s7038_s13, %s7038_s13 }
  0xa9   :  { %p7045_p6 = por %p7044_p5, %p7043_p4 }
  0xab   :  { %p7046_p7 = pnand %p7045_p6, %p7039_p3 }
  0xad   :  { %7049 = shalt.err (!%p7046_p7)
}
  0xae   :  { %s7114_s11 = smov 128   ;;  %s7115_s30 = smov 8  }
  0xaf   :  { %126 = dma.hbm_to_vmem [thread:$0]  %s8212_s14, 512, %s7337_s7, [#allocation12], %s7114_s11, %s7114_s11, %s7115_s30  }
  0xb0   :  { %s7116_s28 = smov [#allocation16]   ;;  %s7117_s6 = smov [#allocation17]  }
  0xb1   :  { %s142_s9 = sshll.u32 %s7116_s28, 4  ;;  %s156_s27 = sshll.u32 %s7117_s6, 4  ;;  %s143_s9 = int_to_ptr.vmem [resolvable:$true] %s142_s9  ;;  %s7371_s27 = int_to_ptr.vmem [resolvable:$true] %s156_s27 }
  0xb2   :  { %s7050_s0 = scalar_lea.hbm %s8214_s16, 512 }
  0xb3   :  { %p7051_p8 = scmp.ne.s32.totalorder %s8214_s16, %s7050_s0  ;;  %p7054_p9 = scmp.lt.u32.totalorder %s7050_s0, %s8214_s16 }
  0xb5   :  { %p7056_p10 = pnand %p7054_p9, %p7051_p8 }
  0xb7   :  { %7059 = shalt.err (!%p7056_p10)
}
  0xb8   :  { %s7060_s14 = scalar_lea.vmem %s143_s9, 512  ;;  %p7065_p12 = scmp.lt.s32.totalorder %s143_s9, %s143_s9 }
  0xb9   :  { %p7061_p11 = scmp.ne.s32.totalorder %s143_s9, %s7060_s14  ;;  %p7066_p13 = scmp.lt.s32.totalorder %s7060_s14, %s7060_s14 }
  0xbb   :  { %p7067_p0 = por %p7066_p13, %p7065_p12 }
  0xbd   :  { %p7068_p1 = pnand %p7067_p0, %p7061_p11 }
  0xbf   :  { %7071 = shalt.err (!%p7068_p1)
}
  0xc0   :  { %148 = dma.hbm_to_vmem [thread:$0]  %s8214_s16, 512, %s143_s9, [#allocation15], %s7114_s11, %s7114_s11, %s7115_s30  }
  0xc1   :  { %s7072_s10 = scalar_lea.hbm %s8216_s18, 512 }
  0xc2   :  { %p7073_p2 = scmp.ne.s32.totalorder %s8216_s18, %s7072_s10  ;;  %p7076_p3 = scmp.lt.u32.totalorder %s7072_s10, %s8216_s18 }
  0xc4   :  { %p7078_p4 = pnand %p7076_p3, %p7073_p2 }
  0xc6   :  { %7081 = shalt.err (!%p7078_p4)
}
  0xc7   :  { %s7082_s8 = scalar_lea.vmem %s7371_s27, 512  ;;  %p7087_p6 = scmp.lt.s32.totalorder %s7371_s27, %s7371_s27 }
  0xc8   :  { %p7083_p5 = scmp.ne.s32.totalorder %s7371_s27, %s7082_s8  ;;  %p7088_p7 = scmp.lt.s32.totalorder %s7082_s8, %s7082_s8 }
  0xca   :  { %p7089_p8 = por %p7088_p7, %p7087_p6 }
  0xcc   :  { %p7090_p9 = pnand %p7089_p8, %p7083_p5 }
  0xce   :  { %7093 = shalt.err (!%p7090_p9)
}
  0xcf   :  { %162 = dma.hbm_to_vmem [thread:$0]  %s8216_s18, 512, %s7371_s27, [#allocation18], %s7114_s11, %s7114_s11, %s7115_s30  }
  0xd0   :  { %7094 = dma.done.wait [#allocation4], 128  }
  0xd1   :  { %7095 = vsyncadd [#allocation4], 4294967168 }
  0xd2   :  { %7096 = dma.done.wait [#allocation6], 32  }
  0xd3   :  { %7097 = vsyncadd [#allocation6], 4294967264 }
  0xd4   :  { %7098 = dma.done.wait [#allocation9], 32  }
  0xd5   :  { %7099 = vsyncadd [#allocation9], 4294967264 }
  0xd6   :  { %7100 = dma.done.wait [#allocation12], 528  }
  0xd7   :  { %7101 = vsyncadd [#allocation12], 4294966768 }
  0xd8   :  { %7102 = dma.done.wait [#allocation15], 528  }
  0xd9   :  { %7103 = vsyncadd [#allocation15], 4294966768 }
  0xda   :  { %7104 = dma.done.wait [#allocation18], 512  }
  0xdb   :  { %7105 = vsyncadd [#allocation18], 4294966784  ;;  %v7118_v1 = vmov 0.0|0.0   ;;  %vm7119_vm0 = vmmov 0   ;;  %v7120_v2 = vmov 0.0   ;;  %vm223_vm1 = vcmask 64512  }
  0xdc   :  { %6365 = vmatprep.subr.bf16.mxu1 %v7118_v1  ;;  %5819 = vmatprep.mubr.msk.f32.mxu1 %vm7119_vm0, %v7120_v2  ;;  %s8251_s30 = sld [smem:[#allocation27_spill]]  ;;  %v215_v5 = vld [vmem:[#allocation3] sm:$0xff]  ;;  %s8252_s2 = sld [smem:[#allocation25_spill]]  ;;  %v7445_v13 = vld [vmem:[#allocation5] ss:$0 sm:$0xff]  ;;  %vm387_vm2 = vcmask 261120  }
  0xdd   :  { %5797 = vmatprep.subr.mxu0 %v215_v5  ;;  %s7121_s10 = smov 64   ;;  %s7122_s29 = smov 32   ;;  %vm5172_vm3 = vcmask 16384   ;;  %vm5189_vm4 = vcmask 1042432   ;;  %vm5185_vm5 = vcmask 23552   ;;  %vm5426_vm6 = vcmask 1024  }
  0xde   :  { %5798 = vmatpush3.msra.mxu0 %v215_v5  ;;  %s8253_s3 = sld [smem:[#allocation30_spill]]  ;;  %s8254_s4 = sld [smem:[#allocation29_spill]] }
  0xdf   :  { %6377 = vmatprep.subr.bf16.mxu0 %v7118_v1  ;;  %s8255_s6 = sld [smem:[#allocation31_spill]]  ;;  %s8257_s11 = sld [smem:[#allocation32_spill]] }
  0xe0   :  { %s7126_s16 = smov 104  }
  0xe2   :  { %v353_v3 = vld [vmem:[%s8251_s30] sm:$0xff]  ;;  %v354_v4 = vld [vmem:[%s8251_s30 + $0x8] sm:$0xff]  ;;  %v355_v9 = vld [vmem:[%s8251_s30 + $0x10] sm:$0xff] }
  0xe3   :  { %v7417_v6 = vpack.c.bf16 %v354_v4, %v353_v3  ;;  %v207_v7 = vld [vmem:[%s8252_s2] sm:$0xff]  ;;  %v208_v8 = vld [vmem:[%s8252_s2 + $0x8] sm:$0xff]  ;;  %v356_v10 = vld [vmem:[%s8251_s30 + $0x18] sm:$0xff]  ;;  %s8256_s30 = sld [smem:[#allocation33_spill]] }
  0xe4   :  { %5799 = vmatprep.mubr.msk.f32.mxu0 %vm223_vm1, %v207_v7  ;;  %v7434_v11 = vpack.c.bf16 %v356_v10, %v355_v9  ;;  %v357_v29 = vld [vmem:[%s8253_s3] sm:$0xff]  ;;  %v358_v30 = vld [vmem:[%s8253_s3 + $0x8] sm:$0xff]  ;;  %v359_v31 = vld [vmem:[%s8253_s3 + $0x10] sm:$0xff] }
  0xe5   :  { %6367 = vmatpush3.bf16.msra.mxu1 %v7417_v6  ;;  %5800 = vmatmul.mubr.msk.f32.vlgmr.msra.gmra.mrb[0].mxu0 %vm223_vm1, %v208_v8  ;;  %v7462_v32 = vpack.c.bf16 %v358_v30, %v357_v29  ;;  %v360_v33 = vld [vmem:[%s8253_s3 + $0x18] sm:$0xff]  ;;  %v365_v35 = vld [vmem:[%s8254_s4] sm:$0xff]  ;;  %v366_v36 = vld [vmem:[%s8254_s4 + $0x8] sm:$0xff] }
  0xe6   :  { %6368 = vmatprep.subr.bf16.mxu1 %v7118_v1  ;;  %v7468_v34 = vpack.c.bf16 %v360_v33, %v359_v31  ;;  %v7478_v37 = vpack.c.bf16 %v366_v36, %v365_v35  ;;  %v367_v38 = vld [vmem:[%s8254_s4 + $0x10] sm:$0xff]  ;;  %v368_v39 = vld [vmem:[%s8254_s4 + $0x18] sm:$0xff]  ;;  %v7511_v47 = vld [vmem:[%s8255_s6] ss:$0 sm:$0xff] }
  0xe7   :  { %v7490_v41 = vpack.c.bf16 %v368_v39, %v367_v38  ;;  %v214_v29 = vld [vmem:[%s8252_s2 + $0x38] sm:$0xff]  ;;  %v369_v30 = vld [vmem:[%s8257_s11] sm:$0xff]  ;;  %v370_v31 = vld [vmem:[%s8257_s11 + $0x8] sm:$0xff] }
  0xe8   :  { %v7585_v35 = vpack.c.bf16 %v370_v31, %v369_v30  ;;  %v371_v36 = vld [vmem:[%s8257_s11 + $0x10] sm:$0xff]  ;;  %v372_v38 = vld [vmem:[%s8257_s11 + $0x18] sm:$0xff] }
  0xe9   :  { %6370 = vmatpush3.bf16.msra.mxu1 %v7434_v11  ;;  %v7595_v39 = vpack.c.bf16 %v372_v38, %v371_v36 }
  0xea   :  { %6371 = vmatprep.subr.bf16.mxu1 %v7118_v1 }
  0xec   :  { %5820 = vmatmul.mubr.f32.vlgmr.msra.gmra.mrb[0].mxu1 %v7120_v2 }
  0xed   :  { %5830 = vmatprep.mubr.msk.f32.mxu1 %vm7119_vm0, %v7120_v2  ;;  %6373 = vmatpush3.bf16.msra.mxu1 %v7462_v32 }
  0xee   :  { %6374 = vmatprep.subr.bf16.mxu1 %v7118_v1 }
  0xf1   :  { %6376 = vmatpush3.bf16.msra.mxu1 %v7468_v34 }
  0xf2   :  { %6383 = vmatprep.subr.bf16.mxu1 %v7118_v1 }
  0xf4   :  { %5831 = vmatmul.mubr.f32.vlgmr.msra.gmra.mrb[2].mxu1 %v7120_v2 }
  0xf5   :  { %6385 = vmatpush3.bf16.msra.mxu1 %v7478_v37  ;;  %5852 = vmatprep.mubr.msk.f32.mxu1 %vm7119_vm0, %v7120_v2 }
  0xf6   :  { %6386 = vmatprep.subr.bf16.mxu1 %v7118_v1 }
  0xf9   :  { %6388 = vmatpush3.bf16.msra.mxu1 %v7490_v41 }
  0xfa   :  { %6395 = vmatprep.subr.bf16.mxu1 %v7118_v1 }
 0x1b8   :  { %v7443_v12 = vpop.f32.mrb[0].mxu0 }
 0x1b9   :  { %v314_v14 = vpop.f32.mrb[1].mxu0  ;;  %v320_v52 = vadd.f32 %v7443_v12, %v7445_v13 }
 0x1ba   :  { %v315_v15 = vadd.f32 %v7445_v13, %v314_v14 }
 0x1bf   :  { %v457_v16 = vpop.f32.mrb[0].mxu1 }
 0x1c0   :  { %v601_v17 = vadd.f32 %v457_v16, %v315_v15  ;;  %v5821_v18 = vpop.f32.mrb[1].mxu1 }
 0x1c1   :  { %v210_v18 = vld [vmem:[%s8252_s2 + $0x18] sm:$0xff] }
 0x1c2   :  { %6657 = vtanh.f32 %v601_v17  ;;  %v5449_v20 = vmul.f32 -1.442695, %v601_v17  ;;  %v209_v17 = vld [vmem:[%s8252_s2 + $0x10] sm:$0xff] }
 0x1c3   :  { %5802 = vmatprep.mubr.msk.f32.mxu0 %vm223_vm1, %v209_v17 }
 0x1c4   :  { %6659 = vpow2.f32 %v5449_v20  ;;  %v362_v20 = vld [vmem:[%s8256_s30 + $0x8] sm:$0xff]  ;;  %5803 = vmatmul.mubr.msk.f32.gmra.mrb[2].mxu0 %vm223_vm1, %v210_v18 }
 0x1c7   :  { %v527_v44 = vpop.f32.mrb[2].mxu1 }
 0x1c8   :  { %v5832_v45 = vpop.f32.mrb[3].mxu1 }
 0x1cc   :  { %v6658_v19 = vpop.eup %6657 }
 0x1cd   :  { %611 = vrot.lane.b32.xlu0 %v6658_v19, %s7121_s10  ;;  %v361_v19 = vld [vmem:[%s8256_s30] sm:$0xff] }
 0x1ce   :  { %v6660_v21 = vpop.eup %6659 }
 0x1cf   :  { %v605_v22 = vadd.f32 1.0, %v6660_v21  ;;  %v211_v21 = vld [vmem:[%s8252_s2 + $0x20] sm:$0xff] }
 0x1d0   :  { %5805 = vmatprep.mubr.msk.f32.mxu0 %vm223_vm1, %v211_v21 }
 0x1d1   :  { %6661 = vrcp.f32 %v605_v22  ;;  %v7544_v22 = vpack.c.bf16 %v362_v20, %v361_v19 }
 0x1d3   :  { %6379 = vmatpush3.bf16.msra.mxu0 %v7544_v22 }
 0x1d4   :  { %6380 = vmatprep.subr.bf16.mxu0 %v7118_v1 }
 0x1db   :  { %v6662_v23 = vpop.eup %6661 }
 0x1dc   :  { %v609_v26 = vmul.f32 0.0, %v6662_v23 }
 0x23f   :  { %v612_v24 = vpop.permute.xlu0 %611 }
 0x240   :  { %v614_v25 = vmul.f32 %v6662_v23, %v612_v24  ;;  %v212_v24 = vld [vmem:[%s8252_s2 + $0x28] sm:$0xff] }
 0x241   :  { %5806 = vmatmul.mubr.msk.f32.gmra.mrb[4].mxu0 %vm223_vm1, %v212_v24 }
 0x242   :  { %616 = vrot.lane.b32.xlu0 %v614_v25, %s7122_s29  ;;  %v364_v25 = vld [vmem:[%s8256_s30 + $0x18] sm:$0xff] }
 0x297   :  { %v7604_v45 = vpop.f32.mrb[2].mxu0 }
 0x2b4   :  { %v617_v27 = vpop.permute.xlu0 %616 }
 0x2b5   :  { %v7450_v28 = vadd.f32 %v617_v27, %v609_v26  ;;  %v213_v27 = vld [vmem:[%s8252_s2 + $0x30] sm:$0xff] }
 0x2b6   :  { %5808 = vmatprep.mubr.msk.f32.mxu0 %vm223_vm1, %v213_v27 }
 0x2b7   :  { %6663 = vtanh.f32 %v7450_v28  ;;  %5809 = vmatmul.mubr.msk.f32.gmra.mrb[6].mxu0 %vm223_vm1, %v214_v29 }
 0x2b8   :  { %5841 = vmatprep.mubr.msk.f32.mxu0 %vm7119_vm0, %v7120_v2 }
 0x2c1   :  { %v6664_v40 = vpop.eup %6663 }
 0x2c2   :  { %622 = vrot.lane.b32.xlu1 %v6664_v40, %s7121_s10 }
 0x334   :  { %v623_v42 = vpop.permute.xlu1 %622 }
 0x335   :  { %v625_v43 = vmul.f32 %v6662_v23, %v623_v42  ;;  %v363_v23 = vld [vmem:[%s8256_s30 + $0x10] sm:$0xff] }
 0x337   :  { %627 = vrot.lane.b32.xlu1 %v625_v43, %s7122_s29 }
 0x3a9   :  { %v628_v46 = vpop.permute.xlu1 %627 }
 0x3aa   :  { %5853 = vmatmul.mubr.msk.f32.vlgmr.msra.gmra.mrb[4].mxu1 %vm387_vm2, %v628_v46 }
 0x3ab   :  { %6397 = vmatpush3.bf16.msra.mxu1 %v7417_v6  ;;  %5874 = vmatprep.mubr.msk.f32.mxu1 %vm7119_vm0, %v7120_v2 }
 0x3ac   :  { %6398 = vmatprep.subr.bf16.mxu1 %v7118_v1 }
 0x3af   :  { %6400 = vmatpush3.bf16.msra.mxu1 %v7434_v11 }
 0x3b0   :  { %6407 = vmatprep.subr.bf16.mxu1 %v7118_v1 }
 0x3b2   :  { %5875 = vmatmul.mubr.msk.f32.vlgmr.msra.gmra.mrb[6].mxu1 %vm387_vm2, %v628_v46  ;;  %v324_v46 = vpop.f32.mrb[3].mxu0 }
 0x3b3   :  { %5896 = vmatprep.mubr.msk.f32.mxu1 %vm7119_vm0, %v7120_v2  ;;  %6409 = vmatpush3.bf16.msra.mxu1 %v7544_v22 }
 0x3b4   :  { %6410 = vmatprep.subr.bf16.mxu1 %v7118_v1 }
 0x47d   :  { %v697_v48 = vpop.f32.mrb[4].mxu1 }
 0x47e   :  { %v698_v49 = vadd.f32 %v697_v48, %v527_v44  ;;  %v5854_v50 = vpop.f32.mrb[5].mxu1  ;;  %v7606_v48 = vpop.f32.mrb[4].mxu0 }
 0x480   :  { %v701_v51 = vadd.f32 %v7511_v47, %v698_v49  ;;  %v7608_v49 = vpop.f32.mrb[5].mxu0 }
 0x481   :  { %v7610_v50 = vpop.f32.mrb[6].mxu0 }
 0x482   :  { %6665 = vtanh.f32 %v701_v51  ;;  %v5451_v58 = vmul.f32 -1.442695, %v701_v51  ;;  %v7612_v51 = vpop.f32.mrb[7].mxu0 }
 0x485   :  { %v892_v53 = vpop.f32.mrb[6].mxu1 }
 0x486   :  { %v1041_v54 = vadd.f32 %v892_v53, %v320_v52  ;;  %v5876_v55 = vpop.f32.mrb[7].mxu1 }
 0x488   :  { %6667 = vtanh.f32 %v1041_v54  ;;  %v5457_v59 = vmul.f32 -1.442695, %v1041_v54 }
 0x489   :  { %6669 = vpow2.f32 %v5451_v58 }
 0x48a   :  { %6671 = vpow2.f32 %v5457_v59 }
 0x48c   :  { %v6666_v56 = vpop.eup %6665 }
 0x48d   :  { %711 = vrot.lane.b32.xlu0 %v6666_v56, %s7121_s10  ;;  %v7642_v56 = vld [vmem:[#allocation7] ss:$0 sm:$0xff] }
 0x492   :  { %v6668_v57 = vpop.eup %6667 }
 0x493   :  { %1051 = vrot.lane.b32.xlu1 %v6668_v57, %s7121_s10  ;;  %v6670_v60 = vpop.eup %6669 }
 0x494   :  { %v705_v61 = vadd.f32 1.0, %v6670_v60  ;;  %v6672_v62 = vpop.eup %6671 }
 0x495   :  { %v1045_v63 = vadd.f32 1.0, %v6672_v62 }
 0x496   :  { %6673 = vrcp.f32 %v705_v61 }
 0x497   :  { %6675 = vrcp.f32 %v1045_v63 }
 0x4a0   :  { %v6674_v0 = vpop.eup %6673 }
 0x4a1   :  { %v6676_v5 = vpop.eup %6675  ;;  %v709_v9 = vmul.f32 0.0, %v6674_v0 }
 0x4a2   :  { %v1049_v14 = vmul.f32 %v6676_v5, %v7450_v28  ;;  %v7560_v28 = vpack.c.bf16 %v364_v25, %v363_v23 }
 0x4a4   :  { %6382 = vmatpush3.bf16.msra.mxu0 %v7560_v28  ;;  %6412 = vmatpush3.bf16.msra.mxu1 %v7560_v28 }
 0x4a5   :  { %6389 = vmatprep.subr.bf16.mxu0 %v7118_v1  ;;  %6419 = vmatprep.subr.bf16.mxu1 %v7118_v1 }
 0x4a7   :  { %5842 = vmatmul.mubr.f32.vlgmr.msra.gmra.mrb[8].mxu0 %v7120_v2 }
 0x4a8   :  { %6391 = vmatpush3.bf16.msra.mxu0 %v7585_v35  ;;  %5863 = vmatprep.mubr.msk.f32.mxu0 %vm7119_vm0, %v7120_v2 }
 0x4a9   :  { %6392 = vmatprep.subr.bf16.mxu0 %v7118_v1 }
 0x4ac   :  { %6394 = vmatpush3.bf16.msra.mxu0 %v7595_v39 }
 0x4ad   :  { %6401 = vmatprep.subr.bf16.mxu0 %v7118_v1 }
 0x4ff   :  { %v712_v3 = vpop.permute.xlu0 %711 }
 0x500   :  { %v714_v4 = vmul.f32 %v6674_v0, %v712_v3 }
 0x502   :  { %716 = vrot.lane.b32.xlu0 %v714_v4, %s7122_s29 }
 0x505   :  { %v1052_v7 = vpop.permute.xlu1 %1051 }
 0x506   :  { %v1054_v8 = vmul.f32 %v6676_v5, %v1052_v7  ;;  %v325_v7 = vadd.f32 %v7445_v13, %v324_v46 }
 0x508   :  { %1056 = vrot.lane.b32.xlu1 %v1054_v8, %s7122_s29 }
 0x574   :  { %v717_v10 = vpop.permute.xlu0 %716 }
 0x575   :  { %v7520_v12 = vadd.f32 %v717_v10, %v709_v9 }
 0x577   :  { %6677 = vtanh.f32 %v7520_v12 }
 0x57a   :  { %v1057_v15 = vpop.permute.xlu1 %1056  ;;  %v597_v52 = vpop.f32.mrb[8].mxu0 }
 0x57b   :  { %v7524_v16 = vadd.f32 %v1057_v15, %v1049_v14  ;;  %v5843_v53 = vpop.f32.mrb[9].mxu0 }
 0x57d   :  { %6679 = vtanh.f32 %v7524_v16 }
 0x581   :  { %v6678_v26 = vpop.eup %6677 }
 0x582   :  { %722 = vrot.lane.b32.xlu0 %v6678_v26, %s7121_s10 }
 0x587   :  { %v6680_v33 = vpop.eup %6679 }
 0x588   :  { %1062 = vrot.lane.b32.xlu1 %v6680_v33, %s7121_s10 }
 0x5f4   :  { %v723_v40 = vpop.permute.xlu0 %722 }
 0x5f5   :  { %v725_v42 = vmul.f32 %v6674_v0, %v723_v40 }
 0x5f7   :  { %727 = vrot.lane.b32.xlu0 %v725_v42, %s7122_s29 }
 0x5fa   :  { %v1063_v43 = vpop.permute.xlu1 %1062 }
 0x5fb   :  { %v1065_v44 = vmul.f32 %v6676_v5, %v1063_v43 }
 0x5fd   :  { %1067 = vrot.lane.b32.xlu1 %v1065_v44, %s7122_s29 }
 0x669   :  { %v728_v54 = vpop.permute.xlu0 %727 }
 0x66a   :  { %5864 = vmatmul.mubr.msk.f32.vlgmr.msra.gmra.mrb[10].mxu0 %vm387_vm2, %v728_v54 }
 0x66b   :  { %6403 = vmatpush3.bf16.msra.mxu0 %v7462_v32  ;;  %5885 = vmatprep.mubr.msk.f32.mxu0 %vm7119_vm0, %v7120_v2 }
 0x66c   :  { %6404 = vmatprep.subr.bf16.mxu0 %v7118_v1 }
 0x66f   :  { %6406 = vmatpush3.bf16.msra.mxu0 %v7468_v34  ;;  %v1068_v55 = vpop.permute.xlu1 %1067 }
 0x670   :  { %6413 = vmatprep.subr.bf16.mxu0 %v7118_v1 }
 0x672   :  { %5886 = vmatmul.mubr.msk.f32.vlgmr.msra.gmra.mrb[12].mxu0 %vm387_vm2, %v728_v54 }
 0x673   :  { %6415 = vmatpush3.bf16.msra.mxu0 %v7478_v37  ;;  %5907 = vmatprep.mubr.msk.f32.mxu0 %vm7119_vm0, %v7120_v2 }
 0x674   :  { %6416 = vmatprep.subr.bf16.mxu0 %v7118_v1 }
 0x677   :  { %6418 = vmatpush3.bf16.msra.mxu0 %v7490_v41 }
 0x678   :  { %6425 = vmatprep.subr.bf16.mxu0 %v7118_v1 }
 0x67a   :  { %5908 = vmatmul.mubr.msk.f32.vlgmr.msra.gmra.mrb[14].mxu0 %vm387_vm2, %v1068_v55 }
 0x67b   :  { %6427 = vmatpush3.bf16.msra.mxu0 %v7417_v6  ;;  %5929 = vmatprep.mubr.msk.f32.mxu0 %vm7119_vm0, %v7120_v2 }
 0x67c   :  { %6428 = vmatprep.subr.bf16.mxu0 %v7118_v1 }
 0x67f   :  { %6430 = vmatpush3.bf16.msra.mxu0 %v7434_v11 }
 0x680   :  { %6437 = vmatprep.subr.bf16.mxu0 %v7118_v1 }
 0x682   :  { %5930 = vmatmul.mubr.msk.f32.vlgmr.msra.gmra.mrb[16].mxu0 %vm387_vm2, %v1068_v55 }
 0x683   :  { %6439 = vmatpush3.bf16.msra.mxu0 %v7544_v22  ;;  %5951 = vmatprep.mubr.msk.f32.mxu0 %vm7119_vm0, %v7120_v2 }
 0x684   :  { %6440 = vmatprep.subr.bf16.mxu0 %v7118_v1 }
 0x687   :  { %6442 = vmatpush3.bf16.msra.mxu0 %v7560_v28 }
 0x688   :  { %6449 = vmatprep.subr.bf16.mxu0 %v7118_v1 }
 0x73d   :  { %v797_v57 = vpop.f32.mrb[10].mxu0 }
 0x73e   :  { %v798_v58 = vadd.f32 %v797_v57, %v597_v52  ;;  %v5865_v59 = vpop.f32.mrb[11].mxu0 }
 0x740   :  { %v801_v60 = vadd.f32 %v7642_v56, %v798_v58 }
 0x742   :  { %6681 = vtanh.f32 %v801_v60  ;;  %v5453_v17 = vmul.f32 -1.442695, %v801_v60 }
 0x745   :  { %v962_v61 = vpop.f32.mrb[12].mxu0 }
 0x746   :  { %v5887_v62 = vpop.f32.mrb[13].mxu0 }
 0x74c   :  { %v6682_v63 = vpop.eup %6681 }
 0x74d   :  { %v1137_v0 = vpop.f32.mrb[14].mxu0  ;;  %811 = vrot.lane.b32.xlu0 %v6682_v63, %s7121_s10 }
 0x74e   :  { %v1138_v3 = vadd.f32 %v1137_v0, %v962_v61  ;;  %v5909_v4 = vpop.f32.mrb[15].mxu0 }
 0x750   :  { %v1141_v5 = vadd.f32 %v7511_v47, %v1138_v3 }
 0x752   :  { %6683 = vtanh.f32 %v1141_v5  ;;  %v5459_v19 = vmul.f32 -1.442695, %v1141_v5 }
 0x755   :  { %v1332_v8 = vpop.f32.mrb[16].mxu0 }
 0x756   :  { %v1481_v9 = vadd.f32 %v1332_v8, %v325_v7  ;;  %v5931_v10 = vpop.f32.mrb[17].mxu0 }
 0x758   :  { %6685 = vtanh.f32 %v1481_v9  ;;  %v5465_v21 = vmul.f32 -1.442695, %v1481_v9 }
 0x759   :  { %6687 = vpow2.f32 %v5453_v17 }
 0x75a   :  { %6689 = vpow2.f32 %v5459_v19 }
 0x75c   :  { %v6684_v14 = vpop.eup %6683 }
 0x75d   :  { %1151 = vrot.lane.b32.xlu1 %v6684_v14, %s7121_s10 }
 0x762   :  { %v6686_v15 = vpop.eup %6685 }
 0x763   :  { %1491 = vrot.lane.b32.xlu0 %v6686_v15, %s7121_s10  ;;  %v6688_v18 = vpop.eup %6687 }
 0x764   :  { %v805_v20 = vadd.f32 1.0, %v6688_v18  ;;  %v6690_v23 = vpop.eup %6689 }
 0x765   :  { %v1145_v27 = vadd.f32 1.0, %v6690_v23 }
 0x766   :  { %6691 = vrcp.f32 %v805_v20 }
 0x767   :  { %6693 = vpow2.f32 %v5465_v21 }
 0x768   :  { %6695 = vrcp.f32 %v1145_v27 }
 0x770   :  { %v6692_v24 = vpop.eup %6691 }
 0x771   :  { %v6694_v29 = vpop.eup %6693  ;;  %v809_v43 = vmul.f32 0.0, %v6692_v24 }
 0x772   :  { %v1485_v30 = vadd.f32 1.0, %v6694_v29  ;;  %v6696_v31 = vpop.eup %6695 }
 0x773   :  { %v1149_v53 = vmul.f32 %v6696_v31, %v7520_v12 }
 0x774   :  { %6697 = vrcp.f32 %v1485_v30 }
 0x77e   :  { %v6698_v38 = vpop.eup %6697 }
 0x77f   :  { %v1489_v57 = vmul.f32 %v6698_v38, %v7524_v16 }
 0x7bf   :  { %v812_v25 = vpop.permute.xlu0 %811 }
 0x7c0   :  { %v814_v26 = vmul.f32 %v6692_v24, %v812_v25 }
 0x7c2   :  { %816 = vrot.lane.b32.xlu1 %v814_v26, %s7122_s29  ;;  %v330_v26 = vadd.f32 %v7604_v45, %v7445_v13 }
 0x7cf   :  { %v1152_v33 = vpop.permute.xlu1 %1151 }
 0x7d0   :  { %v1154_v36 = vmul.f32 %v6696_v31, %v1152_v33 }
 0x7d2   :  { %1156 = vrot.lane.b32.xlu0 %v1154_v36, %s7122_s29 }
 0x7d5   :  { %v1492_v40 = vpop.permute.xlu0 %1491 }
 0x7d6   :  { %v1494_v42 = vmul.f32 %v6698_v38, %v1492_v40 }
 0x7d8   :  { %1496 = vrot.lane.b32.xlu1 %v1494_v42, %s7122_s29 }
 0x834   :  { %v817_v44 = vpop.permute.xlu1 %816 }
 0x835   :  { %v7653_v46 = vadd.f32 %v817_v44, %v809_v43 }
 0x837   :  { %6699 = vtanh.f32 %v7653_v46 }
 0x841   :  { %v6700_v52 = vpop.eup %6699 }
 0x842   :  { %822 = vrot.lane.b32.xlu0 %v6700_v52, %s7121_s10 }
 0x844   :  { %v1157_v54 = vpop.permute.xlu0 %1156 }
 0x845   :  { %v7658_v55 = vadd.f32 %v1157_v54, %v1149_v53 }
 0x847   :  { %6701 = vtanh.f32 %v7658_v55 }
 0x84a   :  { %v1497_v58 = vpop.permute.xlu1 %1496 }
 0x84b   :  { %v7662_v59 = vadd.f32 %v1497_v58, %v1489_v57 }
 0x84d   :  { %6703 = vtanh.f32 %v7662_v59 }
 0x851   :  { %v6702_v60 = vpop.eup %6701 }
 0x852   :  { %1162 = vrot.lane.b32.xlu1 %v6702_v60, %s7121_s10 }
 0x857   :  { %v6704_v61 = vpop.eup %6703 }
 0x858   :  { %1502 = vrot.lane.b32.xlu0 %v6704_v61, %s7121_s10 }
 0x8b4   :  { %v823_v62 = vpop.permute.xlu0 %822 }
 0x8b5   :  { %v825_v12 = vmul.f32 %v6692_v24, %v823_v62 }
 0x8b7   :  { %967 = vrot.lane.b32.xlu1 %v825_v12, %s7122_s29 }
 0x8c4   :  { %v1163_v63 = vpop.permute.xlu1 %1162 }
 0x8c5   :  { %v1165_v0 = vmul.f32 %v6696_v31, %v1163_v63 }
 0x8c7   :  { %1167 = vrot.lane.b32.xlu0 %v1165_v0, %s7122_s29 }
 0x8ca   :  { %v1503_v16 = vpop.permute.xlu0 %1502 }
 0x8cb   :  { %v1505_v3 = vmul.f32 %v6698_v38, %v1503_v16 }
 0x8cd   :  { %1507 = vrot.lane.b32.xlu1 %v1505_v3, %s7122_s29 }
 0x929   :  { %v968_v4 = vpop.permute.xlu1 %967 }
 0x92a   :  { %5897 = vmatmul.mubr.msk.f32.vlgmr.msra.gmra.mrb[8].mxu1 %vm387_vm2, %v968_v4 }
 0x92b   :  { %6421 = vmatpush3.bf16.msra.mxu1 %v7585_v35  ;;  %5918 = vmatprep.mubr.msk.f32.mxu1 %vm7119_vm0, %v7120_v2 }
 0x92c   :  { %6422 = vmatprep.subr.bf16.mxu1 %v7118_v1 }
 0x92f   :  { %6424 = vmatpush3.bf16.msra.mxu1 %v7595_v39 }
 0x930   :  { %6431 = vmatprep.subr.bf16.mxu1 %v7118_v1 }
 0x939   :  { %v1168_v5 = vpop.permute.xlu0 %1167 }
 0x93a   :  { %5919 = vmatmul.mubr.msk.f32.vlgmr.msra.gmra.mrb[10].mxu1 %vm387_vm2, %v1168_v5 }
 0x93b   :  { %6433 = vmatpush3.bf16.msra.mxu1 %v7462_v32  ;;  %5940 = vmatprep.mubr.msk.f32.mxu1 %vm7119_vm0, %v7120_v2 }
 0x93c   :  { %6434 = vmatprep.subr.bf16.mxu1 %v7118_v1 }
 0x93f   :  { %6436 = vmatpush3.bf16.msra.mxu1 %v7468_v34  ;;  %v1508_v7 = vpop.permute.xlu1 %1507 }
 0x940   :  { %6443 = vmatprep.subr.bf16.mxu1 %v7118_v1 }
 0x942   :  { %5941 = vmatmul.mubr.msk.f32.vlgmr.msra.gmra.mrb[12].mxu1 %vm387_vm2, %v1168_v5 }
 0x943   :  { %6445 = vmatpush3.bf16.msra.mxu1 %v7478_v37  ;;  %5962 = vmatprep.mubr.msk.f32.mxu1 %vm7119_vm0, %v7120_v2 }
 0x944   :  { %6446 = vmatprep.subr.bf16.mxu1 %v7118_v1 }
 0x947   :  { %6448 = vmatpush3.bf16.msra.mxu1 %v7490_v41 }
 0x948   :  { %6455 = vmatprep.subr.bf16.mxu1 %v7118_v1 }
 0x94a   :  { %5963 = vmatmul.mubr.msk.f32.vlgmr.msra.gmra.mrb[14].mxu1 %vm387_vm2, %v1508_v7 }
 0x94b   :  { %6457 = vmatpush3.bf16.msra.mxu1 %v7417_v6  ;;  %5984 = vmatprep.mubr.msk.f32.mxu1 %vm7119_vm0, %v7120_v2 }
 0x94c   :  { %6458 = vmatprep.subr.bf16.mxu1 %v7118_v1 }
 0x94f   :  { %6460 = vmatpush3.bf16.msra.mxu1 %v7434_v11 }
 0x950   :  { %6467 = vmatprep.subr.bf16.mxu1 %v7118_v1 }
 0x952   :  { %5985 = vmatmul.mubr.msk.f32.vlgmr.msra.gmra.mrb[16].mxu1 %vm387_vm2, %v1508_v7 }
 0x953   :  { %6469 = vmatpush3.bf16.msra.mxu1 %v7544_v22  ;;  %6006 = vmatprep.mubr.msk.f32.mxu1 %vm7119_vm0, %v7120_v2 }
 0x954   :  { %6470 = vmatprep.subr.bf16.mxu1 %v7118_v1 }
 0x957   :  { %6472 = vmatpush3.bf16.msra.mxu1 %v7560_v28 }
 0x958   :  { %6479 = vmatprep.subr.bf16.mxu1 %v7118_v1 }
 0x9fd   :  { %v1037_v8 = vpop.f32.mrb[8].mxu1 }
 0x9fe   :  { %v5898_v9 = vpop.f32.mrb[9].mxu1 }
 0xa0d   :  { %v1237_v10 = vpop.f32.mrb[10].mxu1 }
 0xa0e   :  { %v1238_v14 = vadd.f32 %v1237_v10, %v1037_v8  ;;  %v5920_v15 = vpop.f32.mrb[11].mxu1 }
 0xa10   :  { %v1241_v17 = vadd.f32 %v7642_v56, %v1238_v14 }
 0xa12   :  { %6705 = vtanh.f32 %v1241_v17  ;;  %v5461_v36 = vmul.f32 -1.442695, %v1241_v17 }
 0xa15   :  { %v1402_v18 = vpop.f32.mrb[12].mxu1 }
 0xa16   :  { %v5942_v19 = vpop.f32.mrb[13].mxu1 }
 0xa1c   :  { %v6706_v20 = vpop.eup %6705 }
 0xa1d   :  { %v1577_v21 = vpop.f32.mrb[14].mxu1  ;;  %1251 = vrot.lane.b32.xlu0 %v6706_v20, %s7121_s10 }
 0xa1e   :  { %v1578_v23 = vadd.f32 %v1577_v21, %v1402_v18  ;;  %v5964_v24 = vpop.f32.mrb[15].mxu1 }
 0xa20   :  { %v1581_v25 = vadd.f32 %v7511_v47, %v1578_v23 }
 0xa22   :  { %6707 = vtanh.f32 %v1581_v25  ;;  %v5467_v40 = vmul.f32 -1.442695, %v1581_v25 }
 0xa25   :  { %v1772_v27 = vpop.f32.mrb[16].mxu1 }
 0xa26   :  { %v1921_v29 = vadd.f32 %v1772_v27, %v330_v26  ;;  %v5986_v30 = vpop.f32.mrb[17].mxu1 }
 0xa28   :  { %6709 = vtanh.f32 %v1921_v29  ;;  %v5473_v43 = vmul.f32 -1.442695, %v1921_v29 }
 0xa29   :  { %6711 = vpow2.f32 %v5461_v36 }
 0xa2a   :  { %6713 = vpow2.f32 %v5467_v40 }
 0xa2c   :  { %v6708_v31 = vpop.eup %6707 }
 0xa2d   :  { %1591 = vrot.lane.b32.xlu1 %v6708_v31, %s7121_s10 }
 0xa32   :  { %v6710_v33 = vpop.eup %6709 }
 0xa33   :  { %1931 = vrot.lane.b32.xlu0 %v6710_v33, %s7121_s10  ;;  %v6712_v38 = vpop.eup %6711 }
 0xa34   :  { %v1245_v42 = vadd.f32 1.0, %v6712_v38  ;;  %v6714_v45 = vpop.eup %6713 }
 0xa35   :  { %v1585_v54 = vadd.f32 1.0, %v6714_v45 }
 0xa36   :  { %6715 = vrcp.f32 %v1245_v42 }
 0xa37   :  { %6717 = vpow2.f32 %v5473_v43 }
 0xa38   :  { %6719 = vrcp.f32 %v1585_v54 }
 0xa40   :  { %v6716_v44 = vpop.eup %6715 }
 0xa41   :  { %v6718_v57 = vpop.eup %6717  ;;  %v1249_v16 = vmul.f32 %v6716_v44, %v7653_v46 }
 0xa42   :  { %v1925_v58 = vadd.f32 1.0, %v6718_v57  ;;  %v6720_v60 = vpop.eup %6719 }
 0xa43   :  { %v1589_v7 = vmul.f32 %v6720_v60, %v7658_v55 }
 0xa44   :  { %6721 = vrcp.f32 %v1925_v58 }
 0xa4e   :  { %v6722_v12 = vpop.eup %6721 }
 0xa4f   :  { %v1929_v10 = vmul.f32 %v6722_v12, %v7662_v59 }
 0xa8f   :  { %v1252_v52 = vpop.permute.xlu0 %1251 }
 0xa90   :  { %v1254_v53 = vmul.f32 %v6716_v44, %v1252_v52  ;;  %v335_v52 = vadd.f32 %v7445_v13, %v7608_v49 }
 0xa92   :  { %1256 = vrot.lane.b32.xlu1 %v1254_v53, %s7122_s29 }
 0xa9f   :  { %v1592_v61 = vpop.permute.xlu1 %1591 }
 0xaa0   :  { %v1594_v62 = vmul.f32 %v6720_v60, %v1592_v61 }
 0xaa2   :  { %1596 = vrot.lane.b32.xlu0 %v1594_v62, %s7122_s29 }
 0xaa5   :  { %v1932_v63 = vpop.permute.xlu0 %1931 }
 0xaa6   :  { %v1934_v0 = vmul.f32 %v6722_v12, %v1932_v63 }
 0xaa8   :  { %1936 = vrot.lane.b32.xlu1 %v1934_v0, %s7122_s29 }
 0xb04   :  { %v1257_v3 = vpop.permute.xlu1 %1256 }
 0xb05   :  { %v7716_v4 = vadd.f32 %v1257_v3, %v1249_v16 }
 0xb07   :  { %6723 = vtanh.f32 %v7716_v4 }
 0xb11   :  { %v6724_v5 = vpop.eup %6723 }
 0xb12   :  { %1262 = vrot.lane.b32.xlu0 %v6724_v5, %s7121_s10 }
 0xb14   :  { %v1597_v8 = vpop.permute.xlu0 %1596 }
 0xb15   :  { %v7721_v9 = vadd.f32 %v1597_v8, %v1589_v7 }
 0xb17   :  { %6725 = vtanh.f32 %v7721_v9 }
 0xb1a   :  { %v1937_v14 = vpop.permute.xlu1 %1936 }
 0xb1b   :  { %v7725_v15 = vadd.f32 %v1937_v14, %v1929_v10 }
 0xb1d   :  { %6727 = vtanh.f32 %v7725_v15 }
 0xb21   :  { %v6726_v46 = vpop.eup %6725 }
 0xb22   :  { %1602 = vrot.lane.b32.xlu1 %v6726_v46, %s7121_s10 }
 0xb27   :  { %v6728_v17 = vpop.eup %6727 }
 0xb28   :  { %1942 = vrot.lane.b32.xlu0 %v6728_v17, %s7121_s10 }
 0xb84   :  { %v1263_v18 = vpop.permute.xlu0 %1262 }
 0xb85   :  { %v1265_v55 = vmul.f32 %v6716_v44, %v1263_v18 }
 0xb87   :  { %1407 = vrot.lane.b32.xlu1 %v1265_v55, %s7122_s29 }
 0xb94   :  { %v1603_v19 = vpop.permute.xlu1 %1602 }
 0xb95   :  { %v1605_v20 = vmul.f32 %v6720_v60, %v1603_v19 }
 0xb97   :  { %1607 = vrot.lane.b32.xlu0 %v1605_v20, %s7122_s29 }
 0xb9a   :  { %v1943_v59 = vpop.permute.xlu0 %1942 }
 0xb9b   :  { %v1945_v21 = vmul.f32 %v6722_v12, %v1943_v59 }
 0xb9d   :  { %1947 = vrot.lane.b32.xlu1 %v1945_v21, %s7122_s29 }
 0xbf9   :  { %v1408_v23 = vpop.permute.xlu1 %1407 }
 0xbfa   :  { %5952 = vmatmul.mubr.msk.f32.vlgmr.msra.gmra.mrb[18].mxu0 %vm387_vm2, %v1408_v23 }
 0xbfb   :  { %6451 = vmatpush3.bf16.msra.mxu0 %v7585_v35  ;;  %5973 = vmatprep.mubr.msk.f32.mxu0 %vm7119_vm0, %v7120_v2 }
 0xbfc   :  { %6452 = vmatprep.subr.bf16.mxu0 %v7118_v1 }
 0xbff   :  { %6454 = vmatpush3.bf16.msra.mxu0 %v7595_v39 }
 0xc00   :  { %6461 = vmatprep.subr.bf16.mxu0 %v7118_v1 }
 0xc09   :  { %v1608_v24 = vpop.permute.xlu0 %1607 }
 0xc0a   :  { %5974 = vmatmul.mubr.msk.f32.vlgmr.msra.gmra.mrb[20].mxu0 %vm387_vm2, %v1608_v24 }
 0xc0b   :  { %6463 = vmatpush3.bf16.msra.mxu0 %v7462_v32  ;;  %5995 = vmatprep.mubr.msk.f32.mxu0 %vm7119_vm0, %v7120_v2 }
 0xc0c   :  { %6464 = vmatprep.subr.bf16.mxu0 %v7118_v1 }
 0xc0f   :  { %6466 = vmatpush3.bf16.msra.mxu0 %v7468_v34  ;;  %v1948_v25 = vpop.permute.xlu1 %1947 }
 0xc10   :  { %6473 = vmatprep.subr.bf16.mxu0 %v7118_v1 }
 0xc12   :  { %5996 = vmatmul.mubr.msk.f32.vlgmr.msra.gmra.mrb[22].mxu0 %vm387_vm2, %v1608_v24 }
 0xc13   :  { %6475 = vmatpush3.bf16.msra.mxu0 %v7478_v37  ;;  %6017 = vmatprep.mubr.msk.f32.mxu0 %vm7119_vm0, %v7120_v2 }
 0xc14   :  { %6476 = vmatprep.subr.bf16.mxu0 %v7118_v1 }
 0xc17   :  { %6478 = vmatpush3.bf16.msra.mxu0 %v7490_v41 }
 0xc18   :  { %6485 = vmatprep.subr.bf16.mxu0 %v7118_v1 }
 0xc1a   :  { %6018 = vmatmul.mubr.msk.f32.vlgmr.msra.gmra.mrb[24].mxu0 %vm387_vm2, %v1948_v25 }
 0xc1b   :  { %6487 = vmatpush3.bf16.msra.mxu0 %v7417_v6  ;;  %6039 = vmatprep.mubr.msk.f32.mxu0 %vm7119_vm0, %v7120_v2 }
 0xc1c   :  { %6488 = vmatprep.subr.bf16.mxu0 %v7118_v1 }
 0xc1f   :  { %6490 = vmatpush3.bf16.msra.mxu0 %v7434_v11 }
 0xc20   :  { %6497 = vmatprep.subr.bf16.mxu0 %v7118_v1 }
 0xc22   :  { %6040 = vmatmul.mubr.msk.f32.vlgmr.msra.gmra.mrb[26].mxu0 %vm387_vm2, %v1948_v25 }
 0xc23   :  { %6499 = vmatpush3.bf16.msra.mxu0 %v7544_v22  ;;  %6061 = vmatprep.mubr.msk.f32.mxu0 %vm7119_vm0, %v7120_v2 }
 0xc24   :  { %6500 = vmatprep.subr.bf16.mxu0 %v7118_v1 }
 0xc27   :  { %6502 = vmatpush3.bf16.msra.mxu0 %v7560_v28 }
 0xc28   :  { %6509 = vmatprep.subr.bf16.mxu0 %v7118_v1 }
 0xccd   :  { %v1477_v26 = vpop.f32.mrb[18].mxu0 }
 0xcce   :  { %v5953_v27 = vpop.f32.mrb[19].mxu0 }
 0xcdd   :  { %v1677_v29 = vpop.f32.mrb[20].mxu0 }
 0xcde   :  { %v1678_v30 = vadd.f32 %v1677_v29, %v1477_v26  ;;  %v5975_v31 = vpop.f32.mrb[21].mxu0 }
 0xce0   :  { %v1681_v33 = vadd.f32 %v7642_v56, %v1678_v30 }
 0xce2   :  { %6729 = vtanh.f32 %v1681_v33  ;;  %v5469_v61 = vmul.f32 -1.442695, %v1681_v33 }
 0xce5   :  { %v1842_v36 = vpop.f32.mrb[22].mxu0 }
 0xce6   :  { %v5997_v38 = vpop.f32.mrb[23].mxu0 }
 0xcec   :  { %v6730_v40 = vpop.eup %6729 }
 0xced   :  { %v2017_v42 = vpop.f32.mrb[24].mxu0  ;;  %1691 = vrot.lane.b32.xlu0 %v6730_v40, %s7121_s10 }
 0xcee   :  { %v2018_v43 = vadd.f32 %v2017_v42, %v1842_v36  ;;  %v6019_v45 = vpop.f32.mrb[25].mxu0 }
 0xcf0   :  { %v2021_v44 = vadd.f32 %v7511_v47, %v2018_v43 }
 0xcf2   :  { %6731 = vtanh.f32 %v2021_v44  ;;  %v5475_v12 = vmul.f32 -1.442695, %v2021_v44 }
 0xcf5   :  { %v2212_v53 = vpop.f32.mrb[26].mxu0 }
 0xcf6   :  { %v2361_v54 = vadd.f32 %v2212_v53, %v335_v52  ;;  %v6041_v57 = vpop.f32.mrb[27].mxu0 }
 0xcf8   :  { %6733 = vtanh.f32 %v2361_v54  ;;  %v5481_v0 = vmul.f32 -1.442695, %v2361_v54 }
 0xcf9   :  { %6735 = vpow2.f32 %v5469_v61 }
 0xcfa   :  { %6737 = vpow2.f32 %v5475_v12 }
 0xcfc   :  { %v6732_v58 = vpop.eup %6731 }
 0xcfd   :  { %2031 = vrot.lane.b32.xlu1 %v6732_v58, %s7121_s10 }
 0xd02   :  { %v6734_v60 = vpop.eup %6733 }
 0xd03   :  { %2371 = vrot.lane.b32.xlu0 %v6734_v60, %s7121_s10  ;;  %v6736_v62 = vpop.eup %6735 }
 0xd04   :  { %v1685_v63 = vadd.f32 1.0, %v6736_v62  ;;  %v6738_v13 = vpop.eup %6737 }
 0xd05   :  { %v2025_v5 = vadd.f32 1.0, %v6738_v13  ;;  %v7834_v13 = vld [vmem:[#allocation5] ss:$0 sm:$0xff] }
 0xd06   :  { %6739 = vrcp.f32 %v1685_v63 }
 0xd07   :  { %6741 = vpow2.f32 %v5481_v0 }
 0xd08   :  { %6743 = vrcp.f32 %v2025_v5 }
 0xd10   :  { %v6740_v49 = vpop.eup %6739 }
 0xd11   :  { %v6742_v7 = vpop.eup %6741  ;;  %v1689_v19 = vmul.f32 %v6740_v49, %v7716_v4 }
 0xd12   :  { %v2365_v8 = vadd.f32 1.0, %v6742_v7  ;;  %v6744_v10 = vpop.eup %6743 }
 0xd13   :  { %v2029_v23 = vmul.f32 %v6744_v10, %v7721_v9 }
 0xd14   :  { %6745 = vrcp.f32 %v2365_v8 }
 0xd1e   :  { %v6746_v17 = vpop.eup %6745 }
 0xd1f   :  { %v2369_v26 = vmul.f32 %v6746_v17, %v7725_v15 }
 0xd5f   :  { %v1692_v16 = vpop.permute.xlu0 %1691 }
 0xd60   :  { %v1694_v3 = vmul.f32 %v6740_v49, %v1692_v16 }
 0xd62   :  { %1696 = vrot.lane.b32.xlu1 %v1694_v3, %s7122_s29 }
 0xd6f   :  { %v2032_v14 = vpop.permute.xlu1 %2031 }
 0xd70   :  { %v2034_v46 = vmul.f32 %v6744_v10, %v2032_v14 }
 0xd72   :  { %2036 = vrot.lane.b32.xlu0 %v2034_v46, %s7122_s29 }
 0xd75   :  { %v2372_v18 = vpop.permute.xlu0 %2371 }
 0xd76   :  { %v2374_v55 = vmul.f32 %v6746_v17, %v2372_v18 }
 0xd78   :  { %2376 = vrot.lane.b32.xlu1 %v2374_v55, %s7122_s29 }
 0xdd4   :  { %v1697_v20 = vpop.permute.xlu1 %1696 }
 0xdd5   :  { %v7779_v59 = vadd.f32 %v1697_v20, %v1689_v19 }
 0xdd7   :  { %6747 = vtanh.f32 %v7779_v59 }
 0xde1   :  { %v6748_v21 = vpop.eup %6747 }
 0xde2   :  { %1702 = vrot.lane.b32.xlu0 %v6748_v21, %s7121_s10 }
 0xde4   :  { %v2037_v24 = vpop.permute.xlu0 %2036 }
 0xde5   :  { %v7784_v25 = vadd.f32 %v2037_v24, %v2029_v23 }
 0xde7   :  { %6749 = vtanh.f32 %v7784_v25 }
 0xdea   :  { %v2377_v27 = vpop.permute.xlu1 %2376 }
 0xdeb   :  { %v7788_v29 = vadd.f32 %v2377_v27, %v2369_v26 }
 0xded   :  { %6751 = vtanh.f32 %v7788_v29 }
 0xdf1   :  { %v6750_v4 = vpop.eup %6749 }
 0xdf2   :  { %2042 = vrot.lane.b32.xlu1 %v6750_v4, %s7121_s10 }
 0xdf7   :  { %v6752_v30 = vpop.eup %6751 }
 0xdf8   :  { %2382 = vrot.lane.b32.xlu0 %v6752_v30, %s7121_s10 }
 0xe54   :  { %v1703_v31 = vpop.permute.xlu0 %1702 }
 0xe55   :  { %v1705_v9 = vmul.f32 %v6740_v49, %v1703_v31  ;;  %v340_v49 = vadd.f32 %v7834_v13, %v7606_v48 }
 0xe57   :  { %1847 = vrot.lane.b32.xlu1 %v1705_v9, %s7122_s29 }
 0xe64   :  { %v2043_v33 = vpop.permute.xlu1 %2042 }
 0xe65   :  { %v2045_v36 = vmul.f32 %v6744_v10, %v2043_v33 }
 0xe67   :  { %2047 = vrot.lane.b32.xlu0 %v2045_v36, %s7122_s29 }
 0xe6a   :  { %v2383_v15 = vpop.permute.xlu0 %2382 }
 0xe6b   :  { %v2385_v38 = vmul.f32 %v6746_v17, %v2383_v15 }
 0xe6d   :  { %2387 = vrot.lane.b32.xlu1 %v2385_v38, %s7122_s29 }
 0xec9   :  { %v1848_v40 = vpop.permute.xlu1 %1847 }
 0xeca   :  { %6007 = vmatmul.mubr.msk.f32.vlgmr.msra.gmra.mrb[18].mxu1 %vm387_vm2, %v1848_v40 }
 0xecb   :  { %6481 = vmatpush3.bf16.msra.mxu1 %v7585_v35  ;;  %6028 = vmatprep.mubr.msk.f32.mxu1 %vm7119_vm0, %v7120_v2 }
 0xecc   :  { %6482 = vmatprep.subr.bf16.mxu1 %v7118_v1 }
 0xecf   :  { %6484 = vmatpush3.bf16.msra.mxu1 %v7595_v39 }
 0xed0   :  { %6491 = vmatprep.subr.bf16.mxu1 %v7118_v1 }
 0xed9   :  { %v2048_v42 = vpop.permute.xlu0 %2047 }
 0xeda   :  { %6029 = vmatmul.mubr.msk.f32.vlgmr.msra.gmra.mrb[20].mxu1 %vm387_vm2, %v2048_v42 }
 0xedb   :  { %6493 = vmatpush3.bf16.msra.mxu1 %v7462_v32  ;;  %6050 = vmatprep.mubr.msk.f32.mxu1 %vm7119_vm0, %v7120_v2 }
 0xedc   :  { %6494 = vmatprep.subr.bf16.mxu1 %v7118_v1 }
 0xedf   :  { %6496 = vmatpush3.bf16.msra.mxu1 %v7468_v34  ;;  %v2388_v43 = vpop.permute.xlu1 %2387 }
 0xee0   :  { %6503 = vmatprep.subr.bf16.mxu1 %v7118_v1 }
 0xee2   :  { %6051 = vmatmul.mubr.msk.f32.vlgmr.msra.gmra.mrb[22].mxu1 %vm387_vm2, %v2048_v42 }
 0xee3   :  { %6505 = vmatpush3.bf16.msra.mxu1 %v7478_v37  ;;  %6072 = vmatprep.mubr.msk.f32.mxu1 %vm7119_vm0, %v7120_v2 }
 0xee4   :  { %6506 = vmatprep.subr.bf16.mxu1 %v7118_v1 }
 0xee7   :  { %6508 = vmatpush3.bf16.msra.mxu1 %v7490_v41 }
 0xee8   :  { %6515 = vmatprep.subr.bf16.mxu1 %v7118_v1 }
 0xeea   :  { %6073 = vmatmul.mubr.msk.f32.vlgmr.msra.gmra.mrb[24].mxu1 %vm387_vm2, %v2388_v43 }
 0xeeb   :  { %6517 = vmatpush3.bf16.msra.mxu1 %v7417_v6  ;;  %6094 = vmatprep.mubr.msk.f32.mxu1 %vm7119_vm0, %v7120_v2 }
 0xeec   :  { %6518 = vmatprep.subr.bf16.mxu1 %v7118_v1 }
 0xeef   :  { %6520 = vmatpush3.bf16.msra.mxu1 %v7434_v11 }
 0xef0   :  { %6527 = vmatprep.subr.bf16.mxu1 %v7118_v1 }
 0xef2   :  { %6095 = vmatmul.mubr.msk.f32.vlgmr.msra.gmra.mrb[26].mxu1 %vm387_vm2, %v2388_v43 }
 0xef3   :  { %6529 = vmatpush3.bf16.msra.mxu1 %v7544_v22  ;;  %6116 = vmatprep.mubr.msk.f32.mxu1 %vm7119_vm0, %v7120_v2 }
 0xef4   :  { %6530 = vmatprep.subr.bf16.mxu1 %v7118_v1 }
 0xef7   :  { %6532 = vmatpush3.bf16.msra.mxu1 %v7560_v28 }
 0xef8   :  { %6539 = vmatprep.subr.bf16.mxu1 %v7118_v1 }
 0xf9d   :  { %v1917_v45 = vpop.f32.mrb[18].mxu1 }
 0xf9e   :  { %v6008_v44 = vpop.f32.mrb[19].mxu1 }
 0xfad   :  { %v2117_v52 = vpop.f32.mrb[20].mxu1 }
 0xfae   :  { %v2118_v53 = vadd.f32 %v2117_v52, %v1917_v45  ;;  %v6030_v54 = vpop.f32.mrb[21].mxu1 }
 0xfb0   :  { %v2121_v57 = vadd.f32 %v7642_v56, %v2118_v53 }
 0xfb2   :  { %6753 = vtanh.f32 %v2121_v57  ;;  %v5477_v10 = vmul.f32 -1.442695, %v2121_v57 }
 0xfb5   :  { %v2282_v58 = vpop.f32.mrb[22].mxu1 }
 0xfb6   :  { %v6052_v60 = vpop.f32.mrb[23].mxu1 }
 0xfbc   :  { %v6754_v61 = vpop.eup %6753 }
 0xfbd   :  { %v2457_v62 = vpop.f32.mrb[24].mxu1  ;;  %2131 = vrot.lane.b32.xlu0 %v6754_v61, %s7121_s10 }
 0xfbe   :  { %v2458_v12 = vadd.f32 %v2457_v62, %v2282_v58  ;;  %v6074_v63 = vpop.f32.mrb[25].mxu1 }
 0xfc0   :  { %v2461_v0 = vadd.f32 %v7511_v47, %v2458_v12 }
 0xfc2   :  { %6755 = vtanh.f32 %v2461_v0  ;;  %v5483_v47 = vmul.f32 -1.442695, %v2461_v0 }
 0xfc5   :  { %v2652_v16 = vpop.f32.mrb[26].mxu1 }
 0xfc6   :  { %v2801_v3 = vadd.f32 %v2652_v16, %v340_v49  ;;  %v6096_v5 = vpop.f32.mrb[27].mxu1 }
 0xfc8   :  { %6757 = vtanh.f32 %v2801_v3  ;;  %v5489_v17 = vmul.f32 -1.442695, %v2801_v3 }
 0xfc9   :  { %6759 = vpow2.f32 %v5477_v10 }
 0xfca   :  { %6761 = vpow2.f32 %v5483_v47 }
 0xfcc   :  { %v6756_v7 = vpop.eup %6755 }
 0xfcd   :  { %2471 = vrot.lane.b32.xlu1 %v6756_v7, %s7121_s10 }
 0xfd2   :  { %v6758_v8 = vpop.eup %6757 }
 0xfd3   :  { %2811 = vrot.lane.b32.xlu0 %v6758_v8, %s7121_s10  ;;  %v6760_v14 = vpop.eup %6759 }
 0xfd4   :  { %v2125_v46 = vadd.f32 1.0, %v6760_v14  ;;  %v6762_v48 = vpop.eup %6761 }
 0xfd5   :  { %v2465_v20 = vadd.f32 1.0, %v6762_v48 }
 0xfd6   :  { %6763 = vrcp.f32 %v2125_v46  ;;  %v7901_v46 = vld [vmem:[%s8255_s6] ss:$0 sm:$0xff]  ;;  %s7123_s6 = smov 96  }
 0xfd7   :  { %6765 = vpow2.f32 %v5489_v17 }
 0xfd8   :  { %6767 = vrcp.f32 %v2465_v20 }
 0xfe0   :  { %v6764_v18 = vpop.eup %6763 }
 0xfe1   :  { %v6766_v21 = vpop.eup %6765  ;;  %v2129_v9 = vmul.f32 %v6764_v18, %v7779_v59 }
 0xfe2   :  { %v2805_v23 = vadd.f32 1.0, %v6766_v21  ;;  %v6768_v24 = vpop.eup %6767 }
 0xfe3   :  { %v2469_v38 = vmul.f32 %v6768_v24, %v7784_v25 }
 0xfe4   :  { %6769 = vrcp.f32 %v2805_v23 }
 0xfee   :  { %v6770_v4 = vpop.eup %6769 }
 0xfef   :  { %v2809_v43 = vmul.f32 %v6770_v4, %v7788_v29 }
0x102f   :  { %v2132_v55 = vpop.permute.xlu0 %2131 }
0x1030   :  { %v2134_v19 = vmul.f32 %v6764_v18, %v2132_v55 }
0x1032   :  { %2136 = vrot.lane.b32.xlu1 %v2134_v19, %s7122_s29 }
0x103f   :  { %v2472_v26 = vpop.permute.xlu1 %2471 }
0x1040   :  { %v2474_v27 = vmul.f32 %v6768_v24, %v2472_v26 }
0x1042   :  { %2476 = vrot.lane.b32.xlu0 %v2474_v27, %s7122_s29 }
0x1045   :  { %v2812_v30 = vpop.permute.xlu0 %2811 }
0x1046   :  { %v2814_v31 = vmul.f32 %v6770_v4, %v2812_v30 }
0x1048   :  { %2816 = vrot.lane.b32.xlu1 %v2814_v31, %s7122_s29 }
0x10a4   :  { %v2137_v33 = vpop.permute.xlu1 %2136 }
0x10a5   :  { %v7844_v36 = vadd.f32 %v2137_v33, %v2129_v9 }
0x10a7   :  { %6771 = vtanh.f32 %v7844_v36 }
0x10b1   :  { %v6772_v15 = vpop.eup %6771 }
0x10b2   :  { %2142 = vrot.lane.b32.xlu0 %v6772_v15, %s7121_s10 }
0x10b4   :  { %v2477_v40 = vpop.permute.xlu0 %2476 }
0x10b5   :  { %v7849_v42 = vadd.f32 %v2477_v40, %v2469_v38 }
0x10b7   :  { %6773 = vtanh.f32 %v7849_v42 }
0x10ba   :  { %v2817_v45 = vpop.permute.xlu1 %2816 }
0x10bb   :  { %v7853_v44 = vadd.f32 %v2817_v45, %v2809_v43 }
0x10bd   :  { %6775 = vtanh.f32 %v7853_v44 }
0x10c1   :  { %v6774_v59 = vpop.eup %6773 }
0x10c2   :  { %2482 = vrot.lane.b32.xlu1 %v6774_v59, %s7121_s10 }
0x10c7   :  { %v6776_v52 = vpop.eup %6775 }
0x10c8   :  { %2822 = vrot.lane.b32.xlu0 %v6776_v52, %s7121_s10 }
0x1124   :  { %v2143_v53 = vpop.permute.xlu0 %2142 }
0x1125   :  { %v2145_v25 = vmul.f32 %v6764_v18, %v2143_v53 }
0x1127   :  { %2287 = vrot.lane.b32.xlu1 %v2145_v25, %s7122_s29 }
0x1134   :  { %v2483_v54 = vpop.permute.xlu1 %2482 }
0x1135   :  { %v2485_v57 = vmul.f32 %v6768_v24, %v2483_v54 }
0x1137   :  { %2487 = vrot.lane.b32.xlu0 %v2485_v57, %s7122_s29 }
0x113a   :  { %v2823_v29 = vpop.permute.xlu0 %2822 }
0x113b   :  { %v2825_v58 = vmul.f32 %v6770_v4, %v2823_v29 }
0x113d   :  { %2827 = vrot.lane.b32.xlu1 %v2825_v58, %s7122_s29 }
0x1199   :  { %v2288_v60 = vpop.permute.xlu1 %2287 }
0x119a   :  { %6062 = vmatmul.mubr.msk.f32.vlgmr.msra.gmra.mrb[28].mxu0 %vm387_vm2, %v2288_v60 }
0x119b   :  { %6511 = vmatpush3.bf16.msra.mxu0 %v7585_v35  ;;  %6083 = vmatprep.mubr.msk.f32.mxu0 %vm7119_vm0, %v7120_v2 }
0x119c   :  { %6512 = vmatprep.subr.bf16.mxu0 %v7118_v1 }
0x119f   :  { %6514 = vmatpush3.bf16.msra.mxu0 %v7595_v39 }
0x11a0   :  { %6521 = vmatprep.subr.bf16.mxu0 %v7118_v1 }
0x11a9   :  { %v2488_v61 = vpop.permute.xlu0 %2487 }
0x11aa   :  { %6084 = vmatmul.mubr.msk.f32.vlgmr.msra.gmra.mrb[30].mxu0 %vm387_vm2, %v2488_v61 }
0x11ab   :  { %6523 = vmatpush3.bf16.msra.mxu0 %v7462_v32  ;;  %6105 = vmatprep.mubr.msk.f32.mxu0 %vm7119_vm0, %v7120_v2 }
0x11ac   :  { %6524 = vmatprep.subr.bf16.mxu0 %v7118_v1 }
0x11af   :  { %6526 = vmatpush3.bf16.msra.mxu0 %v7468_v34  ;;  %v2828_v62 = vpop.permute.xlu1 %2827 }
0x11b0   :  { %6533 = vmatprep.subr.bf16.mxu0 %v7118_v1 }
0x11b2   :  { %6106 = vmatmul.mubr.msk.f32.vlgmr.msra.gmra.mrb[32].mxu0 %vm387_vm2, %v2488_v61 }
0x11b3   :  { %6535 = vmatpush3.bf16.msra.mxu0 %v7478_v37  ;;  %6127 = vmatprep.mubr.msk.f32.mxu0 %vm7119_vm0, %v7120_v2 }
0x11b4   :  { %6536 = vmatprep.subr.bf16.mxu0 %v7118_v1 }
0x11b7   :  { %6538 = vmatpush3.bf16.msra.mxu0 %v7490_v41 }
0x11b8   :  { %6545 = vmatprep.subr.bf16.mxu0 %v7118_v1 }
0x11ba   :  { %6128 = vmatmul.mubr.msk.f32.vlgmr.msra.gmra.mrb[34].mxu0 %vm387_vm2, %v2828_v62 }
0x11bb   :  { %6547 = vmatpush3.bf16.msra.mxu0 %v7417_v6  ;;  %6149 = vmatprep.mubr.msk.f32.mxu0 %vm7119_vm0, %v7120_v2 }
0x11bc   :  { %6548 = vmatprep.subr.bf16.mxu0 %v7118_v1 }
0x11bf   :  { %6550 = vmatpush3.bf16.msra.mxu0 %v7434_v11 }
0x11c0   :  { %6557 = vmatprep.subr.bf16.mxu0 %v7118_v1 }
0x11c2   :  { %6150 = vmatmul.mubr.msk.f32.vlgmr.msra.gmra.mrb[36].mxu0 %vm387_vm2, %v2828_v62 }
0x11c3   :  { %6559 = vmatpush3.bf16.msra.mxu0 %v7544_v22  ;;  %6171 = vmatprep.mubr.msk.f32.mxu0 %vm7119_vm0, %v7120_v2 }
0x11c4   :  { %6560 = vmatprep.subr.bf16.mxu0 %v7118_v1 }
0x11c7   :  { %6562 = vmatpush3.bf16.msra.mxu0 %v7560_v28 }
0x11c8   :  { %6569 = vmatprep.subr.bf16.mxu0 %v7118_v1 }
0x126d   :  { %v2357_v12 = vpop.f32.mrb[28].mxu0 }
0x126e   :  { %v6063_v63 = vpop.f32.mrb[29].mxu0 }
0x127d   :  { %v2557_v0 = vpop.f32.mrb[30].mxu0 }
0x127e   :  { %v2558_v49 = vadd.f32 %v2557_v0, %v2357_v12  ;;  %v6085_v16 = vpop.f32.mrb[31].mxu0 }
0x1280   :  { %v2561_v3 = vadd.f32 %v7642_v56, %v2558_v49  ;;  %v345_v56 = vadd.f32 %v7834_v13, %v7612_v51 }
0x1282   :  { %6777 = vtanh.f32 %v2561_v3  ;;  %v5485_v21 = vmul.f32 -1.442695, %v2561_v3 }
0x1285   :  { %v2722_v5 = vpop.f32.mrb[32].mxu0 }
0x1286   :  { %v6107_v7 = vpop.f32.mrb[33].mxu0 }
0x128c   :  { %v6778_v8 = vpop.eup %6777 }
0x128d   :  { %v2897_v10 = vpop.f32.mrb[34].mxu0  ;;  %2571 = vrot.lane.b32.xlu0 %v6778_v8, %s7121_s10 }
0x128e   :  { %v2898_v14 = vadd.f32 %v2897_v10, %v2722_v5  ;;  %v6129_v47 = vpop.f32.mrb[35].mxu0 }
0x1290   :  { %v2901_v17 = vadd.f32 %v7901_v46, %v2898_v14 }
0x1292   :  { %6779 = vtanh.f32 %v2901_v17  ;;  %v5491_v24 = vmul.f32 -1.442695, %v2901_v17  ;;  %v7964_v17 = vld [vmem:[#allocation7] ss:$0 sm:$0xff] }
0x1295   :  { %v3092_v48 = vpop.f32.mrb[36].mxu0 }
0x1296   :  { %v3241_v18 = vadd.f32 %v3092_v48, %v345_v56  ;;  %v6151_v55 = vpop.f32.mrb[37].mxu0 }
0x1298   :  { %6781 = vtanh.f32 %v3241_v18  ;;  %v5497_v27 = vmul.f32 -1.442695, %v3241_v18 }
0x1299   :  { %6783 = vpow2.f32 %v5485_v21  ;;  %v350_v21 = vadd.f32 %v7834_v13, %v7610_v50 }
0x129a   :  { %6785 = vpow2.f32 %v5491_v24 }
0x129c   :  { %v6780_v19 = vpop.eup %6779 }
0x129d   :  { %2911 = vrot.lane.b32.xlu1 %v6780_v19, %s7121_s10 }
0x12a2   :  { %v6782_v20 = vpop.eup %6781 }
0x12a3   :  { %3251 = vrot.lane.b32.xlu0 %v6782_v20, %s7121_s10  ;;  %v6784_v23 = vpop.eup %6783 }
0x12a4   :  { %v2565_v26 = vadd.f32 1.0, %v6784_v23  ;;  %v6786_v51 = vpop.eup %6785 }
0x12a5   :  { %v2905_v9 = vadd.f32 1.0, %v6786_v51 }
0x12a6   :  { %6787 = vrcp.f32 %v2565_v26 }
0x12a7   :  { %6789 = vpow2.f32 %v5497_v27 }
0x12a8   :  { %6791 = vrcp.f32 %v2905_v9 }
0x12b0   :  { %v6788_v4 = vpop.eup %6787 }
0x12b1   :  { %v6790_v33 = vpop.eup %6789  ;;  %v2569_v53 = vmul.f32 %v6788_v4, %v7844_v36 }
0x12b2   :  { %v3245_v15 = vadd.f32 1.0, %v6790_v33  ;;  %v6792_v38 = vpop.eup %6791 }
0x12b3   :  { %v2909_v29 = vmul.f32 %v6792_v38, %v7849_v42 }
0x12b4   :  { %6793 = vrcp.f32 %v3245_v15 }
0x12be   :  { %v6794_v45 = vpop.eup %6793 }
0x12bf   :  { %v3249_v61 = vmul.f32 %v6794_v45, %v7853_v44 }
0x12ff   :  { %v2572_v30 = vpop.permute.xlu0 %2571 }
0x1300   :  { %v2574_v31 = vmul.f32 %v6788_v4, %v2572_v30 }
0x1302   :  { %2576 = vrot.lane.b32.xlu1 %v2574_v31, %s7122_s29 }
0x130f   :  { %v2912_v40 = vpop.permute.xlu1 %2911 }
0x1310   :  { %v2914_v43 = vmul.f32 %v6792_v38, %v2912_v40 }
0x1312   :  { %2916 = vrot.lane.b32.xlu0 %v2914_v43, %s7122_s29 }
0x1315   :  { %v3252_v59 = vpop.permute.xlu0 %3251 }
0x1316   :  { %v3254_v52 = vmul.f32 %v6794_v45, %v3252_v59 }
0x1318   :  { %3256 = vrot.lane.b32.xlu1 %v3254_v52, %s7122_s29 }
0x1374   :  { %v2577_v25 = vpop.permute.xlu1 %2576 }
0x1375   :  { %v7912_v54 = vadd.f32 %v2577_v25, %v2569_v53 }
0x1377   :  { %6795 = vtanh.f32 %v7912_v54 }
0x1381   :  { %v6796_v57 = vpop.eup %6795 }
0x1382   :  { %2582 = vrot.lane.b32.xlu0 %v6796_v57, %s7121_s10 }
0x1384   :  { %v2917_v58 = vpop.permute.xlu0 %2916 }
0x1385   :  { %v7917_v60 = vadd.f32 %v2917_v58, %v2909_v29 }
0x1387   :  { %6797 = vtanh.f32 %v7917_v60 }
0x138a   :  { %v3257_v62 = vpop.permute.xlu1 %3256 }
0x138b   :  { %v7921_v12 = vadd.f32 %v3257_v62, %v3249_v61 }
0x138d   :  { %6799 = vtanh.f32 %v7921_v12 }
0x1391   :  { %v6798_v36 = vpop.eup %6797 }
0x1392   :  { %2922 = vrot.lane.b32.xlu1 %v6798_v36, %s7121_s10 }
0x1397   :  { %v6800_v63 = vpop.eup %6799 }
0x1398   :  { %3262 = vrot.lane.b32.xlu0 %v6800_v63, %s7121_s10 }
0x13f4   :  { %v2583_v0 = vpop.permute.xlu0 %2582 }
0x13f5   :  { %v2585_v42 = vmul.f32 %v6788_v4, %v2583_v0 }
0x13f7   :  { %2727 = vrot.lane.b32.xlu1 %v2585_v42, %s7122_s29 }
0x1404   :  { %v2923_v49 = vpop.permute.xlu1 %2922 }
0x1405   :  { %v2925_v16 = vmul.f32 %v6792_v38, %v2923_v49 }
0x1407   :  { %2927 = vrot.lane.b32.xlu0 %v2925_v16, %s7122_s29 }
0x140a   :  { %v3263_v44 = vpop.permute.xlu0 %3262 }
0x140b   :  { %v3265_v3 = vmul.f32 %v6794_v45, %v3263_v44 }
0x140d   :  { %3267 = vrot.lane.b32.xlu1 %v3265_v3, %s7122_s29 }
0x1469   :  { %v2728_v5 = vpop.permute.xlu1 %2727 }
0x146a   :  { %6117 = vmatmul.mubr.msk.f32.vlgmr.msra.gmra.mrb[28].mxu1 %vm387_vm2, %v2728_v5 }
0x146b   :  { %6541 = vmatpush3.bf16.msra.mxu1 %v7585_v35  ;;  %6138 = vmatprep.mubr.msk.f32.mxu1 %vm7119_vm0, %v7120_v2 }
0x146c   :  { %6542 = vmatprep.subr.bf16.mxu1 %v7118_v1 }
0x146f   :  { %6544 = vmatpush3.bf16.msra.mxu1 %v7595_v39 }
0x1470   :  { %6551 = vmatprep.subr.bf16.mxu1 %v7118_v1 }
0x1479   :  { %v2928_v7 = vpop.permute.xlu0 %2927 }
0x147a   :  { %6139 = vmatmul.mubr.msk.f32.vlgmr.msra.gmra.mrb[30].mxu1 %vm387_vm2, %v2928_v7 }
0x147b   :  { %6553 = vmatpush3.bf16.msra.mxu1 %v7462_v32  ;;  %6160 = vmatprep.mubr.msk.f32.mxu1 %vm7119_vm0, %v7120_v2 }
0x147c   :  { %6554 = vmatprep.subr.bf16.mxu1 %v7118_v1 }
0x147f   :  { %6556 = vmatpush3.bf16.msra.mxu1 %v7468_v34  ;;  %v3268_v8 = vpop.permute.xlu1 %3267 }
0x1480   :  { %6563 = vmatprep.subr.bf16.mxu1 %v7118_v1 }
0x1482   :  { %6161 = vmatmul.mubr.msk.f32.vlgmr.msra.gmra.mrb[32].mxu1 %vm387_vm2, %v2928_v7 }
0x1483   :  { %6565 = vmatpush3.bf16.msra.mxu1 %v7478_v37  ;;  %6182 = vmatprep.mubr.msk.f32.mxu1 %vm7119_vm0, %v7120_v2 }
0x1484   :  { %6566 = vmatprep.subr.bf16.mxu1 %v7118_v1 }
0x1487   :  { %6568 = vmatpush3.bf16.msra.mxu1 %v7490_v41 }
0x1488   :  { %6575 = vmatprep.subr.bf16.mxu1 %v7118_v1 }
0x148a   :  { %6183 = vmatmul.mubr.msk.f32.vlgmr.msra.gmra.mrb[34].mxu1 %vm387_vm2, %v3268_v8 }
0x148b   :  { %6577 = vmatpush3.bf16.msra.mxu1 %v7417_v6  ;;  %6204 = vmatprep.mubr.msk.f32.mxu1 %vm7119_vm0, %v7120_v2 }
0x148c   :  { %6578 = vmatprep.subr.bf16.mxu1 %v7118_v1 }
0x148f   :  { %6580 = vmatpush3.bf16.msra.mxu1 %v7434_v11 }
0x1490   :  { %6587 = vmatprep.subr.bf16.mxu1 %v7118_v1 }
0x1492   :  { %6205 = vmatmul.mubr.msk.f32.vlgmr.msra.gmra.mrb[36].mxu1 %vm387_vm2, %v3268_v8 }
0x1493   :  { %6589 = vmatpush3.bf16.msra.mxu1 %v7544_v22  ;;  %6226 = vmatprep.mubr.msk.f32.mxu1 %vm7119_vm0, %v7120_v2 }
0x1494   :  { %6590 = vmatprep.subr.bf16.mxu1 %v7118_v1 }
0x1497   :  { %6592 = vmatpush3.bf16.msra.mxu1 %v7560_v28 }
0x1498   :  { %6599 = vmatprep.subr.bf16.mxu1 %v7118_v1 }
0x153d   :  { %v2797_v6 = vpop.f32.mrb[28].mxu1 }
0x153e   :  { %v6118_v10 = vpop.f32.mrb[29].mxu1 }
0x154d   :  { %v2997_v14 = vpop.f32.mrb[30].mxu1 }
0x154e   :  { %v2998_v47 = vadd.f32 %v2997_v14, %v2797_v6  ;;  %v6140_v11 = vpop.f32.mrb[31].mxu1 }
0x1550   :  { %v3001_v56 = vadd.f32 %v7964_v17, %v2998_v47 }
0x1552   :  { %6801 = vtanh.f32 %v3001_v56  ;;  %v5493_v4 = vmul.f32 -1.442695, %v3001_v56 }
0x1555   :  { %v3162_v22 = vpop.f32.mrb[32].mxu1 }
0x1556   :  { %v6162_v48 = vpop.f32.mrb[33].mxu1 }
0x155c   :  { %v6802_v18 = vpop.eup %6801 }
0x155d   :  { %v3337_v55 = vpop.f32.mrb[34].mxu1  ;;  %3011 = vrot.lane.b32.xlu0 %v6802_v18, %s7121_s10 }
0x155e   :  { %v3338_v19 = vadd.f32 %v3337_v55, %v3162_v22  ;;  %v6184_v28 = vpop.f32.mrb[35].mxu1 }
0x1560   :  { %v3341_v20 = vadd.f32 %v7901_v46, %v3338_v19 }
0x1562   :  { %6803 = vtanh.f32 %v3341_v20  ;;  %v5499_v31 = vmul.f32 -1.442695, %v3341_v20 }
0x1565   :  { %v3532_v23 = vpop.f32.mrb[36].mxu1 }
0x1566   :  { %v3681_v24 = vadd.f32 %v3532_v23, %v350_v21  ;;  %v6206_v26 = vpop.f32.mrb[37].mxu1 }
0x1568   :  { %6805 = vtanh.f32 %v3681_v24  ;;  %v5505_v33 = vmul.f32 -1.442695, %v3681_v24 }
0x1569   :  { %6807 = vpow2.f32 %v5493_v4 }
0x156a   :  { %6809 = vpow2.f32 %v5499_v31 }
0x156c   :  { %v6804_v27 = vpop.eup %6803 }
0x156d   :  { %3351 = vrot.lane.b32.xlu1 %v6804_v27, %s7121_s10 }
0x1572   :  { %v6806_v51 = vpop.eup %6805 }
0x1573   :  { %3691 = vrot.lane.b32.xlu0 %v6806_v51, %s7121_s10  ;;  %v6808_v30 = vpop.eup %6807 }
0x1574   :  { %v3005_v9 = vadd.f32 1.0, %v6808_v30  ;;  %v6810_v50 = vpop.eup %6809 }
0x1575   :  { %v3345_v40 = vadd.f32 1.0, %v6810_v50 }
0x1576   :  { %6811 = vrcp.f32 %v3005_v9 }
0x1577   :  { %6813 = vpow2.f32 %v5505_v33 }
0x1578   :  { %6815 = vrcp.f32 %v3345_v40 }
0x1580   :  { %v6812_v13 = vpop.eup %6811 }
0x1581   :  { %v6814_v43 = vpop.eup %6813  ;;  %v3009_v58 = vmul.f32 %v6812_v13, %v7912_v54 }
0x1582   :  { %v3685_v45 = vadd.f32 1.0, %v6814_v43  ;;  %v6816_v59 = vpop.eup %6815 }
0x1583   :  { %v3349_v63 = vmul.f32 %v6816_v59, %v7917_v60 }
0x1584   :  { %6817 = vrcp.f32 %v3685_v45 }
0x158e   :  { %v6818_v25 = vpop.eup %6817 }
0x158f   :  { %v3689_v49 = vmul.f32 %v6818_v25, %v7921_v12 }
0x15cf   :  { %v3012_v15 = vpop.permute.xlu0 %3011 }
0x15d0   :  { %v3014_v38 = vmul.f32 %v6812_v13, %v3012_v15 }
0x15d2   :  { %3016 = vrot.lane.b32.xlu1 %v3014_v38, %s7122_s29 }
0x15df   :  { %v3352_v52 = vpop.permute.xlu1 %3351 }
0x15e0   :  { %v3354_v53 = vmul.f32 %v6816_v59, %v3352_v52 }
0x15e2   :  { %3356 = vrot.lane.b32.xlu0 %v3354_v53, %s7122_s29 }
0x15e5   :  { %v3692_v57 = vpop.permute.xlu0 %3691 }
0x15e6   :  { %v3694_v29 = vmul.f32 %v6818_v25, %v3692_v57 }
0x15e8   :  { %3696 = vrot.lane.b32.xlu1 %v3694_v29, %s7122_s29 }
0x1644   :  { %v3017_v61 = vpop.permute.xlu1 %3016 }
0x1645   :  { %v7977_v62 = vadd.f32 %v3017_v61, %v3009_v58 }
0x1647   :  { %6819 = vtanh.f32 %v7977_v62 }
0x1651   :  { %v6820_v36 = vpop.eup %6819 }
0x1652   :  { %3022 = vrot.lane.b32.xlu0 %v6820_v36, %s7121_s10 }
0x1654   :  { %v3357_v0 = vpop.permute.xlu0 %3356 }
0x1655   :  { %v7982_v42 = vadd.f32 %v3357_v0, %v3349_v63 }
0x1657   :  { %6821 = vtanh.f32 %v7982_v42 }
0x165a   :  { %v3697_v16 = vpop.permute.xlu1 %3696 }
0x165b   :  { %v3699_v44 = vadd.f32 %v3697_v16, %v3689_v49 }
0x165d   :  { %6823 = vtanh.f32 %v3699_v44 }
0x1661   :  { %v6822_v54 = vpop.eup %6821 }
0x1662   :  { %3362 = vrot.lane.b32.xlu1 %v6822_v54, %s7121_s10 }
0x1667   :  { %v6824_v3 = vpop.eup %6823 }
0x1668   :  { %3702 = vrot.lane.b32.xlu0 %v6824_v3, %s7121_s10 }
0x16c4   :  { %v3023_v5 = vpop.permute.xlu0 %3022 }
0x16c5   :  { %v3025_v7 = vmul.f32 %v6812_v13, %v3023_v5 }
0x16c7   :  { %3167 = vrot.lane.b32.xlu1 %v3025_v7, %s7122_s29 }
0x16d4   :  { %v3363_v60 = vpop.permute.xlu1 %3362 }
0x16d5   :  { %v3365_v8 = vmul.f32 %v6816_v59, %v3363_v60 }
0x16d7   :  { %3367 = vrot.lane.b32.xlu0 %v3365_v8, %s7122_s29 }
0x16da   :  { %v3703_v6 = vpop.permute.xlu0 %3702 }
0x16db   :  { %v3705_v10 = vmul.f32 %v6818_v25, %v3703_v6 }
0x16dd   :  { %3707 = vrot.lane.b32.xlu1 %v3705_v10, %s7122_s29 }
0x1739   :  { %v3168_v12 = vpop.permute.xlu1 %3167 }
0x173a   :  { %6172 = vmatmul.mubr.msk.f32.vlgmr.msra.gmra.mrb[38].mxu0 %vm387_vm2, %v3168_v12 }
0x173b   :  { %6571 = vmatpush3.bf16.msra.mxu0 %v7585_v35  ;;  %6193 = vmatprep.mubr.msk.f32.mxu0 %vm7119_vm0, %v7120_v2 }
0x173c   :  { %6572 = vmatprep.subr.bf16.mxu0 %v7118_v1 }
0x173f   :  { %6574 = vmatpush3.bf16.msra.mxu0 %v7595_v39 }
0x1740   :  { %6581 = vmatprep.subr.bf16.mxu0 %v7118_v1 }
0x1749   :  { %v3368_v14 = vpop.permute.xlu0 %3367 }
0x174a   :  { %6194 = vmatmul.mubr.msk.f32.vlgmr.msra.gmra.mrb[40].mxu0 %vm387_vm2, %v3368_v14 }
0x174b   :  { %6583 = vmatpush3.bf16.msra.mxu0 %v7462_v32  ;;  %6215 = vmatprep.mubr.msk.f32.mxu0 %vm7119_vm0, %v7120_v2 }
0x174c   :  { %6584 = vmatprep.subr.bf16.mxu0 %v7118_v1 }
0x174f   :  { %6586 = vmatpush3.bf16.msra.mxu0 %v7468_v34  ;;  %v3708_v32 = vpop.permute.xlu1 %3707 }
0x1750   :  { %6593 = vmatprep.subr.bf16.mxu0 %v7118_v1 }
0x1752   :  { %6216 = vmatmul.mubr.msk.f32.vlgmr.msra.gmra.mrb[42].mxu0 %vm387_vm2, %v3368_v14 }
0x1753   :  { %6595 = vmatpush3.bf16.msra.mxu0 %v7478_v37  ;;  %6237 = vmatprep.mubr.msk.f32.mxu0 %vm7119_vm0, %v7120_v2 }
0x1754   :  { %6596 = vmatprep.subr.bf16.mxu0 %v7118_v1 }
0x1757   :  { %6598 = vmatpush3.bf16.msra.mxu0 %v7490_v41 }
0x1758   :  { %6605 = vmatprep.subr.bf16.mxu0 %v7118_v1 }
0x175a   :  { %6238 = vmatmul.mubr.msk.f32.vlgmr.msra.gmra.mrb[44].mxu0 %vm387_vm2, %v3708_v32  ;;  %v5510_v32 = vld [vmem:[#allocation8] ss:$0 sm:$0xff] }
0x175b   :  { %6259 = vmatprep.mubr.msk.f32.mxu0 %vm7119_vm0, %v7120_v2 }
0x180d   :  { %v3237_v34 = vpop.f32.mrb[38].mxu0 }
0x180e   :  { %v6173_v47 = vpop.f32.mrb[39].mxu0 }
0x181d   :  { %v3437_v11 = vpop.f32.mrb[40].mxu0 }
0x181e   :  { %v3438_v56 = vadd.f32 %v3437_v11, %v3237_v34  ;;  %v6195_v37 = vpop.f32.mrb[41].mxu0 }
0x1820   :  { %v3441_v22 = vadd.f32 %v7964_v17, %v3438_v56 }
0x1822   :  { %6825 = vtanh.f32 %v3441_v22  ;;  %v5501_v23 = vmul.f32 -1.442695, %v3441_v22 }
0x1825   :  { %v3602_v48 = vpop.f32.mrb[42].mxu0 }
0x1826   :  { %v6217_v18 = vpop.f32.mrb[43].mxu0 }
0x1827   :  { %v3948_v18 = vld [vmem:[%s8210_s12] sm:$0xff] }
0x182c   :  { %v6826_v55 = vpop.eup %6825 }
0x182d   :  { %v3777_v41 = vpop.f32.mrb[44].mxu0  ;;  %3451 = vrot.lane.b32.xlu0 %v6826_v55, %s7121_s10  ;;  %v3949_v55 = vld [vmem:[%s8210_s12 + $0x8] sm:$0xff] }
0x182e   :  { %v3778_v19 = vadd.f32 %v3777_v41, %v3602_v48  ;;  %v6239_v28 = vpop.f32.mrb[45].mxu0  ;;  %v5511_v48 = vld [vmem:[#allocation10] ss:$0 sm:$0xff]  ;;  %v4034_v41 = vld [vmem:[#allocation13] sm:$0xff] }
0x182f   :  { %v4035_v28 = vld [vmem:[#allocation13 + $0x8] sm:$0xff] }
0x1830   :  { %v3781_v20 = vadd.f32 %v7901_v46, %v3778_v19  ;;  %v6606_v19 = vpack.c.bf16 %v3949_v55, %v3948_v18 }
0x1832   :  { %6827 = vtanh.f32 %v3781_v20  ;;  %v5507_v26 = vmul.f32 -1.442695, %v3781_v20  ;;  %v3950_v20 = vld [vmem:[%s8210_s12 + $0x10] sm:$0xff]  ;;  %6607 = vmatpush3.bf16.msra.mxu0 %v6606_v19 }
0x1833   :  { %6829 = vpow2.f32 %v5501_v23  ;;  %v6612_v23 = vpack.c.bf16 %v4035_v28, %v4034_v41  ;;  %6608 = vmatprep.subr.bf16.mxu0 %v7118_v1  ;;  %v4513_v41 = vld [vmem:[%s8221_s23 + $0x18] sm:$0xff] }
0x1834   :  { %6831 = vpow2.f32 %v5507_v26  ;;  %v4037_v26 = vld [vmem:[#allocation13 + $0x18] sm:$0xff] }
0x183c   :  { %v6828_v21 = vpop.eup %6827 }
0x183d   :  { %3791 = vrot.lane.b32.xlu1 %v6828_v21, %s7121_s10  ;;  %v6830_v24 = vpop.eup %6829  ;;  %v3951_v21 = vld [vmem:[%s8210_s12 + $0x18] sm:$0xff]  ;;  %s7124_s12 = smov 120  }
0x183e   :  { %v3445_v27 = vadd.f32 1.0, %v6830_v24  ;;  %v6832_v51 = vpop.eup %6831  ;;  %v4036_v24 = vld [vmem:[#allocation13 + $0x10] sm:$0xff] }
0x183f   :  { %v3785_v9 = vadd.f32 1.0, %v6832_v51  ;;  %v6615_v51 = vpack.c.bf16 %v4037_v26, %v4036_v24 }
0x1840   :  { %6833 = vrcp.f32 %v3445_v27  ;;  %v6609_v27 = vpack.c.bf16 %v3951_v21, %v3950_v20 }
0x1841   :  { %6835 = vrcp.f32 %v3785_v9 }
0x1842   :  { %6610 = vmatpush3.bf16.msra.mxu0 %v6609_v27 }
0x1843   :  { %6617 = vmatprep.subr.bf16.mxu0 %v7118_v1 }
0x184a   :  { %v6834_v4 = vpop.eup %6833 }
0x184b   :  { %v6836_v46 = vpop.eup %6835  ;;  %v3449_v13 = vmul.f32 %v6834_v4, %v7977_v62 }
0x184c   :  { %v3789_v43 = vmul.f32 %v6836_v46, %v7982_v42 }
0x189f   :  { %v3452_v30 = vpop.permute.xlu0 %3451 }
0x18a0   :  { %v3454_v31 = vmul.f32 %v6834_v4, %v3452_v30 }
0x18a2   :  { %3456 = vrot.lane.b32.xlu0 %v3454_v31, %s7122_s29 }
0x18af   :  { %v3792_v33 = vpop.permute.xlu1 %3791 }
0x18b0   :  { %v3794_v50 = vmul.f32 %v6836_v46, %v3792_v33 }
0x18b2   :  { %3796 = vrot.lane.b32.xlu1 %v3794_v50, %s7122_s29 }
0x1914   :  { %v3457_v15 = vpop.permute.xlu0 %3456 }
0x1915   :  { %v3459_v38 = vadd.f32 %v3457_v15, %v3449_v13 }
0x1917   :  { %6837 = vtanh.f32 %v3459_v38 }
0x1921   :  { %v6838_v40 = vpop.eup %6837 }
0x1922   :  { %3462 = vrot.lane.b32.xlu0 %v6838_v40, %s7121_s10  ;;  %v4116_v40 = vld [vmem:[#allocation16 + $0x8] sm:$0xff] }
0x1924   :  { %v3797_v45 = vpop.permute.xlu1 %3796 }
0x1925   :  { %v3799_v59 = vadd.f32 %v3797_v45, %v3789_v43  ;;  %v4117_v45 = vld [vmem:[#allocation16 + $0x10] sm:$0xff] }
0x1927   :  { %6839 = vtanh.f32 %v3799_v59  ;;  %v4118_v59 = vld [vmem:[#allocation16 + $0x18] sm:$0xff] }
0x1931   :  { %v6840_v52 = vpop.eup %6839 }
0x1932   :  { %3802 = vrot.lane.b32.xlu1 %v6840_v52, %s7121_s10 }
0x1994   :  { %v3463_v53 = vpop.permute.xlu0 %3462 }
0x1995   :  { %v3465_v25 = vmul.f32 %v6834_v4, %v3463_v53  ;;  %v6621_v53 = vpack.c.bf16 %v4118_v59, %v4117_v45 }
0x1997   :  { %3607 = vrot.lane.b32.xlu0 %v3465_v25, %s7122_s29  ;;  %v5512_v25 = vld [vmem:[#allocation11] ss:$0 sm:$0xff] }
0x19a4   :  { %v3803_v57 = vpop.permute.xlu1 %3802 }
0x19a5   :  { %v3805_v29 = vmul.f32 %v6836_v46, %v3803_v57  ;;  %v5514_v57 = vld [vmem:[#allocation14] ss:$0 sm:$0xff] }
0x19a7   :  { %3807 = vrot.lane.b32.xlu1 %v3805_v29, %s7122_s29 }
0x1a09   :  { %v3608_v58 = vpop.permute.xlu0 %3607 }
0x1a0a   :  { %6227 = vmatmul.mubr.msk.f32.vlgmr.msra.gmra.mrb[38].mxu1 %vm387_vm2, %v3608_v58 }
0x1a0b   :  { %6601 = vmatpush3.bf16.msra.mxu1 %v7585_v35  ;;  %6248 = vmatprep.mubr.msk.f32.mxu1 %vm7119_vm0, %v7120_v2 }
0x1a0c   :  { %6602 = vmatprep.subr.bf16.mxu1 %v7118_v1 }
0x1a0f   :  { %6604 = vmatpush3.bf16.msra.mxu1 %v7595_v39 }
0x1a10   :  { %6611 = vmatprep.subr.bf16.mxu1 %v7118_v1 }
0x1a19   :  { %v3808_v61 = vpop.permute.xlu1 %3807 }
0x1a1a   :  { %6249 = vmatmul.mubr.msk.f32.vlgmr.msra.gmra.mrb[40].mxu1 %vm387_vm2, %v3808_v61 }
0x1a1b   :  { %6270 = vmatprep.mubr.msk.f32.mxu1 %vm7119_vm0, %v7120_v2  ;;  %6613 = vmatpush3.bf16.msra.mxu1 %v6612_v23 }
0x1a1c   :  { %6614 = vmatprep.subr.bf16.mxu1 %v7118_v1 }
0x1a1f   :  { %6616 = vmatpush3.bf16.msra.mxu1 %v6615_v51 }
0x1a20   :  { %6294 = vmatprep.subr.mxu1 %v7120_v2 }
0x1add   :  { %v3677_v62 = vpop.f32.mrb[38].mxu1 }
0x1ade   :  { %v6228_v36 = vpop.f32.mrb[39].mxu1 }
0x1aed   :  { %v3877_v63 = vpop.f32.mrb[40].mxu1 }
0x1aee   :  { %v3878_v0 = vadd.f32 %v3877_v63, %v3677_v62  ;;  %v6250_v35 = vpop.f32.mrb[41].mxu1 }
0x1af0   :  { %v3881_v42 = vadd.f32 %v7964_v17, %v3878_v0 }
0x1af2   :  { %6841 = vtanh.f32 %v3881_v42  ;;  %v5509_v39 = vmul.f32 -1.442695, %v3881_v42 }
0x1af4   :  { %6843 = vpow2.f32 %v5509_v39  ;;  %v5516_v39 = vld [vmem:[%s8215_s17] ss:$0 sm:$0xff] }
0x1afc   :  { %v6842_v49 = vpop.eup %6841 }
0x1afd   :  { %3891 = vrot.lane.b32.xlu0 %v6842_v49, %s7121_s10 }
0x1afe   :  { %v6844_v16 = vpop.eup %6843 }
0x1aff   :  { %v3885_v44 = vadd.f32 1.0, %v6844_v16 }
0x1b01   :  { %6845 = vrcp.f32 %v3885_v44 }
0x1b0b   :  { %v6846_v54 = vpop.eup %6845 }
0x1b0c   :  { %v3889_v7 = vmul.f32 %v6846_v54, %v3459_v38  ;;  %v4115_v38 = vld [vmem:[#allocation16] sm:$0xff] }
0x1b0d   :  { %v6618_v43 = vpack.c.bf16 %v4116_v40, %v4115_v38 }
0x1b6f   :  { %v3892_v3 = vpop.permute.xlu0 %3891 }
0x1b70   :  { %v3894_v5 = vmul.f32 %v6846_v54, %v3892_v3 }
0x1b72   :  { %3896 = vrot.lane.b32.xlu1 %v3894_v5, %s7122_s29 }
0x1be4   :  { %v3897_v60 = vpop.permute.xlu1 %3896 }
0x1be5   :  { %v3899_v8 = vadd.f32 %v3897_v60, %v3889_v7  ;;  %v4510_v60 = vld [vmem:[%s8221_s23] sm:$0xff] }
0x1be7   :  { %6847 = vtanh.f32 %v3899_v8 }
0x1bf1   :  { %v6848_v6 = vpop.eup %6847 }
0x1bf2   :  { %3902 = vrot.lane.b32.xlu0 %v6848_v6, %s7121_s10 }
0x1c64   :  { %v3903_v17 = vpop.permute.xlu0 %3902 }
0x1c65   :  { %v3905_v10 = vmul.f32 %v6846_v54, %v3903_v17 }
0x1c67   :  { %3907 = vrot.lane.b32.xlu1 %v3905_v10, %s7122_s29 }
0x1cd9   :  { %v3908_v12 = vpop.permute.xlu1 %3907 }
0x1cda   :  { %v3910_v14 = vsel %vm387_vm2, %v3908_v12, 0.0 }
0x1cdb   :  { %3911 = vadd.xlane.f32.xlu0 %v3910_v14  ;;  %v4511_v14 = vld [vmem:[%s8221_s23 + $0x8] sm:$0xff] }
0x1cf1   :  { %3934 = vrot.lane.b32.xlu0 %v5510_v32, %s7123_s6 }
0x1d68   :  { %v3912_v34 = vpop.xlane.xlu0 %3911 }
0x1d69   :  { %v3914_v47 = vmul.f32 0.03125, %v3912_v34 }
0x1d6b   :  { %v3915_v11 = vsub.f32 %v3905_v10, %v3914_v47 }
0x1d6c   :  { %v3935_v46 = vpop.permute.xlu0 %3934 }
0x1d6d   :  { %v3916_v56 = vmul.f32 %v3915_v11, %v3915_v11 }
0x1d6f   :  { %3918 = vrot.lane.b32.xlu1 %v3916_v56, %s7122_s29  ;;  %v4512_v56 = vld [vmem:[%s8221_s23 + $0x10] sm:$0xff] }
0x1de1   :  { %v3919_v37 = vpop.permute.xlu1 %3918 }
0x1de2   :  { %v3921_v22 = vsel %vm387_vm2, %v3919_v37, 0.0 }
0x1de3   :  { %3922 = vadd.xlane.f32.xlu1 %v3921_v22 }
0x1df4   :  { %3944 = vrot.lane.b32.xlu1 %v5511_v48, %s7123_s6 }
0x1e70   :  { %v3923_v4 = vpop.xlane.xlu1 %3922 }
0x1e71   :  { %v3924_v30 = vmul.f32 0.03125, %v3923_v4 }
0x1e73   :  { %v3925_v31 = vadd.f32 1e-05, %v3924_v30 }
0x1e74   :  { %v3945_v50 = vpop.permute.xlu1 %3944 }
0x1e75   :  { %6849 = vrsqrt.f32 %v3925_v31 }
0x1e7f   :  { %v6850_v9 = vpop.eup %6849 }
0x1e80   :  { %v3927_v33 = vmul.f32 %v6850_v9, %v3915_v11 }
0x1e82   :  { %v3937_v13 = vmul.f32 %v3935_v46, %v3927_v33 }
0x1e84   :  { %v3947_v15 = vadd.f32 %v3945_v50, %v3937_v13 }
0x1e86   :  { %3960 = vrot.lane.b32.xlu0 %v3947_v15, %s7122_s29  ;;  %s7125_s29 = smov 112  }
0x1ef8   :  { %v3961_v52 = vpop.permute.xlu0 %3960 }
0x1ef9   :  { %6260 = vmatmul.mubr.msk.f32.vlgmr.msra.gmra.mrb[46].mxu0 %vm387_vm2, %v3961_v52  ;;  %6271 = vmatmul.mubr.msk.f32.vlgmr.msra.gmra.mrb[42].mxu1 %vm387_vm2, %v3961_v52 }
0x1efa   :  { %6619 = vmatpush3.bf16.msra.mxu0 %v6618_v43  ;;  %6281 = vmatprep.mubr.msk.f32.mxu0 %vm7119_vm0, %v7120_v2 }
0x1efb   :  { %6620 = vmatprep.subr.bf16.mxu0 %v7118_v1  ;;  %6296 = vmatprep.mubr.msk.f32.mxu1 %vm7119_vm0, %v7120_v2 }
0x1efe   :  { %6622 = vmatpush3.bf16.msra.mxu0 %v6621_v53 }
0x1eff   :  { %6284 = vmatprep.subr.mxu0 %v7120_v2 }
0x1f01   :  { %6282 = vmatmul.mubr.msk.f32.vlgmr.msra.gmra.mrb[48].mxu0 %vm387_vm2, %v3961_v52 }
0x1f02   :  { %6286 = vmatprep.mubr.msk.f32.mxu0 %vm7119_vm0, %v7120_v2 }
0x1fcc   :  { %v4030_v29 = vpop.f32.mrb[46].mxu0  ;;  %v4111_v58 = vpop.f32.mrb[42].mxu1 }
0x1fcd   :  { %v4031_v61 = vadd.f32 %v5512_v25, %v4030_v29  ;;  %v4112_v62 = vadd.f32 %v5514_v57, %v4111_v58  ;;  %v6261_v36 = vpop.f32.mrb[47].mxu0  ;;  %v6272_v63 = vpop.f32.mrb[43].mxu1 }
0x1fce   :  { %v4562_v36 = vld [vmem:[#allocation17] sm:$0xff] }
0x1fcf   :  { %4272 = vrot.lane.b32.xlu1 %v4031_v61, %s7124_s12  ;;  %4274 = vrot.lane.b32.xlu0 %v4112_v62, %s7124_s12 }
0x1fd0   :  { %6285 = vmatpush3.xpose.msk.msra.mxu0 %vm223_vm1, %v4112_v62 }
0x1fd1   :  { %6289 = vmatprep.subr.mxu0 %v7120_v2 }
0x1fd3   :  { %6287 = vmatmul.mubr.msk.f32.vlgmr.msra.gmra.mrb[50].mxu0 %vm223_vm1, %v4031_v61  ;;  %4350 = vrot.lane.b32.xlu1 %v4031_v61, %s7125_s29 }
0x1fd4   :  { %v4192_v0 = vpop.f32.mrb[48].mxu0  ;;  %4352 = vrot.lane.b32.xlu0 %v4112_v62, %s7125_s29  ;;  %6291 = vmatprep.mubr.msk.f32.mxu0 %vm7119_vm0, %v7120_v2 }
0x1fd5   :  { %v6283_v35 = vpop.f32.mrb[49].mxu0  ;;  %v8094_v54 = vadd.f32 %v5516_v39, %v4192_v0 }
0x1fd7   :  { %4428 = vrot.lane.b32.xlu1 %v4031_v61, %s7126_s16  ;;  %v5171_v61 = vld [vmem:[%s8220_s22] sm:$0x1] }
0x1fd8   :  { %4430 = vrot.lane.b32.xlu0 %v4112_v62, %s7126_s16  ;;  %v5173_v62 = vsel %vm5172_vm3, %v5171_v61, -inf }
0x2041   :  { %v4273_v42 = vpop.permute.xlu1 %4272  ;;  %v4275_v49 = vpop.permute.xlu0 %4274 }
0x2042   :  { %6290 = vmatpush3.xpose.msk.msra.mxu0 %vm223_vm1, %v4275_v49 }
0x2043   :  { %6299 = vmatprep.subr.mxu0 %v7120_v2 }
0x2045   :  { %6292 = vmatmul.mubr.msk.f32.vlgmr.msra.gmra.mrb[52].mxu0 %vm223_vm1, %v4273_v42  ;;  %v4351_v44 = vpop.permute.xlu1 %4350 }
0x2046   :  { %v4353_v16 = vpop.permute.xlu0 %4352  ;;  %6301 = vmatprep.mubr.msk.f32.mxu0 %vm7119_vm0, %v7120_v2 }
0x2047   :  { %6295 = vmatpush3.xpose.msk.msra.mxu1 %vm223_vm1, %v4353_v16 }
0x2048   :  { %6304 = vmatprep.subr.mxu1 %v7120_v2 }
0x2049   :  { %v4429_v5 = vpop.permute.xlu1 %4428 }
0x204a   :  { %6297 = vmatmul.mubr.msk.f32.vlgmr.msra.gmra.mrb[44].mxu1 %vm223_vm1, %v4351_v44  ;;  %v4431_v3 = vpop.permute.xlu0 %4430 }
0x204b   :  { %6300 = vmatpush3.xpose.msk.msra.mxu0 %vm223_vm1, %v4431_v3  ;;  %6305 = vmatpush3.msra.mxu1 %v8094_v54 }
0x204c   :  { %6306 = vmatprep.mubr.msk.f32.mxu1 %vm7119_vm0, %v7120_v2  ;;  %6314 = vmatprep.subr.mxu1 %v7120_v2 }
0x204d   :  { %6309 = vmatprep.subr.mxu0 %v7120_v2 }
0x204e   :  { %6302 = vmatmul.mubr.msk.f32.vlgmr.msra.gmra.mrb[54].mxu0 %vm223_vm1, %v4429_v5 }
0x204f   :  { %6311 = vmatprep.mubr.msk.f32.mxu0 %vm7119_vm0, %v7120_v2  ;;  %6310 = vmatpush3.msra.mxu0 %v4562_v36 }
0x2050   :  { %6319 = vmatprep.subr.mxu0 %v7120_v2 }
0x20a6   :  { %v4268_v7 = vpop.f32.mrb[50].mxu0 }
0x20a7   :  { %v4506_v8 = vmul.f32 0.35355338, %v4268_v7  ;;  %v6288_v6 = vpop.f32.mrb[51].mxu0 }
0x20a9   :  { %v4514_v17 = vadd.f32 %v4510_v60, %v4506_v8 }
0x20ab   :  { %v4518_v10 = vsel %vm223_vm1, %v4514_v17, -inf }
0x20ac   :  { %4519 = vmax.xlane.f32.xlu0 %v4518_v10  ;;  %v5184_v10 = vld [vmem:[%s8222_s24] sm:$0x7] }
0x2118   :  { %v4346_v12 = vpop.f32.mrb[52].mxu0 }
0x2119   :  { %v4507_v32 = vmul.f32 0.35355338, %v4346_v12  ;;  %v6293_v34 = vpop.f32.mrb[53].mxu0  ;;  %v4563_v12 = vld [vmem:[#allocation17 + $0x8] sm:$0xff] }
0x211b   :  { %v4515_v47 = vadd.f32 %v4511_v14, %v4507_v32 }
0x211d   :  { %v4424_v11 = vpop.f32.mrb[44].mxu1  ;;  %v4521_v37 = vsel %vm223_vm1, %v4515_v47, -inf }
0x211e   :  { %v4508_v22 = vmul.f32 0.35355338, %v4424_v11  ;;  %v6298_v48 = vpop.f32.mrb[45].mxu1  ;;  %4522 = vmax.xlane.f32.xlu1 %v4521_v37 }
0x2120   :  { %v4516_v18 = vadd.f32 %v4512_v56, %v4508_v22 }
0x2121   :  { %v4502_v55 = vpop.f32.mrb[54].mxu0 }
0x2122   :  { %v4509_v19 = vmul.f32 0.35355338, %v4502_v55  ;;  %v6303_v28 = vpop.f32.mrb[55].mxu0  ;;  %v4524_v20 = vsel %vm223_vm1, %v4516_v18, -inf  ;;  %v4565_v55 = vld [vmem:[#allocation17 + $0x18] sm:$0xff] }
0x2123   :  { %4525 = vmax.xlane.f32.xlu0 %v4524_v20  ;;  %v5342_v28 = vld [vmem:[%s8218_s20] sm:$0xff]  ;;  %v5343_v20 = vld [vmem:[%s8218_s20 + $0x8] sm:$0xff] }
0x2124   :  { %v4517_v21 = vadd.f32 %v4513_v41, %v4509_v19 }
0x2126   :  { %v4527_v23 = vsel %vm223_vm1, %v4517_v21, -inf }
0x2127   :  { %4528 = vmax.xlane.f32.xlu0 %v4527_v23  ;;  %v6624_v23 = vpack.c.bf16 %v5343_v20, %v5342_v28 }
0x2139   :  { %v4520_v24 = vpop.xlane.xlu0 %4519 }
0x213a   :  { %v4530_v26 = vsub.f32 %v4514_v17, %v4520_v24  ;;  %v5345_v24 = vld [vmem:[%s8218_s20 + $0x18] sm:$0xff] }
0x213c   :  { %v4534_v27 = vmul.f32 1.442695, %v4530_v26 }
0x213e   :  { %6851 = vpow2.f32 %v4534_v27 }
0x2148   :  { %v6852_v51 = vpop.eup %6851 }
0x2149   :  { %v4542_v4 = vsel %vm223_vm1, %v6852_v51, 0.0 }
0x214a   :  { %4543 = vadd.xlane.f32.xlu1 %v4542_v4 }
0x215b   :  { %4721 = vrot.lane.b32.xlu1 %v8094_v54, %s7124_s12 }
0x21ab   :  { %v4523_v30 = vpop.xlane.xlu1 %4522 }
0x21ac   :  { %v4531_v31 = vsub.f32 %v4515_v47, %v4523_v30  ;;  %v4564_v47 = vld [vmem:[#allocation17 + $0x10] sm:$0xff] }
0x21ae   :  { %v4536_v9 = vmul.f32 1.442695, %v4531_v31 }
0x21b0   :  { %6853 = vpow2.f32 %v4536_v9  ;;  %v4526_v46 = vpop.xlane.xlu0 %4525  ;;  %v5526_v9 = vld [vmem:[%s8217_s19] ss:$0 sm:$0xff] }
0x21b1   :  { %v4532_v33 = vsub.f32 %v4516_v18, %v4526_v46  ;;  %v5263_v46 = vld [vmem:[%s8223_s25] sm:$0x3] }
0x21b3   :  { %v4538_v50 = vmul.f32 1.442695, %v4532_v33 }
0x21b4   :  { %v4529_v13 = vpop.xlane.xlu0 %4528 }
0x21b5   :  { %6855 = vpow2.f32 %v4538_v50  ;;  %v4533_v15 = vsub.f32 %v4517_v21, %v4529_v13  ;;  %v5344_v21 = vld [vmem:[%s8218_s20 + $0x10] sm:$0xff] }
0x21b6   :  { %v6627_v26 = vpack.c.bf16 %v5345_v24, %v5344_v21 }
0x21b7   :  { %v4540_v38 = vmul.f32 1.442695, %v4533_v15 }
0x21b9   :  { %6857 = vpow2.f32 %v4540_v38 }
0x21ba   :  { %v6854_v40 = vpop.eup %6853 }
0x21bb   :  { %v4545_v43 = vsel %vm223_vm1, %v6854_v40, 0.0 }
0x21bc   :  { %4546 = vadd.xlane.f32.xlu0 %v4545_v43 }
0x21bf   :  { %v6856_v45 = vpop.eup %6855 }
0x21c0   :  { %v4548_v59 = vsel %vm223_vm1, %v6856_v45, 0.0 }
0x21c1   :  { %4549 = vadd.xlane.f32.xlu1 %v4548_v59 }
0x21c3   :  { %v6858_v52 = vpop.eup %6857 }
0x21c4   :  { %v4551_v53 = vsel %vm223_vm1, %v6858_v52, 0.0 }
0x21c5   :  { %4552 = vadd.xlane.f32.xlu0 %v4551_v53 }
0x21d2   :  { %5021 = vrot.lane.b32.xlu1 %v8094_v54, %s7126_s16 }
0x21d7   :  { %v4544_v25 = vpop.xlane.xlu1 %4543 }
0x21d8   :  { %6859 = vrcp.f32 %v4544_v25 }
0x21db   :  { %4871 = vrot.lane.b32.xlu0 %v8094_v54, %s7125_s29  ;;  %v4722_v58 = vpop.permute.xlu1 %4721 }
0x21e2   :  { %v6860_v57 = vpop.eup %6859 }
0x21e3   :  { %v4555_v29 = vmul.f32 %v6860_v57, %v6852_v51 }
0x21e5   :  { %6307 = vmatmul.mubr.msk.f32.vlgmr.msra.gmra.mrb[46].mxu1 %vm223_vm1, %v4555_v29 }
0x21e6   :  { %6315 = vmatpush3.msra.mxu1 %v4722_v58  ;;  %6316 = vmatprep.mubr.msk.f32.mxu1 %vm7119_vm0, %v7120_v2 }
0x21e7   :  { %6324 = vmatprep.subr.mxu1 %v7120_v2 }
0x21f6   :  { %5174 = vmax.xlane.f32.xlu1 %v5173_v62 }
0x2249   :  { %v4547_v63 = vpop.xlane.xlu0 %4546 }
0x224a   :  { %6861 = vrcp.f32 %v4547_v63 }
0x224e   :  { %v4550_v0 = vpop.xlane.xlu1 %4549 }
0x224f   :  { %6863 = vrcp.f32 %v4550_v0 }
0x2252   :  { %v4553_v35 = vpop.xlane.xlu0 %4552  ;;  %v5022_v54 = vpop.permute.xlu1 %5021 }
0x2253   :  { %6865 = vrcp.f32 %v4553_v35 }
0x2254   :  { %v6862_v42 = vpop.eup %6861 }
0x2255   :  { %v4557_v49 = vmul.f32 %v6862_v42, %v6854_v40  ;;  %v5538_v40 = vld [vmem:[#allocation2] ss:$0 sm:$0xff] }
0x2256   :  { %v4872_v39 = vpop.permute.xlu0 %4871 }
0x2257   :  { %6317 = vmatmul.mubr.msk.f32.vlgmr.msra.gmra.mrb[48].mxu1 %vm223_vm1, %v4557_v49 }
0x2258   :  { %6325 = vmatpush3.msra.mxu1 %v4872_v39  ;;  %6326 = vmatprep.mubr.msk.f32.mxu1 %vm7119_vm0, %v7120_v2 }
0x2259   :  { %v6864_v16 = vpop.eup %6863  ;;  %6334 = vmatprep.subr.mxu1 %v7120_v2 }
0x225a   :  { %v4559_v44 = vmul.f32 %v6864_v16, %v6856_v45 }
0x225c   :  { %6327 = vmatmul.mubr.msk.f32.vlgmr.msra.gmra.mrb[50].mxu1 %vm223_vm1, %v4559_v44 }
0x225d   :  { %v6866_v3 = vpop.eup %6865  ;;  %6335 = vmatpush3.msra.mxu1 %v5022_v54  ;;  %6336 = vmatprep.mubr.msk.f32.mxu1 %vm7119_vm0, %v7120_v2 }
0x225e   :  { %v4561_v5 = vmul.f32 %v6866_v3, %v6858_v52  ;;  %6344 = vmatprep.subr.mxu1 %v7120_v2 }
0x2260   :  { %6337 = vmatmul.mubr.msk.f32.vlgmr.msra.gmra.mrb[52].mxu1 %vm223_vm1, %v4561_v5 }
0x2261   :  { %6346 = vmatprep.mubr.msk.f32.mxu1 %vm7119_vm0, %v7120_v2  ;;  %6345 = vmatpush3.msk.msra.mxu1 %vm5189_vm4, %v5184_v10 }
0x2262   :  { %6623 = vmatprep.subr.bf16.mxu1 %v7118_v1 }
0x2283   :  { %v5175_v7 = vpop.xlane.xlu1 %5174 }
0x2284   :  { %v5176_v60 = vsub.f32 %v5171_v61, %v5175_v7 }
0x2286   :  { %v5177_v8 = vmul.f32 1.442695, %v5176_v60 }
0x2288   :  { %6867 = vpow2.f32 %v5177_v8 }
0x2292   :  { %v6868_v6 = vpop.eup %6867 }
0x2293   :  { %v5179_v17 = vsel %vm5172_vm3, %v6868_v6, 0.0 }
0x2294   :  { %5180 = vadd.xlane.f32.xlu0 %v5179_v17 }
0x22b8   :  { %v4642_v14 = vpop.f32.mrb[46].mxu1 }
0x22b9   :  { %v6308_v32 = vpop.f32.mrb[47].mxu1  ;;  %6312 = vmatmul.mubr.msk.f32.vlgmr.msra.gmra.mrb[56].mxu0 %vm223_vm1, %v4642_v14 }
0x22ba   :  { %6320 = vmatpush3.msra.mxu0 %v4563_v12  ;;  %6321 = vmatprep.mubr.msk.f32.mxu0 %vm7119_vm0, %v7120_v2 }
0x22bb   :  { %6329 = vmatprep.subr.mxu0 %v7120_v2 }
0x2321   :  { %v5181_v34 = vpop.xlane.xlu0 %5180 }
0x2322   :  { %6869 = vrcp.f32 %v5181_v34 }
0x232a   :  { %v4793_v11 = vpop.f32.mrb[48].mxu1 }
0x232b   :  { %v6318_v56 = vpop.f32.mrb[49].mxu1  ;;  %6322 = vmatmul.mubr.msk.f32.vlgmr.msra.gmra.mrb[56].mxu0 %vm223_vm1, %v4793_v11 }
0x232c   :  { %v6870_v37 = vpop.eup %6869  ;;  %6330 = vmatpush3.msra.mxu0 %v4564_v47  ;;  %6331 = vmatprep.mubr.msk.f32.mxu0 %vm7119_vm0, %v7120_v2 }
0x232d   :  { %v5183_v22 = vmul.f32 %v6870_v37, %v6868_v6  ;;  %6339 = vmatprep.subr.mxu0 %v7120_v2 }
0x232f   :  { %v4943_v48 = vpop.f32.mrb[50].mxu1  ;;  %6347 = vmatmul.mubr.msk.f32.vlgmr.msra.gmra.mrb[54].mxu1 %vm5185_vm5, %v5183_v22 }
0x2330   :  { %v6328_v18 = vpop.f32.mrb[51].mxu1  ;;  %6362 = vmatprep.mubr.msk.f32.mxu1 %vm7119_vm0, %v7120_v2  ;;  %6625 = vmatpush3.bf16.msra.mxu1 %v6624_v23 }
0x2331   :  { %6626 = vmatprep.subr.bf16.mxu1 %v7118_v1 }
0x2333   :  { %v5093_v41 = vpop.f32.mrb[52].mxu1  ;;  %6332 = vmatmul.mubr.msk.f32.vlgmr.msra.gmra.mrb[56].mxu0 %vm223_vm1, %v4943_v48 }
0x2334   :  { %v6338_v19 = vpop.f32.mrb[53].mxu1  ;;  %6340 = vmatpush3.msra.mxu0 %v4565_v55  ;;  %6341 = vmatprep.mubr.msk.f32.mxu0 %vm7119_vm0, %v7120_v2 }
0x2335   :  { %6349 = vmatprep.subr.mxu0 %v7120_v2  ;;  %6628 = vmatpush3.bf16.msra.mxu1 %v6627_v26 }
0x233b   :  { %6342 = vmatmul.mubr.msk.f32.vlgmr.msra.gmra.mrb[56].mxu0 %vm223_vm1, %v5093_v41 }
0x233c   :  { %6351 = vmatprep.mubr.msk.f32.mxu0 %vm7119_vm0, %v7120_v2  ;;  %v5264_v2 = vlaneseq }
0x233e   :  { %v5265_v4 = vshrl.u32 %v5264_v2, 7 }
0x2340   :  { %v5266_v30 = vsub.s32 0, %v5265_v4 }
0x2402   :  { %v5259_v27 = vpop.f32.mrb[54].mxu1 }
0x2403   :  { %v6348_v51 = vpop.f32.mrb[55].mxu1  ;;  %v5267_v31 = vrot.slane %v5259_v27, %v5266_v30 }
0x2405   :  { %v5268_v15 = vmul.f32 %v5267_v31, %v5263_v46 }
0x240e   :  { %v5166_v33 = vpop.f32.mrb[56].mxu0 }
0x240f   :  { %v6629_v50 = vadd.f32 %v5526_v9, %v5166_v33  ;;  %v6343_v13 = vpop.f32.mrb[57].mxu0 }
0x2411   :  { %6350 = vmatpush3.msra.mxu0 %v6629_v50 }
0x2412   :  { %6352 = vmatmul.mubr.msk.f32.vlgmr.msra.gmra.mrb[58].mxu0 %vm223_vm1, %v5268_v15 }
0x24e5   :  { %v5338_v1 = vpop.f32.mrb[58].mxu0 }
0x24e6   :  { %v6353_v38 = vpop.f32.mrb[59].mxu0  ;;  %6363 = vmatmul.mubr.msk.f32.vlgmr.msra.gmra.mrb[56].mxu1 %vm387_vm2, %v5338_v1 }
0x25b9   :  { %v5422_v43 = vpop.f32.mrb[56].mxu1 }
0x25ba   :  { %v5423_v45 = vadd.f32 %v5538_v40, %v5422_v43  ;;  %v6364_v59 = vpop.f32.mrb[57].mxu1 }
0x25bc   :  { %5427 = vst.msk [vmem:[%s8224_s26] sm:$0x3] %vm5426_vm6, %v5423_v45 }
0x25bd   :  { %5432 = vsyncpa [#allocation4], 1 }
0x25be   :  { %5433 = vsyncpa [#allocation6], 1 }
0x25bf   :  { %5434 = vsyncpa [#allocation9], 1 }
0x25c0   :  { %5435 = vsyncpa [#allocation12], 1 }
0x25c1   :  { %5436 = vsyncpa [#allocation15], 1 }
0x25c2   :  { %5437 = vsyncpa [#allocation18], 1 }

</bundles_post_ra>
